<compile_context>
chip_gen: v5e
topology: v5e:2x2
jax: 0.10.0
libtpu: 0.0.40
codegen_flags: <defaults>
</compile_context>

<pallas_src>
import functools

import jax
import jax.numpy as jnp
from jax import lax
from jax.experimental import pallas as pl
from jax.experimental.pallas import tpu as pltpu


def _upconv_kernel(x_ref, e_ref, w_ref, b_ref, o_ref,
                   up_ref, rhs_ref, res_ref, *, C, H, W, Nb):
    """Fused nearest-2x upsample + 3x3 conv for Nb samples.

    x_ref  : (Nb, C, H*W)             input samples, spatially flat
    e_ref  : (W, 2W+2)         VMEM   0/1 column-upsample+pad selection
    w_ref  : (2C, 9C)          VMEM   row-parity-fused weights,
                                      rows = a*C + o, cols = (3r + kx)*C + i
    b_ref  : (2C, 1)           VMEM   bias tiled over the row parity a
    o_ref  : (Nb, C, 4*H*W)           output in final (C,2H,2W)-contiguous
                                      flat layout (lane = h*4W + a*2W + ww)
    up_ref : (Nb, C, (H+2)*(2W+2)+2)  scratch: column-upsampled, fully padded
                                      plane, rows of width 2W+2, flattened
    rhs_ref: (9C, Nb*H*(2W+2))        scratch: stacked shifted tap views
    res_ref: (2C, Nb*H*(2W+2))        scratch: fused matmul result (VMEM, not
                                      held in registers across the scatter)
    """
    W2 = 2 * W                      # output row width
    Wp = 2 * W + 2                  # padded upsampled row width
    HWp = H * Wp                    # flat plane lanes per sample (data rows)

    for n in range(Nb):
        # Zero only the top/bottom halo rows (+2 spill lanes).  The left/right
        # pad columns of every data row are produced by the selection matmul,
        # so no full-plane memset is needed.
        up_ref[n, :, 0:Wp] = jnp.zeros((C, Wp), jnp.float32)
        up_ref[n, :, (H + 1) * Wp:(H + 2) * Wp + 2] = jnp.zeros(
            (C, Wp + 2), jnp.float32)

        # Column-upsample + horizontal zero-pad each input row straight into
        # the plane.  Exact copy: 0/1 selection matrix at HIGHEST precision.
        for h in range(H):
            up_ref[n, :, (h + 1) * Wp:(h + 2) * Wp] = jnp.dot(
                x_ref[n, :, h * W:(h + 1) * W], e_ref[...],
                preferred_element_type=jnp.float32,
                precision=lax.Precision.HIGHEST)

        # Stack the 9 shifted tap views (r, kx) along sublanes.  Valid output
        # lanes (ww < 2W) never read across a row boundary since
        # ww + kx <= 2W + 1 < Wp; the 2 junk lanes/row are dropped at store.
        for k in range(9):
            r, c = divmod(k, 3)
            rhs_ref[k * C:(k + 1) * C, n * HWp:(n + 1) * HWp] = \
                up_ref[n, :, r * Wp + c:r * Wp + c + HWp]

    # One fused matmul for all 9 taps, both row parities and all Nb samples.
    res_ref[...] = jnp.dot(w_ref[...], rhs_ref[...],
                           preferred_element_type=jnp.float32,
                           precision=lax.Precision.HIGHEST) + b_ref[...]

    # Scatter into the final layout: output rows (2h, 2h+1) occupy lanes
    # [h*4W, h*4W+2W) and [h*4W+2W, (h+1)*4W).  The HBM-side output block
    # stays lane-dense (width 4*H*W), so no post-kernel transpose is needed.
    for n in range(Nb):
        for h in range(H):
            for a in range(2):
                o_ref[n, :, h * 2 * W2 + a * W2:h * 2 * W2 + (a + 1) * W2] = \
                    res_ref[a * C:(a + 1) * C,
                            n * HWp + h * Wp:n * HWp + h * Wp + W2]


def _upsample_kernel(x_ref, s_ref, o_ref, *, Nb):
    # x_ref: (Nb, C, H*W); s_ref: (H*W, 4*H*W) 0/1 selection; o_ref: (Nb, C, 4*H*W)
    # One exact selection matmul per sample, one full-width lane-dense store.
    s = s_ref[...]
    for n in range(Nb):
        o_ref[n] = jnp.dot(x_ref[n], s,
                           preferred_element_type=jnp.float32,
                           precision=lax.Precision.HIGHEST)


def _samples_per_block(N, requested):
    if requested is not None:
        assert N % requested == 0
        return requested
    if N <= 2:
        return 1
    # Largest divisor of N that still leaves >= 2 grid steps (v7x megacore).
    for nb in range(N // 2, 0, -1):
        if N % nb == 0:
            return nb
    return 1


def upsample_forward(x, weight=None, bias=None, *, with_conv,
                     samples_per_block=None):
    """x: (N, C, H, W) f32; weight: (C, C, 3, 3) f32 (OIHW); bias: (C,) f32."""
    N, C, H, W = x.shape
    Nb = _samples_per_block(N, samples_per_block)
    x_flat = x.reshape(N, C, H * W)          # contiguous -> free, lane-dense

    if with_conv:
        Wp = 2 * W + 2
        HWp = H * Wp
        # T[a, r, ky] = 1 iff conv tap ky of output-row-parity a reads padded
        # input row h + r (r in {0,1,2}).  Only the row parity is fused into
        # the weights; columns are handled by the explicit column upsample.
        T = jnp.array([[[1., 0., 0.], [0., 1., 1.], [0., 0., 0.]],
                       [[0., 0., 0.], [1., 1., 0.], [0., 0., 1.]]],
                      dtype=jnp.float32)
        w_mat = jnp.einsum('ark,oikc->aorci', T, weight,
                           precision=lax.Precision.HIGHEST).reshape(2 * C, 9 * C)
        b_vec = jnp.concatenate([bias, bias]).reshape(2 * C, 1)
        # Column-upsample + pad selection: e[w, 1+2w] = e[w, 2+2w] = 1; the
        # pad columns 0 and 2W+1 are never selected, so they come out zero.
        cc = jnp.arange(Wp, dtype=jnp.int32)[None, :]
        ww = jnp.arange(W, dtype=jnp.int32)[:, None]
        e_mat = (((cc - 1) // 2 == ww) & (cc >= 1) & (cc <= 2 * W)
                 ).astype(jnp.float32)

        kern = functools.partial(_upconv_kernel, C=C, H=H, W=W, Nb=Nb)
        # TODO(synk): for large C / spatial sizes, tile the rhs/res lane axis
        # and set vmem_limit_bytes / pl.Buffered(1) on the constant weight
        # spec to stay inside the v7x 64 MiB VMEM budget.
        y = pl.pallas_call(
            kern,
            out_shape=jax.ShapeDtypeStruct((N, C, 4 * H * W), jnp.float32),
            grid=(N // Nb,),
            in_specs=[
                pl.BlockSpec((Nb, C, H * W), lambda n: (n, 0, 0)),
                pl.BlockSpec((W, Wp), lambda n: (0, 0)),
                pl.BlockSpec((2 * C, 9 * C), lambda n: (0, 0)),
                pl.BlockSpec((2 * C, 1), lambda n: (0, 0)),
            ],
            out_specs=pl.BlockSpec((Nb, C, 4 * H * W), lambda n: (n, 0, 0)),
            scratch_shapes=[
                pltpu.VMEM((Nb, C, (H + 2) * Wp + 2), jnp.float32),
                pltpu.VMEM((9 * C, Nb * HWp), jnp.float32),
                pltpu.VMEM((2 * C, Nb * HWp), jnp.float32),
            ],
            compiler_params=pltpu.CompilerParams(
                dimension_semantics=("parallel",)),
        )(x_flat, e_mat, w_mat, b_vec)
        # The kernel already wrote the final layout: this reshape is free.
        return y.reshape(N, C, 2 * H, 2 * W)

    # with_conv=False: pure nearest 2x upsample.  One exact 0/1 selection
    # matmul per sample, writing the final layout with one lane-dense store.
    # TODO(synk): the (HW, 4HW) selection matrix scales quadratically with the
    # spatial size; switch to per-row-pair builds for large H*W.
    src = jnp.arange(H * W, dtype=jnp.int32)[:, None]
    q = jnp.arange(4 * H * W, dtype=jnp.int32)[None, :]
    sel = (src == (q // (4 * W)) * W + (q % (2 * W)) // 2).astype(jnp.float32)

    kern = functools.partial(_upsample_kernel, Nb=Nb)
    y = pl.pallas_call(
        kern,
        out_shape=jax.ShapeDtypeStruct((N, C, 4 * H * W), jnp.float32),
        grid=(N // Nb,),
        in_specs=[
            pl.BlockSpec((Nb, C, H * W), lambda n: (n, 0, 0)),
            pl.BlockSpec((H * W, 4 * H * W), lambda n: (0, 0)),
        ],
        out_specs=pl.BlockSpec((Nb, C, 4 * H * W), lambda n: (n, 0, 0)),
        compiler_params=pltpu.CompilerParams(
            dimension_semantics=("parallel",)),
    )(x_flat, sel)
    return y.reshape(N, C, 2 * H, 2 * W)     # contiguous -> free


def ref_forward(x, weight, bias, *, with_conv):
    """Pure-JAX reference matching PyTorch semantics (nearest 2x + Conv2d(3,1,1))."""
    up = jnp.repeat(jnp.repeat(x, 2, axis=2), 2, axis=3)
    if with_conv:
        up = lax.conv_general_dilated(
            up, weight, window_strides=(1, 1), padding=((1, 1), (1, 1)),
            dimension_numbers=('NCHW', 'OIHW', 'NCHW'),
            precision=lax.Precision.HIGHEST) + bias[None, :, None, None]
    return up


if __name__ == "__main__":
    key = jax.random.PRNGKey(0)
    k1, k2, k3 = jax.random.split(key, 3)
    N, C, H, W = 2, 4, 16, 16

    x = jax.random.normal(k1, (N, C, H, W), jnp.float32)
    # Deterministic Conv2d-style init (uniform in [-1/sqrt(fan_in), 1/sqrt(fan_in)]).
    bound = 1.0 / ((C * 3 * 3) ** 0.5)
    weight = jax.random.uniform(k2, (C, C, 3, 3), jnp.float32, -bound, bound)
    bias = jax.random.uniform(k3, (C,), jnp.float32, -bound, bound)

    y_conv = jax.block_until_ready(upsample_forward(x, weight, bias, with_conv=True))
    y_plain = jax.block_until_ready(upsample_forward(x, with_conv=False))

    ref_conv = ref_forward(x, weight, bias, with_conv=True)
    ref_plain = ref_forward(x, weight, bias, with_conv=False)

    assert y_conv.shape == (N, C, 2 * H, 2 * W)
    assert y_plain.shape == (N, C, 2 * H, 2 * W)
    assert jnp.allclose(y_conv, ref_conv, atol=1e-4, rtol=1e-4), "conv path mismatch"
    assert jnp.allclose(y_plain, ref_plain, atol=1e-5, rtol=1e-5), "upsample path mismatch"
    print("KERNEL_OK")
</pallas_src>

<mosaic_0001>
module attributes {stable_mosaic.version = 11 : i64} {
  func.func @_upconv_kernel(%arg0: i32, %arg1: memref<1x4x256xf32, #tpu.memory_space<vmem>>, %arg2: memref<16x34xf32, #tpu.memory_space<vmem>>, %arg3: memref<8x36xf32, #tpu.memory_space<vmem>>, %arg4: memref<8x1xf32, #tpu.memory_space<vmem>>, %arg5: memref<1x4x1024xf32, #tpu.memory_space<vmem>>, %arg6: memref<1x4x614xf32, #tpu.memory_space<vmem>>, %arg7: memref<36x544xf32, #tpu.memory_space<vmem>>, %arg8: memref<8x544xf32, #tpu.memory_space<vmem>>) attributes {dimension_semantics = [#tpu.dimension_semantics<parallel>], iteration_bounds = array<i64: 2>, scalar_prefetch = 0 : i64, scratch_operands = 3 : i64, tpu.core_type = #tpu.core_type<tc>, window_params = [{transform_indices = @transform_0, window_bounds = array<i64: 1, 4, 256>}, {pipeline_mode = #tpu.pipeline_mode<synchronous>, transform_indices = @transform_1, window_bounds = array<i64: 16, 34>}, {pipeline_mode = #tpu.pipeline_mode<synchronous>, transform_indices = @transform_2, window_bounds = array<i64: 8, 36>}, {pipeline_mode = #tpu.pipeline_mode<synchronous>, transform_indices = @transform_3, window_bounds = array<i64: 8, 1>}, {transform_indices = @transform_4, window_bounds = array<i64: 1, 4, 1024>}]} {
    %cst = arith.constant 0.000000e+00 : f32
    %0 = vector.broadcast %cst : f32 to vector<4x34xf32>
    %c0 = arith.constant 0 : index
    %c0_0 = arith.constant 0 : index
    %c0_1 = arith.constant 0 : index
    %1 = vector.load %arg6[%c0, %c0_0, %c0_1] : memref<1x4x614xf32, #tpu.memory_space<vmem>>, vector<1x4x34xf32>
    %2 = vector.shape_cast %1 : vector<1x4x34xf32> to vector<4x34xf32>
    %3 = vector.shape_cast %0 : vector<4x34xf32> to vector<1x4x34xf32>
    tpu.vector_store %arg6[%c0, %c0_0, %c0_1], %3 {strides = array<i32>} : memref<1x4x614xf32, #tpu.memory_space<vmem>>, vector<1x4x34xf32>,
    %cst_2 = arith.constant 0.000000e+00 : f32
    %4 = vector.broadcast %cst_2 : f32 to vector<4x36xf32>
    %c0_3 = arith.constant 0 : index
    %c0_4 = arith.constant 0 : index
    %c578 = arith.constant 578 : index
    %5 = vector.load %arg6[%c0_3, %c0_4, %c578] : memref<1x4x614xf32, #tpu.memory_space<vmem>>, vector<1x4x36xf32>
    %6 = vector.shape_cast %5 : vector<1x4x36xf32> to vector<4x36xf32>
    %7 = vector.shape_cast %4 : vector<4x36xf32> to vector<1x4x36xf32>
    tpu.vector_store %arg6[%c0_3, %c0_4, %c578], %7 {strides = array<i32>} : memref<1x4x614xf32, #tpu.memory_space<vmem>>, vector<1x4x36xf32>,
    %c0_5 = arith.constant 0 : index
    %c0_6 = arith.constant 0 : index
    %c0_7 = arith.constant 0 : index
    %8 = vector.load %arg1[%c0_5, %c0_6, %c0_7] : memref<1x4x256xf32, #tpu.memory_space<vmem>>, vector<1x4x16xf32>
    %9 = vector.shape_cast %8 : vector<1x4x16xf32> to vector<4x16xf32>
    %c0_8 = arith.constant 0 : index
    %c0_9 = arith.constant 0 : index
    %10 = vector.load %arg2[%c0_8, %c0_9] : memref<16x34xf32, #tpu.memory_space<vmem>>, vector<16x34xf32>
    %cst_10 = arith.constant dense<0.000000e+00> : vector<4x34xf32>
    %11 = tpu.matmul %9, %10, %cst_10 {dimension_numbers = #tpu.dot_dimension_numbers<[1], [0], [0], [1], [0, 0, 1, 1], [], []>, precision = #tpu.contract_precision<fp32>} : vector<4x16xf32>, vector<16x34xf32>, vector<4x34xf32> -> vector<4x34xf32>
    %c0_11 = arith.constant 0 : index
    %c0_12 = arith.constant 0 : index
    %c34 = arith.constant 34 : index
    %12 = vector.load %arg6[%c0_11, %c0_12, %c34] : memref<1x4x614xf32, #tpu.memory_space<vmem>>, vector<1x4x34xf32>
    %13 = vector.shape_cast %12 : vector<1x4x34xf32> to vector<4x34xf32>
    %14 = vector.shape_cast %11 : vector<4x34xf32> to vector<1x4x34xf32>
    tpu.vector_store %arg6[%c0_11, %c0_12, %c34], %14 {strides = array<i32>} : memref<1x4x614xf32, #tpu.memory_space<vmem>>, vector<1x4x34xf32>,
    %c0_13 = arith.constant 0 : index
    %c0_14 = arith.constant 0 : index
    %c16 = arith.constant 16 : index
    %15 = vector.load %arg1[%c0_13, %c0_14, %c16] : memref<1x4x256xf32, #tpu.memory_space<vmem>>, vector<1x4x16xf32>
    %16 = vector.shape_cast %15 : vector<1x4x16xf32> to vector<4x16xf32>
    %c0_15 = arith.constant 0 : index
    %c0_16 = arith.constant 0 : index
    %17 = vector.load %arg2[%c0_15, %c0_16] : memref<16x34xf32, #tpu.memory_space<vmem>>, vector<16x34xf32>
    %cst_17 = arith.constant dense<0.000000e+00> : vector<4x34xf32>
    %18 = tpu.matmul %16, %17, %cst_17 {dimension_numbers = #tpu.dot_dimension_numbers<[1], [0], [0], [1], [0, 0, 1, 1], [], []>, precision = #tpu.contract_precision<fp32>} : vector<4x16xf32>, vector<16x34xf32>, vector<4x34xf32> -> vector<4x34xf32>
    %c0_18 = arith.constant 0 : index
    %c0_19 = arith.constant 0 : index
    %c68 = arith.constant 68 : index
    %19 = vector.load %arg6[%c0_18, %c0_19, %c68] : memref<1x4x614xf32, #tpu.memory_space<vmem>>, vector<1x4x34xf32>
    %20 = vector.shape_cast %19 : vector<1x4x34xf32> to vector<4x34xf32>
    %21 = vector.shape_cast %18 : vector<4x34xf32> to vector<1x4x34xf32>
    tpu.vector_store %arg6[%c0_18, %c0_19, %c68], %21 {strides = array<i32>} : memref<1x4x614xf32, #tpu.memory_space<vmem>>, vector<1x4x34xf32>,
    %c0_20 = arith.constant 0 : index
    %c0_21 = arith.constant 0 : index
    %c32 = arith.constant 32 : index
    %22 = vector.load %arg1[%c0_20, %c0_21, %c32] : memref<1x4x256xf32, #tpu.memory_space<vmem>>, vector<1x4x16xf32>
    %23 = vector.shape_cast %22 : vector<1x4x16xf32> to vector<4x16xf32>
    %c0_22 = arith.constant 0 : index
    %c0_23 = arith.constant 0 : index
    %24 = vector.load %arg2[%c0_22, %c0_23] : memref<16x34xf32, #tpu.memory_space<vmem>>, vector<16x34xf32>
    %cst_24 = arith.constant dense<0.000000e+00> : vector<4x34xf32>
    %25 = tpu.matmul %23, %24, %cst_24 {dimension_numbers = #tpu.dot_dimension_numbers<[1], [0], [0], [1], [0, 0, 1, 1], [], []>, precision = #tpu.contract_precision<fp32>} : vector<4x16xf32>, vector<16x34xf32>, vector<4x34xf32> -> vector<4x34xf32>
    %c0_25 = arith.constant 0 : index
    %c0_26 = arith.constant 0 : index
    %c102 = arith.constant 102 : index
    %26 = vector.load %arg6[%c0_25, %c0_26, %c102] : memref<1x4x614xf32, #tpu.memory_space<vmem>>, vector<1x4x34xf32>
    %27 = vector.shape_cast %26 : vector<1x4x34xf32> to vector<4x34xf32>
    %28 = vector.shape_cast %25 : vector<4x34xf32> to vector<1x4x34xf32>
    tpu.vector_store %arg6[%c0_25, %c0_26, %c102], %28 {strides = array<i32>} : memref<1x4x614xf32, #tpu.memory_space<vmem>>, vector<1x4x34xf32>,
    %c0_27 = arith.constant 0 : index
    %c0_28 = arith.constant 0 : index
    %c48 = arith.constant 48 : index
    %29 = vector.load %arg1[%c0_27, %c0_28, %c48] : memref<1x4x256xf32, #tpu.memory_space<vmem>>, vector<1x4x16xf32>
    %30 = vector.shape_cast %29 : vector<1x4x16xf32> to vector<4x16xf32>
    %c0_29 = arith.constant 0 : index
    %c0_30 = arith.constant 0 : index
    %31 = vector.load %arg2[%c0_29, %c0_30] : memref<16x34xf32, #tpu.memory_space<vmem>>, vector<16x34xf32>
    %cst_31 = arith.constant dense<0.000000e+00> : vector<4x34xf32>
    %32 = tpu.matmul %30, %31, %cst_31 {dimension_numbers = #tpu.dot_dimension_numbers<[1], [0], [0], [1], [0, 0, 1, 1], [], []>, precision = #tpu.contract_precision<fp32>} : vector<4x16xf32>, vector<16x34xf32>, vector<4x34xf32> -> vector<4x34xf32>
    %c0_32 = arith.constant 0 : index
    %c0_33 = arith.constant 0 : index
    %c136 = arith.constant 136 : index
    %33 = vector.load %arg6[%c0_32, %c0_33, %c136] : memref<1x4x614xf32, #tpu.memory_space<vmem>>, vector<1x4x34xf32>
    %34 = vector.shape_cast %33 : vector<1x4x34xf32> to vector<4x34xf32>
    %35 = vector.shape_cast %32 : vector<4x34xf32> to vector<1x4x34xf32>
    tpu.vector_store %arg6[%c0_32, %c0_33, %c136], %35 {strides = array<i32>} : memref<1x4x614xf32, #tpu.memory_space<vmem>>, vector<1x4x34xf32>,
    %c0_34 = arith.constant 0 : index
    %c0_35 = arith.constant 0 : index
    %c64 = arith.constant 64 : index
    %36 = vector.load %arg1[%c0_34, %c0_35, %c64] : memref<1x4x256xf32, #tpu.memory_space<vmem>>, vector<1x4x16xf32>
    %37 = vector.shape_cast %36 : vector<1x4x16xf32> to vector<4x16xf32>
    %c0_36 = arith.constant 0 : index
    %c0_37 = arith.constant 0 : index
    %38 = vector.load %arg2[%c0_36, %c0_37] : memref<16x34xf32, #tpu.memory_space<vmem>>, vector<16x34xf32>
    %cst_38 = arith.constant dense<0.000000e+00> : vector<4x34xf32>
    %39 = tpu.matmul %37, %38, %cst_38 {dimension_numbers = #tpu.dot_dimension_numbers<[1], [0], [0], [1], [0, 0, 1, 1], [], []>, precision = #tpu.contract_precision<fp32>} : vector<4x16xf32>, vector<16x34xf32>, vector<4x34xf32> -> vector<4x34xf32>
    %c0_39 = arith.constant 0 : index
    %c0_40 = arith.constant 0 : index
    %c170 = arith.constant 170 : index
    %40 = vector.load %arg6[%c0_39, %c0_40, %c170] : memref<1x4x614xf32, #tpu.memory_space<vmem>>, vector<1x4x34xf32>
    %41 = vector.shape_cast %40 : vector<1x4x34xf32> to vector<4x34xf32>
    %42 = vector.shape_cast %39 : vector<4x34xf32> to vector<1x4x34xf32>
    tpu.vector_store %arg6[%c0_39, %c0_40, %c170], %42 {strides = array<i32>} : memref<1x4x614xf32, #tpu.memory_space<vmem>>, vector<1x4x34xf32>,
    %c0_41 = arith.constant 0 : index
    %c0_42 = arith.constant 0 : index
    %c80 = arith.constant 80 : index
    %43 = vector.load %arg1[%c0_41, %c0_42, %c80] : memref<1x4x256xf32, #tpu.memory_space<vmem>>, vector<1x4x16xf32>
    %44 = vector.shape_cast %43 : vector<1x4x16xf32> to vector<4x16xf32>
    %c0_43 = arith.constant 0 : index
    %c0_44 = arith.constant 0 : index
    %45 = vector.load %arg2[%c0_43, %c0_44] : memref<16x34xf32, #tpu.memory_space<vmem>>, vector<16x34xf32>
    %cst_45 = arith.constant dense<0.000000e+00> : vector<4x34xf32>
    %46 = tpu.matmul %44, %45, %cst_45 {dimension_numbers = #tpu.dot_dimension_numbers<[1], [0], [0], [1], [0, 0, 1, 1], [], []>, precision = #tpu.contract_precision<fp32>} : vector<4x16xf32>, vector<16x34xf32>, vector<4x34xf32> -> vector<4x34xf32>
    %c0_46 = arith.constant 0 : index
    %c0_47 = arith.constant 0 : index
    %c204 = arith.constant 204 : index
    %47 = vector.load %arg6[%c0_46, %c0_47, %c204] : memref<1x4x614xf32, #tpu.memory_space<vmem>>, vector<1x4x34xf32>
    %48 = vector.shape_cast %47 : vector<1x4x34xf32> to vector<4x34xf32>
    %49 = vector.shape_cast %46 : vector<4x34xf32> to vector<1x4x34xf32>
    tpu.vector_store %arg6[%c0_46, %c0_47, %c204], %49 {strides = array<i32>} : memref<1x4x614xf32, #tpu.memory_space<vmem>>, vector<1x4x34xf32>,
    %c0_48 = arith.constant 0 : index
    %c0_49 = arith.constant 0 : index
    %c96 = arith.constant 96 : index
    %50 = vector.load %arg1[%c0_48, %c0_49, %c96] : memref<1x4x256xf32, #tpu.memory_space<vmem>>, vector<1x4x16xf32>
    %51 = vector.shape_cast %50 : vector<1x4x16xf32> to vector<4x16xf32>
    %c0_50 = arith.constant 0 : index
    %c0_51 = arith.constant 0 : index
    %52 = vector.load %arg2[%c0_50, %c0_51] : memref<16x34xf32, #tpu.memory_space<vmem>>, vector<16x34xf32>
    %cst_52 = arith.constant dense<0.000000e+00> : vector<4x34xf32>
    %53 = tpu.matmul %51, %52, %cst_52 {dimension_numbers = #tpu.dot_dimension_numbers<[1], [0], [0], [1], [0, 0, 1, 1], [], []>, precision = #tpu.contract_precision<fp32>} : vector<4x16xf32>, vector<16x34xf32>, vector<4x34xf32> -> vector<4x34xf32>
    %c0_53 = arith.constant 0 : index
    %c0_54 = arith.constant 0 : index
    %c238 = arith.constant 238 : index
    %54 = vector.load %arg6[%c0_53, %c0_54, %c238] : memref<1x4x614xf32, #tpu.memory_space<vmem>>, vector<1x4x34xf32>
    %55 = vector.shape_cast %54 : vector<1x4x34xf32> to vector<4x34xf32>
    %56 = vector.shape_cast %53 : vector<4x34xf32> to vector<1x4x34xf32>
    tpu.vector_store %arg6[%c0_53, %c0_54, %c238], %56 {strides = array<i32>} : memref<1x4x614xf32, #tpu.memory_space<vmem>>, vector<1x4x34xf32>,
    %c0_55 = arith.constant 0 : index
    %c0_56 = arith.constant 0 : index
    %c112 = arith.constant 112 : index
    %57 = vector.load %arg1[%c0_55, %c0_56, %c112] : memref<1x4x256xf32, #tpu.memory_space<vmem>>, vector<1x4x16xf32>
    %58 = vector.shape_cast %57 : vector<1x4x16xf32> to vector<4x16xf32>
    %c0_57 = arith.constant 0 : index
    %c0_58 = arith.constant 0 : index
    %59 = vector.load %arg2[%c0_57, %c0_58] : memref<16x34xf32, #tpu.memory_space<vmem>>, vector<16x34xf32>
    %cst_59 = arith.constant dense<0.000000e+00> : vector<4x34xf32>
    %60 = tpu.matmul %58, %59, %cst_59 {dimension_numbers = #tpu.dot_dimension_numbers<[1], [0], [0], [1], [0, 0, 1, 1], [], []>, precision = #tpu.contract_precision<fp32>} : vector<4x16xf32>, vector<16x34xf32>, vector<4x34xf32> -> vector<4x34xf32>
    %c0_60 = arith.constant 0 : index
    %c0_61 = arith.constant 0 : index
    %c272 = arith.constant 272 : index
    %61 = vector.load %arg6[%c0_60, %c0_61, %c272] : memref<1x4x614xf32, #tpu.memory_space<vmem>>, vector<1x4x34xf32>
    %62 = vector.shape_cast %61 : vector<1x4x34xf32> to vector<4x34xf32>
    %63 = vector.shape_cast %60 : vector<4x34xf32> to vector<1x4x34xf32>
    tpu.vector_store %arg6[%c0_60, %c0_61, %c272], %63 {strides = array<i32>} : memref<1x4x614xf32, #tpu.memory_space<vmem>>, vector<1x4x34xf32>,
    %c0_62 = arith.constant 0 : index
    %c0_63 = arith.constant 0 : index
    %c128 = arith.constant 128 : index
    %64 = vector.load %arg1[%c0_62, %c0_63, %c128] : memref<1x4x256xf32, #tpu.memory_space<vmem>>, vector<1x4x16xf32>
    %65 = vector.shape_cast %64 : vector<1x4x16xf32> to vector<4x16xf32>
    %c0_64 = arith.constant 0 : index
    %c0_65 = arith.constant 0 : index
    %66 = vector.load %arg2[%c0_64, %c0_65] : memref<16x34xf32, #tpu.memory_space<vmem>>, vector<16x34xf32>
    %cst_66 = arith.constant dense<0.000000e+00> : vector<4x34xf32>
    %67 = tpu.matmul %65, %66, %cst_66 {dimension_numbers = #tpu.dot_dimension_numbers<[1], [0], [0], [1], [0, 0, 1, 1], [], []>, precision = #tpu.contract_precision<fp32>} : vector<4x16xf32>, vector<16x34xf32>, vector<4x34xf32> -> vector<4x34xf32>
    %c0_67 = arith.constant 0 : index
    %c0_68 = arith.constant 0 : index
    %c306 = arith.constant 306 : index
    %68 = vector.load %arg6[%c0_67, %c0_68, %c306] : memref<1x4x614xf32, #tpu.memory_space<vmem>>, vector<1x4x34xf32>
    %69 = vector.shape_cast %68 : vector<1x4x34xf32> to vector<4x34xf32>
    %70 = vector.shape_cast %67 : vector<4x34xf32> to vector<1x4x34xf32>
    tpu.vector_store %arg6[%c0_67, %c0_68, %c306], %70 {strides = array<i32>} : memref<1x4x614xf32, #tpu.memory_space<vmem>>, vector<1x4x34xf32>,
    %c0_69 = arith.constant 0 : index
    %c0_70 = arith.constant 0 : index
    %c144 = arith.constant 144 : index
    %71 = vector.load %arg1[%c0_69, %c0_70, %c144] : memref<1x4x256xf32, #tpu.memory_space<vmem>>, vector<1x4x16xf32>
    %72 = vector.shape_cast %71 : vector<1x4x16xf32> to vector<4x16xf32>
    %c0_71 = arith.constant 0 : index
    %c0_72 = arith.constant 0 : index
    %73 = vector.load %arg2[%c0_71, %c0_72] : memref<16x34xf32, #tpu.memory_space<vmem>>, vector<16x34xf32>
    %cst_73 = arith.constant dense<0.000000e+00> : vector<4x34xf32>
    %74 = tpu.matmul %72, %73, %cst_73 {dimension_numbers = #tpu.dot_dimension_numbers<[1], [0], [0], [1], [0, 0, 1, 1], [], []>, precision = #tpu.contract_precision<fp32>} : vector<4x16xf32>, vector<16x34xf32>, vector<4x34xf32> -> vector<4x34xf32>
    %c0_74 = arith.constant 0 : index
    %c0_75 = arith.constant 0 : index
    %c340 = arith.constant 340 : index
    %75 = vector.load %arg6[%c0_74, %c0_75, %c340] : memref<1x4x614xf32, #tpu.memory_space<vmem>>, vector<1x4x34xf32>
    %76 = vector.shape_cast %75 : vector<1x4x34xf32> to vector<4x34xf32>
    %77 = vector.shape_cast %74 : vector<4x34xf32> to vector<1x4x34xf32>
    tpu.vector_store %arg6[%c0_74, %c0_75, %c340], %77 {strides = array<i32>} : memref<1x4x614xf32, #tpu.memory_space<vmem>>, vector<1x4x34xf32>,
    %c0_76 = arith.constant 0 : index
    %c0_77 = arith.constant 0 : index
    %c160 = arith.constant 160 : index
    %78 = vector.load %arg1[%c0_76, %c0_77, %c160] : memref<1x4x256xf32, #tpu.memory_space<vmem>>, vector<1x4x16xf32>
    %79 = vector.shape_cast %78 : vector<1x4x16xf32> to vector<4x16xf32>
    %c0_78 = arith.constant 0 : index
    %c0_79 = arith.constant 0 : index
    %80 = vector.load %arg2[%c0_78, %c0_79] : memref<16x34xf32, #tpu.memory_space<vmem>>, vector<16x34xf32>
    %cst_80 = arith.constant dense<0.000000e+00> : vector<4x34xf32>
    %81 = tpu.matmul %79, %80, %cst_80 {dimension_numbers = #tpu.dot_dimension_numbers<[1], [0], [0], [1], [0, 0, 1, 1], [], []>, precision = #tpu.contract_precision<fp32>} : vector<4x16xf32>, vector<16x34xf32>, vector<4x34xf32> -> vector<4x34xf32>
    %c0_81 = arith.constant 0 : index
    %c0_82 = arith.constant 0 : index
    %c374 = arith.constant 374 : index
    %82 = vector.load %arg6[%c0_81, %c0_82, %c374] : memref<1x4x614xf32, #tpu.memory_space<vmem>>, vector<1x4x34xf32>
    %83 = vector.shape_cast %82 : vector<1x4x34xf32> to vector<4x34xf32>
    %84 = vector.shape_cast %81 : vector<4x34xf32> to vector<1x4x34xf32>
    tpu.vector_store %arg6[%c0_81, %c0_82, %c374], %84 {strides = array<i32>} : memref<1x4x614xf32, #tpu.memory_space<vmem>>, vector<1x4x34xf32>,
    %c0_83 = arith.constant 0 : index
    %c0_84 = arith.constant 0 : index
    %c176 = arith.constant 176 : index
    %85 = vector.load %arg1[%c0_83, %c0_84, %c176] : memref<1x4x256xf32, #tpu.memory_space<vmem>>, vector<1x4x16xf32>
    %86 = vector.shape_cast %85 : vector<1x4x16xf32> to vector<4x16xf32>
    %c0_85 = arith.constant 0 : index
    %c0_86 = arith.constant 0 : index
    %87 = vector.load %arg2[%c0_85, %c0_86] : memref<16x34xf32, #tpu.memory_space<vmem>>, vector<16x34xf32>
    %cst_87 = arith.constant dense<0.000000e+00> : vector<4x34xf32>
    %88 = tpu.matmul %86, %87, %cst_87 {dimension_numbers = #tpu.dot_dimension_numbers<[1], [0], [0], [1], [0, 0, 1, 1], [], []>, precision = #tpu.contract_precision<fp32>} : vector<4x16xf32>, vector<16x34xf32>, vector<4x34xf32> -> vector<4x34xf32>
    %c0_88 = arith.constant 0 : index
    %c0_89 = arith.constant 0 : index
    %c408 = arith.constant 408 : index
    %89 = vector.load %arg6[%c0_88, %c0_89, %c408] : memref<1x4x614xf32, #tpu.memory_space<vmem>>, vector<1x4x34xf32>
    %90 = vector.shape_cast %89 : vector<1x4x34xf32> to vector<4x34xf32>
    %91 = vector.shape_cast %88 : vector<4x34xf32> to vector<1x4x34xf32>
    tpu.vector_store %arg6[%c0_88, %c0_89, %c408], %91 {strides = array<i32>} : memref<1x4x614xf32, #tpu.memory_space<vmem>>, vector<1x4x34xf32>,
    %c0_90 = arith.constant 0 : index
    %c0_91 = arith.constant 0 : index
    %c192 = arith.constant 192 : index
    %92 = vector.load %arg1[%c0_90, %c0_91, %c192] : memref<1x4x256xf32, #tpu.memory_space<vmem>>, vector<1x4x16xf32>
    %93 = vector.shape_cast %92 : vector<1x4x16xf32> to vector<4x16xf32>
    %c0_92 = arith.constant 0 : index
    %c0_93 = arith.constant 0 : index
    %94 = vector.load %arg2[%c0_92, %c0_93] : memref<16x34xf32, #tpu.memory_space<vmem>>, vector<16x34xf32>
    %cst_94 = arith.constant dense<0.000000e+00> : vector<4x34xf32>
    %95 = tpu.matmul %93, %94, %cst_94 {dimension_numbers = #tpu.dot_dimension_numbers<[1], [0], [0], [1], [0, 0, 1, 1], [], []>, precision = #tpu.contract_precision<fp32>} : vector<4x16xf32>, vector<16x34xf32>, vector<4x34xf32> -> vector<4x34xf32>
    %c0_95 = arith.constant 0 : index
    %c0_96 = arith.constant 0 : index
    %c442 = arith.constant 442 : index
    %96 = vector.load %arg6[%c0_95, %c0_96, %c442] : memref<1x4x614xf32, #tpu.memory_space<vmem>>, vector<1x4x34xf32>
    %97 = vector.shape_cast %96 : vector<1x4x34xf32> to vector<4x34xf32>
    %98 = vector.shape_cast %95 : vector<4x34xf32> to vector<1x4x34xf32>
    tpu.vector_store %arg6[%c0_95, %c0_96, %c442], %98 {strides = array<i32>} : memref<1x4x614xf32, #tpu.memory_space<vmem>>, vector<1x4x34xf32>,
    %c0_97 = arith.constant 0 : index
    %c0_98 = arith.constant 0 : index
    %c208 = arith.constant 208 : index
    %99 = vector.load %arg1[%c0_97, %c0_98, %c208] : memref<1x4x256xf32, #tpu.memory_space<vmem>>, vector<1x4x16xf32>
    %100 = vector.shape_cast %99 : vector<1x4x16xf32> to vector<4x16xf32>
    %c0_99 = arith.constant 0 : index
    %c0_100 = arith.constant 0 : index
    %101 = vector.load %arg2[%c0_99, %c0_100] : memref<16x34xf32, #tpu.memory_space<vmem>>, vector<16x34xf32>
    %cst_101 = arith.constant dense<0.000000e+00> : vector<4x34xf32>
    %102 = tpu.matmul %100, %101, %cst_101 {dimension_numbers = #tpu.dot_dimension_numbers<[1], [0], [0], [1], [0, 0, 1, 1], [], []>, precision = #tpu.contract_precision<fp32>} : vector<4x16xf32>, vector<16x34xf32>, vector<4x34xf32> -> vector<4x34xf32>
    %c0_102 = arith.constant 0 : index
    %c0_103 = arith.constant 0 : index
    %c476 = arith.constant 476 : index
    %103 = vector.load %arg6[%c0_102, %c0_103, %c476] : memref<1x4x614xf32, #tpu.memory_space<vmem>>, vector<1x4x34xf32>
    %104 = vector.shape_cast %103 : vector<1x4x34xf32> to vector<4x34xf32>
    %105 = vector.shape_cast %102 : vector<4x34xf32> to vector<1x4x34xf32>
    tpu.vector_store %arg6[%c0_102, %c0_103, %c476], %105 {strides = array<i32>} : memref<1x4x614xf32, #tpu.memory_space<vmem>>, vector<1x4x34xf32>,
    %c0_104 = arith.constant 0 : index
    %c0_105 = arith.constant 0 : index
    %c224 = arith.constant 224 : index
    %106 = vector.load %arg1[%c0_104, %c0_105, %c224] : memref<1x4x256xf32, #tpu.memory_space<vmem>>, vector<1x4x16xf32>
    %107 = vector.shape_cast %106 : vector<1x4x16xf32> to vector<4x16xf32>
    %c0_106 = arith.constant 0 : index
    %c0_107 = arith.constant 0 : index
    %108 = vector.load %arg2[%c0_106, %c0_107] : memref<16x34xf32, #tpu.memory_space<vmem>>, vector<16x34xf32>
    %cst_108 = arith.constant dense<0.000000e+00> : vector<4x34xf32>
    %109 = tpu.matmul %107, %108, %cst_108 {dimension_numbers = #tpu.dot_dimension_numbers<[1], [0], [0], [1], [0, 0, 1, 1], [], []>, precision = #tpu.contract_precision<fp32>} : vector<4x16xf32>, vector<16x34xf32>, vector<4x34xf32> -> vector<4x34xf32>
    %c0_109 = arith.constant 0 : index
    %c0_110 = arith.constant 0 : index
    %c510 = arith.constant 510 : index
    %110 = vector.load %arg6[%c0_109, %c0_110, %c510] : memref<1x4x614xf32, #tpu.memory_space<vmem>>, vector<1x4x34xf32>
    %111 = vector.shape_cast %110 : vector<1x4x34xf32> to vector<4x34xf32>
    %112 = vector.shape_cast %109 : vector<4x34xf32> to vector<1x4x34xf32>
    tpu.vector_store %arg6[%c0_109, %c0_110, %c510], %112 {strides = array<i32>} : memref<1x4x614xf32, #tpu.memory_space<vmem>>, vector<1x4x34xf32>,
    %c0_111 = arith.constant 0 : index
    %c0_112 = arith.constant 0 : index
    %c240 = arith.constant 240 : index
    %113 = vector.load %arg1[%c0_111, %c0_112, %c240] : memref<1x4x256xf32, #tpu.memory_space<vmem>>, vector<1x4x16xf32>
    %114 = vector.shape_cast %113 : vector<1x4x16xf32> to vector<4x16xf32>
    %c0_113 = arith.constant 0 : index
    %c0_114 = arith.constant 0 : index
    %115 = vector.load %arg2[%c0_113, %c0_114] : memref<16x34xf32, #tpu.memory_space<vmem>>, vector<16x34xf32>
    %cst_115 = arith.constant dense<0.000000e+00> : vector<4x34xf32>
    %116 = tpu.matmul %114, %115, %cst_115 {dimension_numbers = #tpu.dot_dimension_numbers<[1], [0], [0], [1], [0, 0, 1, 1], [], []>, precision = #tpu.contract_precision<fp32>} : vector<4x16xf32>, vector<16x34xf32>, vector<4x34xf32> -> vector<4x34xf32>
    %c0_116 = arith.constant 0 : index
    %c0_117 = arith.constant 0 : index
    %c544 = arith.constant 544 : index
    %117 = vector.load %arg6[%c0_116, %c0_117, %c544] : memref<1x4x614xf32, #tpu.memory_space<vmem>>, vector<1x4x34xf32>
    %118 = vector.shape_cast %117 : vector<1x4x34xf32> to vector<4x34xf32>
    %119 = vector.shape_cast %116 : vector<4x34xf32> to vector<1x4x34xf32>
    tpu.vector_store %arg6[%c0_116, %c0_117, %c544], %119 {strides = array<i32>} : memref<1x4x614xf32, #tpu.memory_space<vmem>>, vector<1x4x34xf32>,
    %c0_118 = arith.constant 0 : index
    %c0_119 = arith.constant 0 : index
    %c0_120 = arith.constant 0 : index
    %120 = vector.load %arg6[%c0_118, %c0_119, %c0_120] : memref<1x4x614xf32, #tpu.memory_space<vmem>>, vector<1x4x544xf32>
    %121 = vector.shape_cast %120 : vector<1x4x544xf32> to vector<4x544xf32>
    %c0_121 = arith.constant 0 : index
    %c0_122 = arith.constant 0 : index
    %122 = vector.load %arg7[%c0_121, %c0_122] : memref<36x544xf32, #tpu.memory_space<vmem>>, vector<4x544xf32>
    tpu.vector_store %arg7[%c0_121, %c0_122], %121 {strides = array<i32>} : memref<36x544xf32, #tpu.memory_space<vmem>>, vector<4x544xf32>,
    %c0_123 = arith.constant 0 : index
    %c0_124 = arith.constant 0 : index
    %c1 = arith.constant 1 : index
    %123 = vector.load %arg6[%c0_123, %c0_124, %c1] : memref<1x4x614xf32, #tpu.memory_space<vmem>>, vector<1x4x544xf32>
    %124 = vector.shape_cast %123 : vector<1x4x544xf32> to vector<4x544xf32>
    %c4 = arith.constant 4 : index
    %c0_125 = arith.constant 0 : index
    %125 = vector.load %arg7[%c4, %c0_125] : memref<36x544xf32, #tpu.memory_space<vmem>>, vector<4x544xf32>
    tpu.vector_store %arg7[%c4, %c0_125], %124 {strides = array<i32>} : memref<36x544xf32, #tpu.memory_space<vmem>>, vector<4x544xf32>,
    %c0_126 = arith.constant 0 : index
    %c0_127 = arith.constant 0 : index
    %c2 = arith.constant 2 : index
    %126 = vector.load %arg6[%c0_126, %c0_127, %c2] : memref<1x4x614xf32, #tpu.memory_space<vmem>>, vector<1x4x544xf32>
    %127 = vector.shape_cast %126 : vector<1x4x544xf32> to vector<4x544xf32>
    %c8 = arith.constant 8 : index
    %c0_128 = arith.constant 0 : index
    %128 = vector.load %arg7[%c8, %c0_128] : memref<36x544xf32, #tpu.memory_space<vmem>>, vector<4x544xf32>
    tpu.vector_store %arg7[%c8, %c0_128], %127 {strides = array<i32>} : memref<36x544xf32, #tpu.memory_space<vmem>>, vector<4x544xf32>,
    %c0_129 = arith.constant 0 : index
    %c0_130 = arith.constant 0 : index
    %c34_131 = arith.constant 34 : index
    %129 = vector.load %arg6[%c0_129, %c0_130, %c34_131] : memref<1x4x614xf32, #tpu.memory_space<vmem>>, vector<1x4x544xf32>
    %130 = vector.shape_cast %129 : vector<1x4x544xf32> to vector<4x544xf32>
    %c12 = arith.constant 12 : index
    %c0_132 = arith.constant 0 : index
    %131 = vector.load %arg7[%c12, %c0_132] : memref<36x544xf32, #tpu.memory_space<vmem>>, vector<4x544xf32>
    tpu.vector_store %arg7[%c12, %c0_132], %130 {strides = array<i32>} : memref<36x544xf32, #tpu.memory_space<vmem>>, vector<4x544xf32>,
    %c0_133 = arith.constant 0 : index
    %c0_134 = arith.constant 0 : index
    %c35 = arith.constant 35 : index
    %132 = vector.load %arg6[%c0_133, %c0_134, %c35] : memref<1x4x614xf32, #tpu.memory_space<vmem>>, vector<1x4x544xf32>
    %133 = vector.shape_cast %132 : vector<1x4x544xf32> to vector<4x544xf32>
    %c16_135 = arith.constant 16 : index
    %c0_136 = arith.constant 0 : index
    %134 = vector.load %arg7[%c16_135, %c0_136] : memref<36x544xf32, #tpu.memory_space<vmem>>, vector<4x544xf32>
    tpu.vector_store %arg7[%c16_135, %c0_136], %133 {strides = array<i32>} : memref<36x544xf32, #tpu.memory_space<vmem>>, vector<4x544xf32>,
    %c0_137 = arith.constant 0 : index
    %c0_138 = arith.constant 0 : index
    %c36 = arith.constant 36 : index
    %135 = vector.load %arg6[%c0_137, %c0_138, %c36] : memref<1x4x614xf32, #tpu.memory_space<vmem>>, vector<1x4x544xf32>
    %136 = vector.shape_cast %135 : vector<1x4x544xf32> to vector<4x544xf32>
    %c20 = arith.constant 20 : index
    %c0_139 = arith.constant 0 : index
    %137 = vector.load %arg7[%c20, %c0_139] : memref<36x544xf32, #tpu.memory_space<vmem>>, vector<4x544xf32>
    tpu.vector_store %arg7[%c20, %c0_139], %136 {strides = array<i32>} : memref<36x544xf32, #tpu.memory_space<vmem>>, vector<4x544xf32>,
    %c0_140 = arith.constant 0 : index
    %c0_141 = arith.constant 0 : index
    %c68_142 = arith.constant 68 : index
    %138 = vector.load %arg6[%c0_140, %c0_141, %c68_142] : memref<1x4x614xf32, #tpu.memory_space<vmem>>, vector<1x4x544xf32>
    %139 = vector.shape_cast %138 : vector<1x4x544xf32> to vector<4x544xf32>
    %c24 = arith.constant 24 : index
    %c0_143 = arith.constant 0 : index
    %140 = vector.load %arg7[%c24, %c0_143] : memref<36x544xf32, #tpu.memory_space<vmem>>, vector<4x544xf32>
    tpu.vector_store %arg7[%c24, %c0_143], %139 {strides = array<i32>} : memref<36x544xf32, #tpu.memory_space<vmem>>, vector<4x544xf32>,
    %c0_144 = arith.constant 0 : index
    %c0_145 = arith.constant 0 : index
    %c69 = arith.constant 69 : index
    %141 = vector.load %arg6[%c0_144, %c0_145, %c69] : memref<1x4x614xf32, #tpu.memory_space<vmem>>, vector<1x4x544xf32>
    %142 = vector.shape_cast %141 : vector<1x4x544xf32> to vector<4x544xf32>
    %c28 = arith.constant 28 : index
    %c0_146 = arith.constant 0 : index
    %143 = vector.load %arg7[%c28, %c0_146] : memref<36x544xf32, #tpu.memory_space<vmem>>, vector<4x544xf32>
    tpu.vector_store %arg7[%c28, %c0_146], %142 {strides = array<i32>} : memref<36x544xf32, #tpu.memory_space<vmem>>, vector<4x544xf32>,
    %c0_147 = arith.constant 0 : index
    %c0_148 = arith.constant 0 : index
    %c70 = arith.constant 70 : index
    %144 = vector.load %arg6[%c0_147, %c0_148, %c70] : memref<1x4x614xf32, #tpu.memory_space<vmem>>, vector<1x4x544xf32>
    %145 = vector.shape_cast %144 : vector<1x4x544xf32> to vector<4x544xf32>
    %c32_149 = arith.constant 32 : index
    %c0_150 = arith.constant 0 : index
    %146 = vector.load %arg7[%c32_149, %c0_150] : memref<36x544xf32, #tpu.memory_space<vmem>>, vector<4x544xf32>
    tpu.vector_store %arg7[%c32_149, %c0_150], %145 {strides = array<i32>} : memref<36x544xf32, #tpu.memory_space<vmem>>, vector<4x544xf32>,
    %c0_151 = arith.constant 0 : index
    %c0_152 = arith.constant 0 : index
    %147 = vector.load %arg3[%c0_151, %c0_152] : memref<8x36xf32, #tpu.memory_space<vmem>>, vector<8x36xf32>
    %c0_153 = arith.constant 0 : index
    %c0_154 = arith.constant 0 : index
    %148 = vector.load %arg7[%c0_153, %c0_154] : memref<36x544xf32, #tpu.memory_space<vmem>>, vector<36x544xf32>
    %cst_155 = arith.constant dense<0.000000e+00> : vector<8x544xf32>
    %149 = tpu.matmul %147, %148, %cst_155 {dimension_numbers = #tpu.dot_dimension_numbers<[1], [0], [0], [1], [0, 0, 1, 1], [], []>, precision = #tpu.contract_precision<fp32>} : vector<8x36xf32>, vector<36x544xf32>, vector<8x544xf32> -> vector<8x544xf32>
    %c0_156 = arith.constant 0 : index
    %c0_157 = arith.constant 0 : index
    %150 = vector.load %arg4[%c0_156, %c0_157] : memref<8x1xf32, #tpu.memory_space<vmem>>, vector<8x1xf32>
    %151 = vector.broadcast %150 : vector<8x1xf32> to vector<8x544xf32>
    %152 = arith.addf %149, %151 : vector<8x544xf32>
    %c0_158 = arith.constant 0 : index
    %c0_159 = arith.constant 0 : index
    %153 = vector.load %arg8[%c0_158, %c0_159] : memref<8x544xf32, #tpu.memory_space<vmem>>, vector<8x544xf32>
    tpu.vector_store %arg8[%c0_158, %c0_159], %152 {strides = array<i32>} : memref<8x544xf32, #tpu.memory_space<vmem>>, vector<8x544xf32>,
    %c0_160 = arith.constant 0 : index
    %c0_161 = arith.constant 0 : index
    %154 = vector.load %arg8[%c0_160, %c0_161] : memref<8x544xf32, #tpu.memory_space<vmem>>, vector<4x32xf32>
    %c0_162 = arith.constant 0 : index
    %c0_163 = arith.constant 0 : index
    %c0_164 = arith.constant 0 : index
    %155 = vector.load %arg5[%c0_162, %c0_163, %c0_164] : memref<1x4x1024xf32, #tpu.memory_space<vmem>>, vector<1x4x32xf32>
    %156 = vector.shape_cast %155 : vector<1x4x32xf32> to vector<4x32xf32>
    %157 = vector.shape_cast %154 : vector<4x32xf32> to vector<1x4x32xf32>
    tpu.vector_store %arg5[%c0_162, %c0_163, %c0_164], %157 {strides = array<i32>} : memref<1x4x1024xf32, #tpu.memory_space<vmem>>, vector<1x4x32xf32>,
    %c4_165 = arith.constant 4 : index
    %c0_166 = arith.constant 0 : index
    %158 = vector.load %arg8[%c4_165, %c0_166] : memref<8x544xf32, #tpu.memory_space<vmem>>, vector<4x32xf32>
    %c0_167 = arith.constant 0 : index
    %c0_168 = arith.constant 0 : index
    %c32_169 = arith.constant 32 : index
    %159 = vector.load %arg5[%c0_167, %c0_168, %c32_169] : memref<1x4x1024xf32, #tpu.memory_space<vmem>>, vector<1x4x32xf32>
    %160 = vector.shape_cast %159 : vector<1x4x32xf32> to vector<4x32xf32>
    %161 = vector.shape_cast %158 : vector<4x32xf32> to vector<1x4x32xf32>
    tpu.vector_store %arg5[%c0_167, %c0_168, %c32_169], %161 {strides = array<i32>} : memref<1x4x1024xf32, #tpu.memory_space<vmem>>, vector<1x4x32xf32>,
    %c0_170 = arith.constant 0 : index
    %c34_171 = arith.constant 34 : index
    %162 = vector.load %arg8[%c0_170, %c34_171] : memref<8x544xf32, #tpu.memory_space<vmem>>, vector<4x32xf32>
    %c0_172 = arith.constant 0 : index
    %c0_173 = arith.constant 0 : index
    %c64_174 = arith.constant 64 : index
    %163 = vector.load %arg5[%c0_172, %c0_173, %c64_174] : memref<1x4x1024xf32, #tpu.memory_space<vmem>>, vector<1x4x32xf32>
    %164 = vector.shape_cast %163 : vector<1x4x32xf32> to vector<4x32xf32>
    %165 = vector.shape_cast %162 : vector<4x32xf32> to vector<1x4x32xf32>
    tpu.vector_store %arg5[%c0_172, %c0_173, %c64_174], %165 {strides = array<i32>} : memref<1x4x1024xf32, #tpu.memory_space<vmem>>, vector<1x4x32xf32>,
    %c4_175 = arith.constant 4 : index
    %c34_176 = arith.constant 34 : index
    %166 = vector.load %arg8[%c4_175, %c34_176] : memref<8x544xf32, #tpu.memory_space<vmem>>, vector<4x32xf32>
    %c0_177 = arith.constant 0 : index
    %c0_178 = arith.constant 0 : index
    %c96_179 = arith.constant 96 : index
    %167 = vector.load %arg5[%c0_177, %c0_178, %c96_179] : memref<1x4x1024xf32, #tpu.memory_space<vmem>>, vector<1x4x32xf32>
    %168 = vector.shape_cast %167 : vector<1x4x32xf32> to vector<4x32xf32>
    %169 = vector.shape_cast %166 : vector<4x32xf32> to vector<1x4x32xf32>
    tpu.vector_store %arg5[%c0_177, %c0_178, %c96_179], %169 {strides = array<i32>} : memref<1x4x1024xf32, #tpu.memory_space<vmem>>, vector<1x4x32xf32>,
    %c0_180 = arith.constant 0 : index
    %c68_181 = arith.constant 68 : index
    %170 = vector.load %arg8[%c0_180, %c68_181] : memref<8x544xf32, #tpu.memory_space<vmem>>, vector<4x32xf32>
    %c0_182 = arith.constant 0 : index
    %c0_183 = arith.constant 0 : index
    %c128_184 = arith.constant 128 : index
    %171 = vector.load %arg5[%c0_182, %c0_183, %c128_184] : memref<1x4x1024xf32, #tpu.memory_space<vmem>>, vector<1x4x32xf32>
    %172 = vector.shape_cast %171 : vector<1x4x32xf32> to vector<4x32xf32>
    %173 = vector.shape_cast %170 : vector<4x32xf32> to vector<1x4x32xf32>
    tpu.vector_store %arg5[%c0_182, %c0_183, %c128_184], %173 {strides = array<i32>} : memref<1x4x1024xf32, #tpu.memory_space<vmem>>, vector<1x4x32xf32>,
    %c4_185 = arith.constant 4 : index
    %c68_186 = arith.constant 68 : index
    %174 = vector.load %arg8[%c4_185, %c68_186] : memref<8x544xf32, #tpu.memory_space<vmem>>, vector<4x32xf32>
    %c0_187 = arith.constant 0 : index
    %c0_188 = arith.constant 0 : index
    %c160_189 = arith.constant 160 : index
    %175 = vector.load %arg5[%c0_187, %c0_188, %c160_189] : memref<1x4x1024xf32, #tpu.memory_space<vmem>>, vector<1x4x32xf32>
    %176 = vector.shape_cast %175 : vector<1x4x32xf32> to vector<4x32xf32>
    %177 = vector.shape_cast %174 : vector<4x32xf32> to vector<1x4x32xf32>
    tpu.vector_store %arg5[%c0_187, %c0_188, %c160_189], %177 {strides = array<i32>} : memref<1x4x1024xf32, #tpu.memory_space<vmem>>, vector<1x4x32xf32>,
    %c0_190 = arith.constant 0 : index
    %c102_191 = arith.constant 102 : index
    %178 = vector.load %arg8[%c0_190, %c102_191] : memref<8x544xf32, #tpu.memory_space<vmem>>, vector<4x32xf32>
    %c0_192 = arith.constant 0 : index
    %c0_193 = arith.constant 0 : index
    %c192_194 = arith.constant 192 : index
    %179 = vector.load %arg5[%c0_192, %c0_193, %c192_194] : memref<1x4x1024xf32, #tpu.memory_space<vmem>>, vector<1x4x32xf32>
    %180 = vector.shape_cast %179 : vector<1x4x32xf32> to vector<4x32xf32>
    %181 = vector.shape_cast %178 : vector<4x32xf32> to vector<1x4x32xf32>
    tpu.vector_store %arg5[%c0_192, %c0_193, %c192_194], %181 {strides = array<i32>} : memref<1x4x1024xf32, #tpu.memory_space<vmem>>, vector<1x4x32xf32>,
    %c4_195 = arith.constant 4 : index
    %c102_196 = arith.constant 102 : index
    %182 = vector.load %arg8[%c4_195, %c102_196] : memref<8x544xf32, #tpu.memory_space<vmem>>, vector<4x32xf32>
    %c0_197 = arith.constant 0 : index
    %c0_198 = arith.constant 0 : index
    %c224_199 = arith.constant 224 : index
    %183 = vector.load %arg5[%c0_197, %c0_198, %c224_199] : memref<1x4x1024xf32, #tpu.memory_space<vmem>>, vector<1x4x32xf32>
    %184 = vector.shape_cast %183 : vector<1x4x32xf32> to vector<4x32xf32>
    %185 = vector.shape_cast %182 : vector<4x32xf32> to vector<1x4x32xf32>
    tpu.vector_store %arg5[%c0_197, %c0_198, %c224_199], %185 {strides = array<i32>} : memref<1x4x1024xf32, #tpu.memory_space<vmem>>, vector<1x4x32xf32>,
    %c0_200 = arith.constant 0 : index
    %c136_201 = arith.constant 136 : index
    %186 = vector.load %arg8[%c0_200, %c136_201] : memref<8x544xf32, #tpu.memory_space<vmem>>, vector<4x32xf32>
    %c0_202 = arith.constant 0 : index
    %c0_203 = arith.constant 0 : index
    %c256 = arith.constant 256 : index
    %187 = vector.load %arg5[%c0_202, %c0_203, %c256] : memref<1x4x1024xf32, #tpu.memory_space<vmem>>, vector<1x4x32xf32>
    %188 = vector.shape_cast %187 : vector<1x4x32xf32> to vector<4x32xf32>
    %189 = vector.shape_cast %186 : vector<4x32xf32> to vector<1x4x32xf32>
    tpu.vector_store %arg5[%c0_202, %c0_203, %c256], %189 {strides = array<i32>} : memref<1x4x1024xf32, #tpu.memory_space<vmem>>, vector<1x4x32xf32>,
    %c4_204 = arith.constant 4 : index
    %c136_205 = arith.constant 136 : index
    %190 = vector.load %arg8[%c4_204, %c136_205] : memref<8x544xf32, #tpu.memory_space<vmem>>, vector<4x32xf32>
    %c0_206 = arith.constant 0 : index
    %c0_207 = arith.constant 0 : index
    %c288 = arith.constant 288 : index
    %191 = vector.load %arg5[%c0_206, %c0_207, %c288] : memref<1x4x1024xf32, #tpu.memory_space<vmem>>, vector<1x4x32xf32>
    %192 = vector.shape_cast %191 : vector<1x4x32xf32> to vector<4x32xf32>
    %193 = vector.shape_cast %190 : vector<4x32xf32> to vector<1x4x32xf32>
    tpu.vector_store %arg5[%c0_206, %c0_207, %c288], %193 {strides = array<i32>} : memref<1x4x1024xf32, #tpu.memory_space<vmem>>, vector<1x4x32xf32>,
    %c0_208 = arith.constant 0 : index
    %c170_209 = arith.constant 170 : index
    %194 = vector.load %arg8[%c0_208, %c170_209] : memref<8x544xf32, #tpu.memory_space<vmem>>, vector<4x32xf32>
    %c0_210 = arith.constant 0 : index
    %c0_211 = arith.constant 0 : index
    %c320 = arith.constant 320 : index
    %195 = vector.load %arg5[%c0_210, %c0_211, %c320] : memref<1x4x1024xf32, #tpu.memory_space<vmem>>, vector<1x4x32xf32>
    %196 = vector.shape_cast %195 : vector<1x4x32xf32> to vector<4x32xf32>
    %197 = vector.shape_cast %194 : vector<4x32xf32> to vector<1x4x32xf32>
    tpu.vector_store %arg5[%c0_210, %c0_211, %c320], %197 {strides = array<i32>} : memref<1x4x1024xf32, #tpu.memory_space<vmem>>, vector<1x4x32xf32>,
    %c4_212 = arith.constant 4 : index
    %c170_213 = arith.constant 170 : index
    %198 = vector.load %arg8[%c4_212, %c170_213] : memref<8x544xf32, #tpu.memory_space<vmem>>, vector<4x32xf32>
    %c0_214 = arith.constant 0 : index
    %c0_215 = arith.constant 0 : index
    %c352 = arith.constant 352 : index
    %199 = vector.load %arg5[%c0_214, %c0_215, %c352] : memref<1x4x1024xf32, #tpu.memory_space<vmem>>, vector<1x4x32xf32>
    %200 = vector.shape_cast %199 : vector<1x4x32xf32> to vector<4x32xf32>
    %201 = vector.shape_cast %198 : vector<4x32xf32> to vector<1x4x32xf32>
    tpu.vector_store %arg5[%c0_214, %c0_215, %c352], %201 {strides = array<i32>} : memref<1x4x1024xf32, #tpu.memory_space<vmem>>, vector<1x4x32xf32>,
    %c0_216 = arith.constant 0 : index
    %c204_217 = arith.constant 204 : index
    %202 = vector.load %arg8[%c0_216, %c204_217] : memref<8x544xf32, #tpu.memory_space<vmem>>, vector<4x32xf32>
    %c0_218 = arith.constant 0 : index
    %c0_219 = arith.constant 0 : index
    %c384 = arith.constant 384 : index
    %203 = vector.load %arg5[%c0_218, %c0_219, %c384] : memref<1x4x1024xf32, #tpu.memory_space<vmem>>, vector<1x4x32xf32>
    %204 = vector.shape_cast %203 : vector<1x4x32xf32> to vector<4x32xf32>
    %205 = vector.shape_cast %202 : vector<4x32xf32> to vector<1x4x32xf32>
    tpu.vector_store %arg5[%c0_218, %c0_219, %c384], %205 {strides = array<i32>} : memref<1x4x1024xf32, #tpu.memory_space<vmem>>, vector<1x4x32xf32>,
    %c4_220 = arith.constant 4 : index
    %c204_221 = arith.constant 204 : index
    %206 = vector.load %arg8[%c4_220, %c204_221] : memref<8x544xf32, #tpu.memory_space<vmem>>, vector<4x32xf32>
    %c0_222 = arith.constant 0 : index
    %c0_223 = arith.constant 0 : index
    %c416 = arith.constant 416 : index
    %207 = vector.load %arg5[%c0_222, %c0_223, %c416] : memref<1x4x1024xf32, #tpu.memory_space<vmem>>, vector<1x4x32xf32>
    %208 = vector.shape_cast %207 : vector<1x4x32xf32> to vector<4x32xf32>
    %209 = vector.shape_cast %206 : vector<4x32xf32> to vector<1x4x32xf32>
    tpu.vector_store %arg5[%c0_222, %c0_223, %c416], %209 {strides = array<i32>} : memref<1x4x1024xf32, #tpu.memory_space<vmem>>, vector<1x4x32xf32>,
    %c0_224 = arith.constant 0 : index
    %c238_225 = arith.constant 238 : index
    %210 = vector.load %arg8[%c0_224, %c238_225] : memref<8x544xf32, #tpu.memory_space<vmem>>, vector<4x32xf32>
    %c0_226 = arith.constant 0 : index
    %c0_227 = arith.constant 0 : index
    %c448 = arith.constant 448 : index
    %211 = vector.load %arg5[%c0_226, %c0_227, %c448] : memref<1x4x1024xf32, #tpu.memory_space<vmem>>, vector<1x4x32xf32>
    %212 = vector.shape_cast %211 : vector<1x4x32xf32> to vector<4x32xf32>
    %213 = vector.shape_cast %210 : vector<4x32xf32> to vector<1x4x32xf32>
    tpu.vector_store %arg5[%c0_226, %c0_227, %c448], %213 {strides = array<i32>} : memref<1x4x1024xf32, #tpu.memory_space<vmem>>, vector<1x4x32xf32>,
    %c4_228 = arith.constant 4 : index
    %c238_229 = arith.constant 238 : index
    %214 = vector.load %arg8[%c4_228, %c238_229] : memref<8x544xf32, #tpu.memory_space<vmem>>, vector<4x32xf32>
    %c0_230 = arith.constant 0 : index
    %c0_231 = arith.constant 0 : index
    %c480 = arith.constant 480 : index
    %215 = vector.load %arg5[%c0_230, %c0_231, %c480] : memref<1x4x1024xf32, #tpu.memory_space<vmem>>, vector<1x4x32xf32>
    %216 = vector.shape_cast %215 : vector<1x4x32xf32> to vector<4x32xf32>
    %217 = vector.shape_cast %214 : vector<4x32xf32> to vector<1x4x32xf32>
    tpu.vector_store %arg5[%c0_230, %c0_231, %c480], %217 {strides = array<i32>} : memref<1x4x1024xf32, #tpu.memory_space<vmem>>, vector<1x4x32xf32>,
    %c0_232 = arith.constant 0 : index
    %c272_233 = arith.constant 272 : index
    %218 = vector.load %arg8[%c0_232, %c272_233] : memref<8x544xf32, #tpu.memory_space<vmem>>, vector<4x32xf32>
    %c0_234 = arith.constant 0 : index
    %c0_235 = arith.constant 0 : index
    %c512 = arith.constant 512 : index
    %219 = vector.load %arg5[%c0_234, %c0_235, %c512] : memref<1x4x1024xf32, #tpu.memory_space<vmem>>, vector<1x4x32xf32>
    %220 = vector.shape_cast %219 : vector<1x4x32xf32> to vector<4x32xf32>
    %221 = vector.shape_cast %218 : vector<4x32xf32> to vector<1x4x32xf32>
    tpu.vector_store %arg5[%c0_234, %c0_235, %c512], %221 {strides = array<i32>} : memref<1x4x1024xf32, #tpu.memory_space<vmem>>, vector<1x4x32xf32>,
    %c4_236 = arith.constant 4 : index
    %c272_237 = arith.constant 272 : index
    %222 = vector.load %arg8[%c4_236, %c272_237] : memref<8x544xf32, #tpu.memory_space<vmem>>, vector<4x32xf32>
    %c0_238 = arith.constant 0 : index
    %c0_239 = arith.constant 0 : index
    %c544_240 = arith.constant 544 : index
    %223 = vector.load %arg5[%c0_238, %c0_239, %c544_240] : memref<1x4x1024xf32, #tpu.memory_space<vmem>>, vector<1x4x32xf32>
    %224 = vector.shape_cast %223 : vector<1x4x32xf32> to vector<4x32xf32>
    %225 = vector.shape_cast %222 : vector<4x32xf32> to vector<1x4x32xf32>
    tpu.vector_store %arg5[%c0_238, %c0_239, %c544_240], %225 {strides = array<i32>} : memref<1x4x1024xf32, #tpu.memory_space<vmem>>, vector<1x4x32xf32>,
    %c0_241 = arith.constant 0 : index
    %c306_242 = arith.constant 306 : index
    %226 = vector.load %arg8[%c0_241, %c306_242] : memref<8x544xf32, #tpu.memory_space<vmem>>, vector<4x32xf32>
    %c0_243 = arith.constant 0 : index
    %c0_244 = arith.constant 0 : index
    %c576 = arith.constant 576 : index
    %227 = vector.load %arg5[%c0_243, %c0_244, %c576] : memref<1x4x1024xf32, #tpu.memory_space<vmem>>, vector<1x4x32xf32>
    %228 = vector.shape_cast %227 : vector<1x4x32xf32> to vector<4x32xf32>
    %229 = vector.shape_cast %226 : vector<4x32xf32> to vector<1x4x32xf32>
    tpu.vector_store %arg5[%c0_243, %c0_244, %c576], %229 {strides = array<i32>} : memref<1x4x1024xf32, #tpu.memory_space<vmem>>, vector<1x4x32xf32>,
    %c4_245 = arith.constant 4 : index
    %c306_246 = arith.constant 306 : index
    %230 = vector.load %arg8[%c4_245, %c306_246] : memref<8x544xf32, #tpu.memory_space<vmem>>, vector<4x32xf32>
    %c0_247 = arith.constant 0 : index
    %c0_248 = arith.constant 0 : index
    %c608 = arith.constant 608 : index
    %231 = vector.load %arg5[%c0_247, %c0_248, %c608] : memref<1x4x1024xf32, #tpu.memory_space<vmem>>, vector<1x4x32xf32>
    %232 = vector.shape_cast %231 : vector<1x4x32xf32> to vector<4x32xf32>
    %233 = vector.shape_cast %230 : vector<4x32xf32> to vector<1x4x32xf32>
    tpu.vector_store %arg5[%c0_247, %c0_248, %c608], %233 {strides = array<i32>} : memref<1x4x1024xf32, #tpu.memory_space<vmem>>, vector<1x4x32xf32>,
    %c0_249 = arith.constant 0 : index
    %c340_250 = arith.constant 340 : index
    %234 = vector.load %arg8[%c0_249, %c340_250] : memref<8x544xf32, #tpu.memory_space<vmem>>, vector<4x32xf32>
    %c0_251 = arith.constant 0 : index
    %c0_252 = arith.constant 0 : index
    %c640 = arith.constant 640 : index
    %235 = vector.load %arg5[%c0_251, %c0_252, %c640] : memref<1x4x1024xf32, #tpu.memory_space<vmem>>, vector<1x4x32xf32>
    %236 = vector.shape_cast %235 : vector<1x4x32xf32> to vector<4x32xf32>
    %237 = vector.shape_cast %234 : vector<4x32xf32> to vector<1x4x32xf32>
    tpu.vector_store %arg5[%c0_251, %c0_252, %c640], %237 {strides = array<i32>} : memref<1x4x1024xf32, #tpu.memory_space<vmem>>, vector<1x4x32xf32>,
    %c4_253 = arith.constant 4 : index
    %c340_254 = arith.constant 340 : index
    %238 = vector.load %arg8[%c4_253, %c340_254] : memref<8x544xf32, #tpu.memory_space<vmem>>, vector<4x32xf32>
    %c0_255 = arith.constant 0 : index
    %c0_256 = arith.constant 0 : index
    %c672 = arith.constant 672 : index
    %239 = vector.load %arg5[%c0_255, %c0_256, %c672] : memref<1x4x1024xf32, #tpu.memory_space<vmem>>, vector<1x4x32xf32>
    %240 = vector.shape_cast %239 : vector<1x4x32xf32> to vector<4x32xf32>
    %241 = vector.shape_cast %238 : vector<4x32xf32> to vector<1x4x32xf32>
    tpu.vector_store %arg5[%c0_255, %c0_256, %c672], %241 {strides = array<i32>} : memref<1x4x1024xf32, #tpu.memory_space<vmem>>, vector<1x4x32xf32>,
    %c0_257 = arith.constant 0 : index
    %c374_258 = arith.constant 374 : index
    %242 = vector.load %arg8[%c0_257, %c374_258] : memref<8x544xf32, #tpu.memory_space<vmem>>, vector<4x32xf32>
    %c0_259 = arith.constant 0 : index
    %c0_260 = arith.constant 0 : index
    %c704 = arith.constant 704 : index
    %243 = vector.load %arg5[%c0_259, %c0_260, %c704] : memref<1x4x1024xf32, #tpu.memory_space<vmem>>, vector<1x4x32xf32>
    %244 = vector.shape_cast %243 : vector<1x4x32xf32> to vector<4x32xf32>
    %245 = vector.shape_cast %242 : vector<4x32xf32> to vector<1x4x32xf32>
    tpu.vector_store %arg5[%c0_259, %c0_260, %c704], %245 {strides = array<i32>} : memref<1x4x1024xf32, #tpu.memory_space<vmem>>, vector<1x4x32xf32>,
    %c4_261 = arith.constant 4 : index
    %c374_262 = arith.constant 374 : index
    %246 = vector.load %arg8[%c4_261, %c374_262] : memref<8x544xf32, #tpu.memory_space<vmem>>, vector<4x32xf32>
    %c0_263 = arith.constant 0 : index
    %c0_264 = arith.constant 0 : index
    %c736 = arith.constant 736 : index
    %247 = vector.load %arg5[%c0_263, %c0_264, %c736] : memref<1x4x1024xf32, #tpu.memory_space<vmem>>, vector<1x4x32xf32>
    %248 = vector.shape_cast %247 : vector<1x4x32xf32> to vector<4x32xf32>
    %249 = vector.shape_cast %246 : vector<4x32xf32> to vector<1x4x32xf32>
    tpu.vector_store %arg5[%c0_263, %c0_264, %c736], %249 {strides = array<i32>} : memref<1x4x1024xf32, #tpu.memory_space<vmem>>, vector<1x4x32xf32>,
    %c0_265 = arith.constant 0 : index
    %c408_266 = arith.constant 408 : index
    %250 = vector.load %arg8[%c0_265, %c408_266] : memref<8x544xf32, #tpu.memory_space<vmem>>, vector<4x32xf32>
    %c0_267 = arith.constant 0 : index
    %c0_268 = arith.constant 0 : index
    %c768 = arith.constant 768 : index
    %251 = vector.load %arg5[%c0_267, %c0_268, %c768] : memref<1x4x1024xf32, #tpu.memory_space<vmem>>, vector<1x4x32xf32>
    %252 = vector.shape_cast %251 : vector<1x4x32xf32> to vector<4x32xf32>
    %253 = vector.shape_cast %250 : vector<4x32xf32> to vector<1x4x32xf32>
    tpu.vector_store %arg5[%c0_267, %c0_268, %c768], %253 {strides = array<i32>} : memref<1x4x1024xf32, #tpu.memory_space<vmem>>, vector<1x4x32xf32>,
    %c4_269 = arith.constant 4 : index
    %c408_270 = arith.constant 408 : index
    %254 = vector.load %arg8[%c4_269, %c408_270] : memref<8x544xf32, #tpu.memory_space<vmem>>, vector<4x32xf32>
    %c0_271 = arith.constant 0 : index
    %c0_272 = arith.constant 0 : index
    %c800 = arith.constant 800 : index
    %255 = vector.load %arg5[%c0_271, %c0_272, %c800] : memref<1x4x1024xf32, #tpu.memory_space<vmem>>, vector<1x4x32xf32>
    %256 = vector.shape_cast %255 : vector<1x4x32xf32> to vector<4x32xf32>
    %257 = vector.shape_cast %254 : vector<4x32xf32> to vector<1x4x32xf32>
    tpu.vector_store %arg5[%c0_271, %c0_272, %c800], %257 {strides = array<i32>} : memref<1x4x1024xf32, #tpu.memory_space<vmem>>, vector<1x4x32xf32>,
    %c0_273 = arith.constant 0 : index
    %c442_274 = arith.constant 442 : index
    %258 = vector.load %arg8[%c0_273, %c442_274] : memref<8x544xf32, #tpu.memory_space<vmem>>, vector<4x32xf32>
    %c0_275 = arith.constant 0 : index
    %c0_276 = arith.constant 0 : index
    %c832 = arith.constant 832 : index
    %259 = vector.load %arg5[%c0_275, %c0_276, %c832] : memref<1x4x1024xf32, #tpu.memory_space<vmem>>, vector<1x4x32xf32>
    %260 = vector.shape_cast %259 : vector<1x4x32xf32> to vector<4x32xf32>
    %261 = vector.shape_cast %258 : vector<4x32xf32> to vector<1x4x32xf32>
    tpu.vector_store %arg5[%c0_275, %c0_276, %c832], %261 {strides = array<i32>} : memref<1x4x1024xf32, #tpu.memory_space<vmem>>, vector<1x4x32xf32>,
    %c4_277 = arith.constant 4 : index
    %c442_278 = arith.constant 442 : index
    %262 = vector.load %arg8[%c4_277, %c442_278] : memref<8x544xf32, #tpu.memory_space<vmem>>, vector<4x32xf32>
    %c0_279 = arith.constant 0 : index
    %c0_280 = arith.constant 0 : index
    %c864 = arith.constant 864 : index
    %263 = vector.load %arg5[%c0_279, %c0_280, %c864] : memref<1x4x1024xf32, #tpu.memory_space<vmem>>, vector<1x4x32xf32>
    %264 = vector.shape_cast %263 : vector<1x4x32xf32> to vector<4x32xf32>
    %265 = vector.shape_cast %262 : vector<4x32xf32> to vector<1x4x32xf32>
    tpu.vector_store %arg5[%c0_279, %c0_280, %c864], %265 {strides = array<i32>} : memref<1x4x1024xf32, #tpu.memory_space<vmem>>, vector<1x4x32xf32>,
    %c0_281 = arith.constant 0 : index
    %c476_282 = arith.constant 476 : index
    %266 = vector.load %arg8[%c0_281, %c476_282] : memref<8x544xf32, #tpu.memory_space<vmem>>, vector<4x32xf32>
    %c0_283 = arith.constant 0 : index
    %c0_284 = arith.constant 0 : index
    %c896 = arith.constant 896 : index
    %267 = vector.load %arg5[%c0_283, %c0_284, %c896] : memref<1x4x1024xf32, #tpu.memory_space<vmem>>, vector<1x4x32xf32>
    %268 = vector.shape_cast %267 : vector<1x4x32xf32> to vector<4x32xf32>
    %269 = vector.shape_cast %266 : vector<4x32xf32> to vector<1x4x32xf32>
    tpu.vector_store %arg5[%c0_283, %c0_284, %c896], %269 {strides = array<i32>} : memref<1x4x1024xf32, #tpu.memory_space<vmem>>, vector<1x4x32xf32>,
    %c4_285 = arith.constant 4 : index
    %c476_286 = arith.constant 476 : index
    %270 = vector.load %arg8[%c4_285, %c476_286] : memref<8x544xf32, #tpu.memory_space<vmem>>, vector<4x32xf32>
    %c0_287 = arith.constant 0 : index
    %c0_288 = arith.constant 0 : index
    %c928 = arith.constant 928 : index
    %271 = vector.load %arg5[%c0_287, %c0_288, %c928] : memref<1x4x1024xf32, #tpu.memory_space<vmem>>, vector<1x4x32xf32>
    %272 = vector.shape_cast %271 : vector<1x4x32xf32> to vector<4x32xf32>
    %273 = vector.shape_cast %270 : vector<4x32xf32> to vector<1x4x32xf32>
    tpu.vector_store %arg5[%c0_287, %c0_288, %c928], %273 {strides = array<i32>} : memref<1x4x1024xf32, #tpu.memory_space<vmem>>, vector<1x4x32xf32>,
    %c0_289 = arith.constant 0 : index
    %c510_290 = arith.constant 510 : index
    %274 = vector.load %arg8[%c0_289, %c510_290] : memref<8x544xf32, #tpu.memory_space<vmem>>, vector<4x32xf32>
    %c0_291 = arith.constant 0 : index
    %c0_292 = arith.constant 0 : index
    %c960 = arith.constant 960 : index
    %275 = vector.load %arg5[%c0_291, %c0_292, %c960] : memref<1x4x1024xf32, #tpu.memory_space<vmem>>, vector<1x4x32xf32>
    %276 = vector.shape_cast %275 : vector<1x4x32xf32> to vector<4x32xf32>
    %277 = vector.shape_cast %274 : vector<4x32xf32> to vector<1x4x32xf32>
    tpu.vector_store %arg5[%c0_291, %c0_292, %c960], %277 {strides = array<i32>} : memref<1x4x1024xf32, #tpu.memory_space<vmem>>, vector<1x4x32xf32>,
    %c4_293 = arith.constant 4 : index
    %c510_294 = arith.constant 510 : index
    %278 = vector.load %arg8[%c4_293, %c510_294] : memref<8x544xf32, #tpu.memory_space<vmem>>, vector<4x32xf32>
    %c0_295 = arith.constant 0 : index
    %c0_296 = arith.constant 0 : index
    %c992 = arith.constant 992 : index
    %279 = vector.load %arg5[%c0_295, %c0_296, %c992] : memref<1x4x1024xf32, #tpu.memory_space<vmem>>, vector<1x4x32xf32>
    %280 = vector.shape_cast %279 : vector<1x4x32xf32> to vector<4x32xf32>
    %281 = vector.shape_cast %278 : vector<4x32xf32> to vector<1x4x32xf32>
    tpu.vector_store %arg5[%c0_295, %c0_296, %c992], %281 {strides = array<i32>} : memref<1x4x1024xf32, #tpu.memory_space<vmem>>, vector<1x4x32xf32>,
    return
  }
  func.func @transform_0(%arg0: i32) -> (i32, i32, i32) {
    %c0_i32 = arith.constant 0 : i32
    %c0_i32_0 = arith.constant 0 : i32
    %c0_i32_1 = arith.constant 0 : i32
    return %arg0, %c0_i32, %c0_i32_0 : i32, i32, i32
  }
  func.func @transform_1(%arg0: i32) -> (i32, i32) {
    %c0_i32 = arith.constant 0 : i32
    %c0_i32_0 = arith.constant 0 : i32
    %c0_i32_1 = arith.constant 0 : i32
    return %c0_i32, %c0_i32_0 : i32, i32
  }
  func.func @transform_2(%arg0: i32) -> (i32, i32) {
    %c0_i32 = arith.constant 0 : i32
    %c0_i32_0 = arith.constant 0 : i32
    %c0_i32_1 = arith.constant 0 : i32
    return %c0_i32, %c0_i32_0 : i32, i32
  }
  func.func @transform_3(%arg0: i32) -> (i32, i32) {
    %c0_i32 = arith.constant 0 : i32
    %c0_i32_0 = arith.constant 0 : i32
    %c0_i32_1 = arith.constant 0 : i32
    return %c0_i32, %c0_i32_0 : i32, i32
  }
  func.func @transform_4(%arg0: i32) -> (i32, i32, i32) {
    %c0_i32 = arith.constant 0 : i32
    %c0_i32_0 = arith.constant 0 : i32
    %c0_i32_1 = arith.constant 0 : i32
    return %arg0, %c0_i32, %c0_i32_0 : i32, i32, i32
  }
}

</mosaic_0001>

<bundles_post_ra>
// kernel: tpu_custom_call.1
= control target key start
LH: loop header
LB: loop body
LE: loop exit
PB: predicated region body
PF: predicated region fallthrough
CT: control target
= control target key end

     0   :  { %9 = vsyncpa [#allocation6], 0  ;;  %s6192_s0 = inlined_call_operand.hbm [shape: f32[2,4,256], index: 0, kind: input, shape index: {}]   ;;  %s6193_s1 = inlined_call_operand.hbm [shape: f32[16,34], index: 1, kind: input, shape index: {}]   ;;  %s6194_s2 = inlined_call_operand.vmem [shape: f32[8,36], index: 2, kind: input, shape index: {}]   ;;  %s6195_s3 = inlined_call_operand.vmem [shape: f32[8,1], index: 3, kind: input, shape index: {}]   ;;  %s6196_s4 = inlined_call_operand.hbm [shape: f32[2,4,1024], index: 4, kind: output, shape index: {}]  }
   0x1   :  { %11 = vsyncpa [#allocation6 + $0x1], 0 }
   0x2   :  { %12 = vsyncpa [#allocation9], 0 }
   0x3   :  { %13 = vsyncpa [#allocation7], 0 }
   0x4   :  { %15 = vsyncpa [#allocation7 + $0x1], 0  ;;  %s5181_s15 = smov 0   ;;  %s5183_s16 = smov 0  }
   0x5   :  { %s5185_s17 = smov 0   ;;  %s5187_s18 = smov 0  }
   0x6 LB: > { %s152_s21 = sshll.u32 %s6193_s1, 4  ;;  %s5205_s22 = sadd.s32 4294967295, %s5102_s18   ;;  %s5102_s18 = sphi %s5187_s18, %s6206_s18   ;;  %s5098_s17 = sphi %s5185_s17, %s6205_s17   ;;  %s5094_s16 = sphi %s5183_s16, %s6204_s16   ;;  %s5090_s15 = sphi %s5181_s15, %s6203_s15   ;;  %s153_s21 = int_to_ptr.hbm [resolvable:$true] %s152_s21 }
   0x7   : > { %p4845_p0 = scmp.ge.s32.totalorder %s5102_s18, 1  ;;  %p42_p1 = scmp.eq.s32.totalorder %s5205_s22, 0 }
   0x8   : > { %p141_p2 = scmp.lt.s32.totalorder %s5102_s18, 3  ;;  %s5104_s24 = smov [#allocation8]  }
   0x9   : > { %s154_s25 = sshll.u32 %s5104_s24, 4  ;;  %s5105_s26 = smov 128   ;;  %s155_s25 = int_to_ptr.vmem [resolvable:$true] %s154_s25 }
   0xa   : > { %p5210_p3 = pnand %p4845_p0, %p141_p2  ;;  %s5106_s27 = smov 8  }
   0xb   : > { %s4844_s28 = sadd.s32 4294967294, %s5102_s18   ;;  %s5221_s29 = sadd.s32 1, %s5102_s18  }
   0xc   : > { %p4870_p4 = pneg %p5210_p3  ;;  %s28_s30 = sadd.s32 1, %s5098_s17 }
   0xd   : > { %s25_s5 = ssub.s32 %s5102_s18, %s5221_s29  ;;  %p35_p7 = scmp.ne.s32.totalorder %s5098_s17, %s5094_s16 }
   0xe   : > { %p4871_p6 = pnand %p4870_p4, %p42_p1  ;;  %p26_p8 = scmp.eq.s32.totalorder %s25_s5, 0 }
   0xf   : > { %p36_p9 = scmp.eq.s32.totalorder %s5102_s18, 0  ;;  %p41_p10 = scmp.ne.s32.totalorder %s5094_s16, %s5090_s15 }
  0x10   : > { %4873 = dma.hbm_to_vmem [thread:$0]  (!%p4871_p6), %s153_s21, 256, %s155_s25, [#allocation9], %s5105_s26, %s5105_s26, %s5106_s27  }
  0x11   : > { %p128_p11 = scmp.eq.s32.totalorder %s5205_s22, 1  ;;  %p5237_p12 = por %p42_p1, %p41_p10 }
  0x12   : > { %s5233_s6 = scalar_select %p26_p8, %s5098_s17, %s28_s30  }
  0x13   : > { %p5241_p13 = por %p128_p11, %p35_p7  ;;  %p134_p0 = scmp.eq.s32.totalorder %s4844_s28, 1 }
  0x14   : > { %p37_p2 = por %p36_p9, %p35_p7  ;;  %s174_s9 = sand.u32 1, %s5098_s17  }
  0x15   : > { %p5246_p4 = por %p134_p0, %p41_p10  ;;  %p4883_p6 = scmp.lt.s32.totalorder %s5102_s18, 2 }
  0x16   : > { %s4848_s11 = sshll.u32 %s174_s9, 3  ;;  %s4860_s12 = sshll.u32 %s5102_s18, 3 }
  0x17   : > { %s183_s19 = scalar_lea.hbm %s6192_s0, %s4860_s12  ;;  %s178_s21 = scalar_lea.vmem [#allocation5], %s4848_s11 }
  0x18   : > { %s185_s20 = sshll.u32 %s183_s19, 4  ;;  %s187_s24 = sshll.u32 %s178_s21, 4  ;;  %s186_s20 = int_to_ptr.hbm [resolvable:$true] %s185_s20  ;;  %s188_s24 = int_to_ptr.vmem [resolvable:$true] %s187_s24 }
  0x19   : > { %p5255_p8 = pnand %p4883_p6, %p37_p2  ;;  %s175_s26 = scalar_lea.sflag [#allocation6], %s174_s9 }
  0x1a   : > { %s5002_s27 = sshra.s32 %s186_s20, 4  ;;  %s5009_s11 = scalar_lea.hbm %s6192_s0, 16  ;;  %s5003_s27 = int_to_ptr.hbm [resolvable:$true] %s5002_s27 }
  0x1b   : > { %s5004_s28 = scalar_lea.hbm %s5003_s27, 8  ;;  %p5006_p9 = pneg %p5255_p8 }
  0x1c   : > { %p5005_p7 = scmp.ne.s32.totalorder %s5003_s27, %s5004_s28  ;;  %p5010_p0 = scmp.lt.s32.totalorder %s5003_s27, %s6192_s0 }
  0x1d   : > { %p5011_p2 = scmp.lt.s32.totalorder %s5009_s11, %s5004_s28 }
  0x1e   : > { %p5007_p10 = pnand %p5006_p9, %p5005_p7 }
  0x1f   : > { %p5012_p6 = por %p5011_p2, %p5010_p0 }
  0x20   : > { %p5008_p11 = pneg %p5007_p10 }
  0x22   : > { %p5013_p5 = pnand %p5012_p6, %p5008_p11 }
  0x24   : > { %5016 = shalt.err (!%p5013_p5)
}
  0x25   : > { %4877 = dma.hbm_to_vmem [thread:$0]  (!%p5255_p8), %s186_s20, 128, %s188_s24, %s175_s26  }
  0x26   : > { %196 = sbr.rel (%p5210_p3) target bundleno = 1197 (0x4ad), region = 36  ;;  %s5272_s9 = sand.u32 (!%p5210_p3), 1, %s5094_s16  }
  0x27   : > { %s4852_s14 = sshll.u32 (!%p5210_p3), %s5272_s9, 3  ;;  %s199_s19 = scalar_lea.sflag (!%p5210_p3), [#allocation6], %s5272_s9 }
  0x28   : > { %s5276_s21 = scalar_lea.vmem (!%p5210_p3), [#allocation5], %s4852_s14 }
  0x2b   : > { %5077 = dma.done.wait (%p5237_p12), %s199_s19, 128  }
  0x2c   : > { %5079 = vsyncadd (%p5237_p12), %s199_s19, 4294967168 }
  0x2d   : > { %5081 = dma.done.wait (%p42_p1), [#allocation9], 256  }
  0x2e   : > { %5083 = vsyncadd (%p42_p1), [#allocation9], 4294967040  ;;  %v409_v0 = vld [vmem:[%s5276_s21] sm:$0xf]  ;;  %s5107_s23 = smov 112   ;;  %s5108_s7 = smov 96  }
  0x2f   : > { %413 = vst [vmem:[#allocation1] ss:$2 sm:$0xff] %v409_v0  ;;  %v584_v1 = vld [vmem:[%s5276_s21] sm:$0xf]  ;;  %s5109_s20 = smov 80   ;;  %s5110_s24 = smov 64  }
  0x30   : > { %v764_v3 = vld [vmem:[%s5276_s21] sm:$0xf]  ;;  %v239_v9 = vld [vmem:[#allocation8 + $0x8] sm:$0xff]  ;;  %v238_v10 = vld [vmem:[#allocation8] sm:$0xff]  ;;  %vm240_vm0 = vcmask 130048   ;;  %s5111_s25 = smov 48  }
  0x31   : > { %v939_v5 = vld [vmem:[%s5276_s21] sm:$0xf]  ;;  %v5296_v12 = vand.u32 4294901760, %v239_v9  ;;  %v5298_v13 = vand.u32 4294901760, %v238_v10  ;;  %s5112_s26 = smov 32   ;;  %s5113_s27 = smov 16  }
  0x32   : > { %v1114_v7 = vld [vmem:[%s5276_s21] sm:$0xf]  ;;  %v1815_v32 = vld [vmem:[%s5276_s21 + $0x4] sm:$0xf]  ;;  %s5114_s28 = smov 34   ;;  %s5115_s30 = smov 68  }
  0x33   : > { %v237_v11 = vld [vmem:[%s5276_s21] sm:$0xf]  ;;  %v5302_v15 = vsub.f32 %v239_v9, %v5296_v12  ;;  %259 = vmatpush.msra.mxu2 %v5296_v12  ;;  %v5306_v16 = vsub.f32 %v238_v10, %v5298_v13  ;;  %395 = vmatpush.msra.mxu1 %v5296_v12  ;;  %v1990_v35 = vld [vmem:[%s5276_s21 + $0x4] sm:$0xf]  ;;  %s5116_s5 = smov 102   ;;  %s5117_s11 = smov 8  }
  0x34   : > { %v242_v14 = vsel %vm240_vm0, %v237_v11, 0  ;;  %v1289_v18 = vld [vmem:[%s5276_s21] sm:$0xf]  ;;  %v2170_v37 = vld [vmem:[%s5276_s21 + $0x4] sm:$0xf]  ;;  %s5118_s12 = smov 42  }
  0x35   : > { %v262_v17 = vand.u32 4294901760, %v242_v14  ;;  %v5311_v19 = vand.u32 4294901760, %v5302_v15  ;;  %v5314_v20 = vand.u32 4294901760, %v5306_v16  ;;  %261 = vmatpush.msra.mxu2 %v5298_v13  ;;  %397 = vmatpush.msra.mxu1 %v5298_v13  ;;  %v1469_v30 = vld [vmem:[%s5276_s21] sm:$0xf]  ;;  %s5119_s13 = smov 76  }
  0x36   : > { %v414_v2 = vld.sshfl [vmem:[#allocation1] sm:$0xff pattern:$0x75316420]  ;;  %v2345_v39 = vld [vmem:[%s5276_s21 + $0x4] sm:$0xf]  ;;  %s5120_s14 = smov 110  }
  0x37   : > { %415 = vrot.lane.b32.xlu0 %v414_v2, %s5107_s23  ;;  %588 = vst [vmem:[#allocation1] ss:$2 sm:$0xff] %v584_v1  ;;  %v263_v21 = vsub.f32 %v242_v14, %v262_v17  ;;  %318 = vmatpush.msrb.mxu2 %v5302_v15  ;;  %v288_v23 = vsub.f32 %v5302_v15, %v5311_v19  ;;  %v2520_v41 = vld [vmem:[%s5276_s21 + $0x4] sm:$0xf]  ;;  %vm233_vm1 = vcmask 273408   ;;  %vm235_vm2 = vcmask 830992  }
  0x38   : > { %399 = vmatmul.f32.vlgmr.msra.gmra.mxu1 %v262_v17  ;;  %v294_v24 = vsub.f32 %v5306_v16, %v5314_v20  ;;  %370 = vmatpush.msra.mxu0 %v5311_v19  ;;  %v2695_v46 = vld [vmem:[%s5276_s21 + $0x4] sm:$0xf]  ;;  %vm407_vm3 = vcmask 552208   ;;  %s5122_s19 = smov 50   ;;  %vm760_vm4 = vcmask 1044272   ;;  %vm761_vm5 = vcmask 64516  }
  0x39   : > { %v264_v25 = vand.u32 4294901760, %v263_v21  ;;  %518 = vmatpush.msrb.mxu1 %v5296_v12  ;;  %321 = vmatpush.msrb.mxu2 %v5306_v16  ;;  %v5327_v26 = vand.u32 4294901760, %v288_v23  ;;  %v2875_v59 = vld [vmem:[%s5276_s21 + $0x4] sm:$0xf]  ;;  %vm757_vm6 = vcmask 834560   ;;  %vm582_vm7 = vcmask 831008   ;;  %vm762_vm8 = vmor %vm761_vm5, %vm760_vm4 }
  0x3a   : > { %v5329_v27 = vand.u32 4294901760, %v294_v24  ;;  %374 = vmatpush.msra.mxu0 %v5314_v20  ;;  %vm937_vm9 = vcmask 339008   ;;  %vm1112_vm10 = vcmask 617808   ;;  %vm1287_vm11 = vcmask 896608  }
  0x3b   : > { %v265_v28 = vsub.f32 %v263_v21, %v264_v25  ;;  %520 = vmatpush.msrb.mxu1 %v5298_v13  ;;  %376 = vmatmul.f32.vlgmr.msra.gmra.mxu0 %v262_v17  ;;  %vm1465_vm12 = vcmask 1044336   ;;  %vm1466_vm13 = vcmask 130052   ;;  %vm1462_vm14 = vcmask 900096  }
  0x3c   : > { %290 = vmatpush.msra.mxu3 %v5327_v26  ;;  %493 = vmatpush.msrb.mxu0 %v5302_v15  ;;  %vm1467_vm15 = vmor %vm1466_vm13, %vm1465_vm12  ;;  %vm2167_vm4 = vcmask 195588   ;;  %vm2163_vm5 = vcmask 965632   ;;  %vm2693_vm12 = vcmask 1027808  }
  0x3d   : > { %v266_v29 = vand.u32 4294901760, %v265_v28  ;;  %640 = vmatpush.msra.mxu1 %v5327_v26 }
  0x3e   : > { %v589_v4 = vld.sshfl [vmem:[#allocation1] sm:$0xff pattern:$0x75316420]  ;;  %296 = vmatpush.msra.mxu3 %v5329_v27  ;;  %496 = vmatpush.msrb.mxu0 %v5306_v16 }
  0x3f   : > { %590 = vrot.lane.b32.xlu0 %v589_v4, %s5108_s7  ;;  %768 = vst [vmem:[#allocation1] ss:$2 sm:$0xff] %v764_v3  ;;  %267 = vmatmul.f32.vlgmr.msra.gmra.mxu2 %v266_v29 }
  0x40   : > { %298 = vmatmul.f32.vlgmr.msra.gmra.mxu3 %v262_v17  ;;  %434 = vmatpush.msra.mxu2 %v5296_v12 }
  0x41   : > { %343 = vmatpush.msrb.mxu3 %v5296_v12  ;;  %646 = vmatpush.msra.mxu1 %v5329_v27 }
  0x42   : > { %436 = vmatpush.msra.mxu2 %v5298_v13  ;;  %609 = vmatpush.msra.mxu0 %v5296_v12 }
  0x43   : > { %345 = vmatpush.msrb.mxu3 %v5298_v13 }
  0x44   : > { %611 = vmatpush.msra.mxu0 %v5298_v13 }
  0x45   : > { %465 = vmatpush.msra.mxu3 %v5327_v26 }
  0x46   : > { %v769_v6 = vld.sshfl [vmem:[#allocation1] sm:$0xff pattern:$0x75316420] }
  0x47   : > { %770 = vrot.lane.b32.xlu1 %v769_v6, %s5109_s20  ;;  %943 = vst [vmem:[#allocation1] ss:$2 sm:$0xff] %v939_v5  ;;  %471 = vmatpush.msra.mxu3 %v5329_v27 }
  0x48   : > { %324 = vmatmul.f32.vlgmr.msrb.gmra.mxu2 %v263_v21  ;;  %349 = vmatmul.f32.vlgmr.msrb.gmra.mxu3 %v264_v25 }
  0x49   : > { %545 = vmatpush.msrb.mxu2 %v5311_v19  ;;  %570 = vmatpush.msrb.mxu3 %v5296_v12 }
  0x4b   : > { %549 = vmatpush.msrb.mxu2 %v5314_v20  ;;  %572 = vmatpush.msrb.mxu3 %v5298_v13 }
  0x4e   : > { %v944_v8 = vld.sshfl [vmem:[#allocation1] sm:$0xff pattern:$0x75316420] }
  0x4f   : > { %945 = vrot.lane.b32.xlu1 %v944_v8, %s5110_s24  ;;  %1118 = vst [vmem:[#allocation1] ss:$2 sm:$0xff] %v1114_v7 }
  0x56   : > { %v1119_v22 = vld.sshfl [vmem:[#allocation1] sm:$0xff pattern:$0x75316420] }
  0x57   : > { %1120 = vrot.lane.b32.xlu2 %v1119_v22, %s5111_s25  ;;  %1293 = vst [vmem:[#allocation1] ss:$2 sm:$0xff] %v1289_v18 }
  0x5e   : > { %v1294_v31 = vld.sshfl [vmem:[#allocation1] sm:$0xff pattern:$0x75316420] }
  0x5f   : > { %1473 = vst [vmem:[#allocation1] ss:$2 sm:$0xff] %v1469_v30  ;;  %1295 = vrot.lane.b32.xlu2 %v1294_v31, %s5112_s26 }
  0x66   : > { %v1474_v33 = vld.sshfl [vmem:[#allocation1] sm:$0xff pattern:$0x75316420] }
  0x67   : > { %1475 = vrot.lane.b32.xlu0 %v1474_v33, %s5113_s27  ;;  %1819 = vst [vmem:[#allocation1] ss:$2 sm:$0xff] %v1815_v32 }
  0x6e   : > { %v1820_v34 = vld.sshfl [vmem:[#allocation1] sm:$0xff pattern:$0x75316420] }
  0x6f   : > { %1821 = vrot.lane.b32.xlu1 %v1820_v34, %s5107_s23  ;;  %1994 = vst [vmem:[#allocation1] ss:$2 sm:$0xff] %v1990_v35 }
  0x76   : > { %v1995_v36 = vld.sshfl [vmem:[#allocation1] sm:$0xff pattern:$0x75316420] }
  0x77   : > { %2174 = vst [vmem:[#allocation1] ss:$2 sm:$0xff] %v2170_v37  ;;  %1996 = vrot.lane.b32.xlu2 %v1995_v36, %s5108_s7  ;;  %v1644_v36 = vld [vmem:[%s5276_s21 + $0x4] sm:$0xf]  ;;  %s5123_s21 = smov 84   ;;  %s5124_s7 = smov 118  }
  0x78   : > { %v1648_v37 = vsel %vm240_vm0, %v1644_v36, 0 }
  0x7e   : > { %v2175_v38 = vld.sshfl [vmem:[#allocation1] sm:$0xff pattern:$0x75316420] }
  0x7f   : > { %2176 = vrot.lane.b32.xlu0 %v2175_v38, %s5109_s20  ;;  %2349 = vst [vmem:[#allocation1] ss:$2 sm:$0xff] %v2345_v39  ;;  %v1668_v39 = vand.u32 4294901760, %v1648_v37  ;;  %s5125_s20 = smov 24  }
  0x86   : > { %v2350_v40 = vld.sshfl [vmem:[#allocation1] sm:$0xff pattern:$0x75316420] }
  0x87   : > { %2351 = vrot.lane.b32.xlu1 %v2350_v40, %s5110_s24  ;;  %2524 = vst [vmem:[#allocation1] ss:$2 sm:$0xff] %v2520_v41  ;;  %v1669_v41 = vsub.f32 %v1648_v37, %v1668_v39  ;;  %s5126_s24 = smov 58  }
  0x8e   : > { %v2525_v45 = vld.sshfl [vmem:[#allocation1] sm:$0xff pattern:$0x75316420] }
  0x8f   : > { %2699 = vst [vmem:[#allocation1] ss:$2 sm:$0xff] %v2695_v46  ;;  %2526 = vrot.lane.b32.xlu2 %v2525_v45, %s5111_s25  ;;  %s5127_s25 = smov 92  }
  0x96   : > { %v2700_v54 = vld.sshfl [vmem:[#allocation1] sm:$0xff pattern:$0x75316420] }
  0x97   : > { %2701 = vrot.lane.b32.xlu0 %v2700_v54, %s5112_s26  ;;  %2879 = vst [vmem:[#allocation1] ss:$2 sm:$0xff] %v2875_v59 }
  0x9e   : > { %v2880_v1 = vld.sshfl [vmem:[#allocation1] sm:$0xff pattern:$0x75316420] }
  0x9f   : > { %2881 = vrot.lane.b32.xlu1 %v2880_v1, %s5113_s27 }
  0xa9   : > { %v416_v42 = vpop.permute.xlu0 %415 }
  0xaa   : > { %v417_v43 = vsel %vm240_vm0, %v416_v42, 0 }
  0xab   : > { %v437_v44 = vand.u32 4294901760, %v417_v43 }
  0xad   : > { %v438_v47 = vsub.f32 %v417_v43, %v437_v44  ;;  %473 = vmatmul.f32.vlgmr.msra.gmra.mxu3 %v437_v44  ;;  %v1670_v43 = vand.u32 4294901760, %v1669_v41 }
  0xae   : > { %693 = vmatpush.msra.mxu3 %v5296_v12 }
  0xaf   : > { %499 = vmatmul.f32.vlgmr.msrb.gmra.mxu0 %v438_v47  ;;  %v439_v48 = vand.u32 4294901760, %v438_v47  ;;  %v1671_v46 = vsub.f32 %v1669_v41, %v1670_v43 }
  0xb0   : > { %695 = vmatpush.msra.mxu3 %v5298_v13  ;;  %720 = vmatpush.msrb.mxu0 %v5311_v19 }
  0xb1   : > { %v591_v49 = vpop.permute.xlu0 %590  ;;  %v440_v50 = vsub.f32 %v438_v47, %v439_v48  ;;  %524 = vmatmul.f32.vlgmr.msrb.gmra.mxu1 %v439_v48  ;;  %v1121_v9 = vpop.permute.xlu2 %1120  ;;  %v1672_v48 = vand.u32 4294901760, %v1671_v46 }
  0xb2   : > { %v592_v51 = vsel %vm240_vm0, %v591_v49, 0  ;;  %745 = vmatpush.msrb.mxu1 %v5296_v12  ;;  %724 = vmatpush.msrb.mxu0 %v5314_v20  ;;  %v1122_v11 = vsel %vm240_vm0, %v1121_v9, 0  ;;  %v2522_v9 = vld [vmem:[#allocation8 + $0x8] sm:$0xff] }
  0xb3   : > { %v612_v52 = vand.u32 4294901760, %v592_v51  ;;  %v441_v53 = vand.u32 4294901760, %v440_v50  ;;  %v1142_v17 = vand.u32 4294901760, %v1122_v11 }
  0xb4   : > { %747 = vmatpush.msrb.mxu1 %v5298_v13 }
  0xb5   : > { %v613_v55 = vsub.f32 %v592_v51, %v612_v52  ;;  %442 = vmatmul.f32.vlgmr.msra.gmra.mxu2 %v441_v53  ;;  %574 = vmatmul.f32.vlgmr.msrb.gmra.mxu3 %v437_v44  ;;  %v1143_v22 = vsub.f32 %v1122_v11, %v1142_v17 }
  0xb6   : > { %668 = vmatpush.msra.mxu2 %v5302_v15  ;;  %820 = vmatpush.msrb.mxu3 %v5327_v26 }
  0xb7   : > { %v614_v56 = vand.u32 4294901760, %v613_v55  ;;  %v1144_v24 = vand.u32 4294901760, %v1143_v22 }
  0xb8   : > { %671 = vmatpush.msra.mxu2 %v5306_v16  ;;  %826 = vmatpush.msrb.mxu3 %v5329_v27 }
  0xb9   : > { %v615_v57 = vsub.f32 %v613_v55, %v614_v56  ;;  %648 = vmatmul.f32.vlgmr.msra.gmra.mxu1 %v612_v52  ;;  %v771_v58 = vpop.permute.xlu1 %770  ;;  %v1296_v18 = vpop.permute.xlu2 %1295  ;;  %v1145_v28 = vsub.f32 %v1143_v22, %v1144_v24 }
  0xba   : > { %v772_v60 = vsel %vm240_vm0, %v771_v58, 0  ;;  %873 = vmatpush.msra.mxu1 %v5296_v12  ;;  %v1297_v21 = vsel %vm240_vm0, %v1296_v18, 0  ;;  %v2521_v18 = vld [vmem:[#allocation8] sm:$0xff] }
  0xbb   : > { %v616_v61 = vand.u32 4294901760, %v615_v57  ;;  %v792_v62 = vand.u32 4294901760, %v772_v60  ;;  %v1317_v23 = vand.u32 4294901760, %v1297_v21  ;;  %v1146_v30 = vand.u32 4294901760, %v1145_v28 }
  0xbc   : > { %875 = vmatpush.msra.mxu1 %v5298_v13 }
  0xbd   : > { %551 = vmatmul.f32.vlgmr.msrb.gmra.mxu2 %v437_v44  ;;  %617 = vmatmul.f32.vlgmr.msra.gmra.mxu0 %v616_v61  ;;  %v793_v63 = vsub.f32 %v772_v60, %v792_v62  ;;  %v1318_v25 = vsub.f32 %v1297_v21, %v1317_v23 }
  0xbe   : > { %699 = vmatmul.f32.vlgmr.msra.gmra.mxu3 %v614_v56  ;;  %789 = vmatpush.msrb.mxu2 %v5296_v12 }
  0xbf   : > { %848 = vmatpush.msra.mxu0 %v5302_v15  ;;  %925 = vmatpush.msra.mxu3 %v5296_v12  ;;  %v794_v3 = vand.u32 4294901760, %v793_v63  ;;  %v1319_v29 = vand.u32 4294901760, %v1318_v25 }
  0xc0   : > { %791 = vmatpush.msrb.mxu2 %v5298_v13 }
  0xc1   : > { %749 = vmatmul.f32.vlgmr.msrb.gmra.mxu1 %v612_v52  ;;  %v946_v0 = vpop.permute.xlu1 %945  ;;  %851 = vmatpush.msra.mxu0 %v5306_v16  ;;  %v795_v6 = vsub.f32 %v793_v63, %v794_v3  ;;  %v1320_v31 = vsub.f32 %v1318_v25, %v1319_v29 }
  0xc2   : > { %v947_v2 = vsel %vm240_vm0, %v946_v0, 0  ;;  %927 = vmatpush.msra.mxu3 %v5298_v13  ;;  %995 = vmatpush.msrb.mxu1 %v5327_v26  ;;  %v268_v50 = vpop.f32.mrf.mxu2 }
  0xc3   : > { %v967_v4 = vand.u32 4294901760, %v947_v2  ;;  %v796_v8 = vand.u32 4294901760, %v795_v6  ;;  %v1321_v34 = vand.u32 4294901760, %v1320_v31  ;;  %v299_v49 = vpop.f32.mrf.mxu3 }
  0xc4   : > { %1001 = vmatpush.msrb.mxu1 %v5329_v27  ;;  %v300_v54 = vadd.f32 %v299_v49, %v268_v50 }
  0xc5   : > { %674 = vmatmul.f32.vlgmr.msra.gmra.mxu2 %v613_v55  ;;  %726 = vmatmul.f32.vlgmr.msrb.gmra.mxu0 %v612_v52  ;;  %v968_v5 = vsub.f32 %v947_v2, %v967_v4  ;;  %v400_v2 = vpop.f32.mrf.mxu1 }
  0xc6   : > { %828 = vmatmul.f32.vlgmr.msrb.gmra.mxu3 %v792_v62  ;;  %900 = vmatpush.msra.mxu2 %v5311_v19 }
  0xc7   : > { %964 = vmatpush.msrb.mxu0 %v5296_v12  ;;  %1048 = vmatpush.msrb.mxu3 %v5296_v12  ;;  %v969_v7 = vand.u32 4294901760, %v968_v5 }
  0xc8   : > { %904 = vmatpush.msra.mxu2 %v5314_v20 }
  0xc9   : > { %879 = vmatmul.f32.vlgmr.msra.gmra.mxu1 %v794_v3  ;;  %966 = vmatpush.msrb.mxu0 %v5298_v13  ;;  %v970_v10 = vsub.f32 %v968_v5, %v969_v7 }
  0xca   : > { %1050 = vmatpush.msrb.mxu3 %v5298_v13  ;;  %1100 = vmatpush.msra.mxu1 %v5296_v12 }
  0xcb   : > { %v971_v14 = vand.u32 4294901760, %v970_v10  ;;  %v325_v57 = vpop.f32.mrf.mxu2  ;;  %v350_v60 = vpop.f32.mrf.mxu3 }
  0xcc   : > { %1102 = vmatpush.msra.mxu1 %v5298_v13  ;;  %v326_v58 = vadd.f32 %v325_v57, %v300_v54 }
  0xcd   : > { %797 = vmatmul.f32.vlgmr.msrb.gmra.mxu2 %v796_v8  ;;  %854 = vmatmul.f32.vlgmr.msra.gmra.mxu0 %v793_v63  ;;  %v377_v63 = vpop.f32.mrf.mxu0 }
  0xce   : > { %929 = vmatmul.f32.vlgmr.msra.gmra.mxu3 %v792_v62  ;;  %1023 = vmatpush.msrb.mxu2 %v5302_v15  ;;  %v351_v61 = vadd.f32 %v350_v60, %v326_v58 }
  0xcf   : > { %1075 = vmatpush.msra.mxu0 %v5311_v19  ;;  %1170 = vmatpush.msra.mxu3 %v5327_v26 }
  0xd0   : > { %1026 = vmatpush.msrb.mxu2 %v5306_v16  ;;  %v378_v0 = vadd.f32 %v377_v63, %v351_v61 }
  0xd1   : > { %1003 = vmatmul.f32.vlgmr.msrb.gmra.mxu1 %v967_v4  ;;  %1079 = vmatpush.msra.mxu0 %v5314_v20  ;;  %v1997_v52 = vpop.permute.xlu2 %1996 }
  0xd2   : > { %1176 = vmatpush.msra.mxu3 %v5329_v27  ;;  %1223 = vmatpush.msrb.mxu1 %v5296_v12  ;;  %v1998_v53 = vsel %vm240_vm0, %v1997_v52, 0 }
  0xd3   : > { %v5470_v56 = vand.u32 4294901760, %v1998_v53 }
  0xd4   : > { %1225 = vmatpush.msrb.mxu1 %v5298_v13 }
  0xd5   : > { %906 = vmatmul.f32.vlgmr.msra.gmra.mxu2 %v792_v62  ;;  %972 = vmatmul.f32.vlgmr.msrb.gmra.mxu0 %v971_v14  ;;  %v2019_v62 = vsub.f32 %v1998_v53, %v5470_v56 }
  0xd6   : > { %1054 = vmatmul.f32.vlgmr.msrb.gmra.mxu3 %v969_v7  ;;  %1139 = vmatpush.msra.mxu2 %v5296_v12 }
  0xd7   : > { %1198 = vmatpush.msrb.mxu0 %v5302_v15  ;;  %1275 = vmatpush.msrb.mxu3 %v5296_v12  ;;  %v2020_v3 = vand.u32 4294901760, %v2019_v62 }
  0xd8   : > { %1141 = vmatpush.msra.mxu2 %v5298_v13 }
  0xd9   : > { %1104 = vmatmul.f32.vlgmr.msra.gmra.mxu1 %v967_v4  ;;  %1201 = vmatpush.msrb.mxu0 %v5306_v16  ;;  %v1476_v32 = vpop.permute.xlu0 %1475  ;;  %v2021_v6 = vsub.f32 %v2019_v62, %v2020_v3 }
  0xda   : > { %1277 = vmatpush.msrb.mxu3 %v5298_v13  ;;  %1345 = vmatpush.msra.mxu1 %v5327_v26  ;;  %v1477_v33 = vsel %vm240_vm0, %v1476_v32, 0 }
  0xdb   : > { %v1497_v35 = vand.u32 4294901760, %v1477_v33  ;;  %v2022_v10 = vand.u32 4294901760, %v2021_v6 }
  0xdc   : > { %1351 = vmatpush.msra.mxu1 %v5329_v27 }
  0xdd   : > { %1029 = vmatmul.f32.vlgmr.msrb.gmra.mxu2 %v968_v5  ;;  %1081 = vmatmul.f32.vlgmr.msra.gmra.mxu0 %v967_v4  ;;  %v1498_v38 = vsub.f32 %v1477_v33, %v1497_v35  ;;  %v401_v4 = vadd.f32 %v400_v2, %v378_v0 }
  0xde   : > { %1178 = vmatmul.f32.vlgmr.msra.gmra.mxu3 %v1142_v17  ;;  %1250 = vmatpush.msrb.mxu2 %v5311_v19 }
  0xdf   : > { %1314 = vmatpush.msra.mxu0 %v5296_v12  ;;  %1398 = vmatpush.msra.mxu3 %v5296_v12  ;;  %v1499_v40 = vand.u32 4294901760, %v1498_v38 }
  0xe0   : > { %1254 = vmatpush.msrb.mxu2 %v5314_v20  ;;  %404 = vrot.lane.b32.xlu0 %v401_v4, %s5114_s28  ;;  %s5128_s28 = smov 126  }
  0xe1   : > { %1229 = vmatmul.f32.vlgmr.msrb.gmra.mxu1 %v1144_v24  ;;  %1316 = vmatpush.msra.mxu0 %v5298_v13  ;;  %v1500_v42 = vsub.f32 %v1498_v38, %v1499_v40  ;;  %v1822_v45 = vpop.permute.xlu1 %1821 }
  0xe2   : > { %1400 = vmatpush.msra.mxu3 %v5298_v13  ;;  %1450 = vmatpush.msrb.mxu1 %v5296_v12  ;;  %v1823_v47 = vsel %vm240_vm0, %v1822_v45, 0 }
  0xe3   : > { %v1501_v44 = vand.u32 4294901760, %v1500_v42  ;;  %v5461_v51 = vand.u32 4294901760, %v1823_v47 }
  0xe4   : > { %1452 = vmatpush.msrb.mxu1 %v5298_v13 }
  0xe5   : > { %1147 = vmatmul.f32.vlgmr.msra.gmra.mxu2 %v1146_v30  ;;  %1204 = vmatmul.f32.vlgmr.msrb.gmra.mxu0 %v1143_v22  ;;  %v1844_v55 = vsub.f32 %v1823_v47, %v5461_v51  ;;  %v5504_v22 = vand.u32 4294901760, %v2521_v18 }
  0xe6   : > { %1279 = vmatmul.f32.vlgmr.msrb.gmra.mxu3 %v1142_v17  ;;  %1373 = vmatpush.msra.mxu2 %v5302_v15 }
  0xe7   : > { %1425 = vmatpush.msrb.mxu0 %v5311_v19  ;;  %1525 = vmatpush.msrb.mxu3 %v5327_v26  ;;  %v1845_v59 = vand.u32 4294901760, %v1844_v55  ;;  %v5520_v28 = vsub.f32 %v2521_v18, %v5504_v22 }
  0xe8   : > { %1376 = vmatpush.msra.mxu2 %v5306_v16 }
  0xe9   : > { %1353 = vmatmul.f32.vlgmr.msra.gmra.mxu1 %v1317_v23  ;;  %1429 = vmatpush.msrb.mxu0 %v5314_v20  ;;  %v1846_v1 = vsub.f32 %v1844_v55, %v1845_v59 }
  0xea   : > { %1531 = vmatpush.msrb.mxu3 %v5329_v27  ;;  %1578 = vmatpush.msra.mxu1 %v5296_v12 }
  0xeb   : > { %v1847_v5 = vand.u32 4294901760, %v1846_v1 }
  0xec   : > { %1580 = vmatpush.msra.mxu1 %v5298_v13 }
  0xed   : > { %1256 = vmatmul.f32.vlgmr.msrb.gmra.mxu2 %v1142_v17  ;;  %1322 = vmatmul.f32.vlgmr.msra.gmra.mxu0 %v1321_v34  ;;  %v5498_v17 = vand.u32 4294901760, %v2522_v9 }
  0xee   : > { %1404 = vmatmul.f32.vlgmr.msra.gmra.mxu3 %v1319_v29  ;;  %1494 = vmatpush.msrb.mxu2 %v5296_v12 }
  0xef   : > { %1553 = vmatpush.msra.mxu0 %v5302_v15  ;;  %1630 = vmatpush.msra.mxu3 %v5296_v12  ;;  %v5510_v24 = vsub.f32 %v2522_v9, %v5498_v17 }
  0xf0   : > { %1496 = vmatpush.msrb.mxu2 %v5298_v13 }
  0xf1   : > { %1454 = vmatmul.f32.vlgmr.msrb.gmra.mxu1 %v1317_v23  ;;  %1556 = vmatpush.msra.mxu0 %v5306_v16  ;;  %v2177_v7 = vpop.permute.xlu0 %2176  ;;  %v5523_v30 = vand.u32 4294901760, %v5510_v24 }
  0xf2   : > { %1632 = vmatpush.msra.mxu3 %v5298_v13  ;;  %1696 = vmatpush.msrb.mxu1 %v5327_v26  ;;  %v2178_v8 = vsel %vm240_vm0, %v2177_v7, 0 }
  0xf3   : > { %v5496_v11 = vand.u32 4294901760, %v2178_v8 }
  0xf4   : > { %1702 = vmatpush.msrb.mxu1 %v5329_v27 }
  0xf5   : > { %1379 = vmatmul.f32.vlgmr.msra.gmra.mxu2 %v1318_v25  ;;  %1431 = vmatmul.f32.vlgmr.msrb.gmra.mxu0 %v1317_v23  ;;  %v2199_v23 = vsub.f32 %v2178_v8, %v5496_v11 }
  0xf6   : > { %1533 = vmatmul.f32.vlgmr.msrb.gmra.mxu3 %v1497_v35  ;;  %1605 = vmatpush.msra.mxu2 %v5311_v19 }
  0xf7   : > { %1665 = vmatpush.msrb.mxu0 %v5296_v12  ;;  %1749 = vmatpush.msrb.mxu3 %v5296_v12  ;;  %v2200_v29 = vand.u32 4294901760, %v2199_v23 }
  0xf8   : > { %1609 = vmatpush.msra.mxu2 %v5314_v20 }
  0xf9   : > { %1584 = vmatmul.f32.vlgmr.msra.gmra.mxu1 %v1499_v40  ;;  %1667 = vmatpush.msrb.mxu0 %v5298_v13  ;;  %v2352_v14 = vpop.permute.xlu1 %2351  ;;  %v2201_v32 = vsub.f32 %v2199_v23, %v2200_v29 }
  0xfa   : > { %1751 = vmatpush.msrb.mxu3 %v5298_v13  ;;  %1801 = vmatpush.msra.mxu1 %v5296_v12  ;;  %v2353_v21 = vsel %vm240_vm0, %v2352_v14, 0 }
  0xfb   : > { %v5514_v25 = vand.u32 4294901760, %v2353_v21 }
  0xfc   : > { %1803 = vmatpush.msra.mxu1 %v5298_v13 }
  0xfd   : > { %1502 = vmatmul.f32.vlgmr.msrb.gmra.mxu2 %v1501_v44  ;;  %1559 = vmatmul.f32.vlgmr.msra.gmra.mxu0 %v1498_v38  ;;  %v2374_v31 = vsub.f32 %v2353_v21, %v5514_v25  ;;  %v2527_v38 = vpop.permute.xlu2 %2526 }
  0xfe   : > { %1634 = vmatmul.f32.vlgmr.msra.gmra.mxu3 %v1497_v35  ;;  %1724 = vmatpush.msrb.mxu2 %v5302_v15 }
  0xff   : > { %1776 = vmatpush.msra.mxu0 %v5311_v19  ;;  %1871 = vmatpush.msra.mxu3 %v5327_v26  ;;  %v2375_v33 = vand.u32 4294901760, %v2374_v31 }
 0x100   : > { %1727 = vmatpush.msrb.mxu2 %v5306_v16 }
 0x101   : > { %1704 = vmatmul.f32.vlgmr.msrb.gmra.mxu1 %v1668_v39  ;;  %1780 = vmatpush.msra.mxu0 %v5314_v20  ;;  %v2376_v37 = vsub.f32 %v2374_v31, %v2375_v33 }
 0x102   : > { %1877 = vmatpush.msra.mxu3 %v5329_v27  ;;  %1924 = vmatpush.msrb.mxu1 %v5296_v12 }
 0x104   : > { %1926 = vmatpush.msrb.mxu1 %v5298_v13 }
 0x105   : > { %1611 = vmatmul.f32.vlgmr.msra.gmra.mxu2 %v1497_v35  ;;  %1673 = vmatmul.f32.vlgmr.msrb.gmra.mxu0 %v1672_v48  ;;  %v2202_v35 = vand.u32 4294901760, %v2201_v32 }
 0x106   : > { %1755 = vmatmul.f32.vlgmr.msrb.gmra.mxu3 %v1670_v43  ;;  %1840 = vmatpush.msra.mxu2 %v5296_v12 }
 0x107   : > { %1899 = vmatpush.msrb.mxu0 %v5302_v15  ;;  %1976 = vmatpush.msrb.mxu3 %v5296_v12 }
 0x108   : > { %1842 = vmatpush.msra.mxu2 %v5298_v13 }
 0x109   : > { %1805 = vmatmul.f32.vlgmr.msra.gmra.mxu1 %v1668_v39  ;;  %1902 = vmatpush.msrb.mxu0 %v5306_v16 }
 0x10a   : > { %1978 = vmatpush.msrb.mxu3 %v5298_v13  ;;  %2046 = vmatpush.msra.mxu1 %v5327_v26 }
 0x10c   : > { %2052 = vmatpush.msra.mxu1 %v5329_v27 }
 0x10d   : > { %1730 = vmatmul.f32.vlgmr.msrb.gmra.mxu2 %v1669_v41  ;;  %1782 = vmatmul.f32.vlgmr.msra.gmra.mxu0 %v1668_v39  ;;  %v2528_v41 = vsel %vm240_vm0, %v2527_v38, 0 }
 0x10e   : > { %1879 = vmatmul.f32.vlgmr.msra.gmra.mxu3 %v5461_v51  ;;  %1951 = vmatpush.msrb.mxu2 %v5311_v19 }
 0x10f   : > { %2015 = vmatpush.msra.mxu0 %v5296_v12  ;;  %2099 = vmatpush.msra.mxu3 %v5296_v12 }
 0x110   : > { %1955 = vmatpush.msrb.mxu2 %v5314_v20 }
 0x111   : > { %1930 = vmatmul.f32.vlgmr.msrb.gmra.mxu1 %v1845_v59  ;;  %2017 = vmatpush.msra.mxu0 %v5298_v13 }
 0x112   : > { %2101 = vmatpush.msra.mxu3 %v5298_v13  ;;  %2151 = vmatpush.msrb.mxu1 %v5296_v12 }
 0x114   : > { %2153 = vmatpush.msrb.mxu1 %v5298_v13 }
 0x115   : > { %1848 = vmatmul.f32.vlgmr.msra.gmra.mxu2 %v1847_v5  ;;  %1905 = vmatmul.f32.vlgmr.msrb.gmra.mxu0 %v1844_v55 }
 0x116   : > { %1980 = vmatmul.f32.vlgmr.msrb.gmra.mxu3 %v5461_v51  ;;  %2074 = vmatpush.msra.mxu2 %v5302_v15 }
 0x117   : > { %2126 = vmatpush.msrb.mxu0 %v5311_v19  ;;  %2226 = vmatpush.msrb.mxu3 %v5327_v26 }
 0x118   : > { %2077 = vmatpush.msra.mxu2 %v5306_v16 }
 0x119   : > { %2054 = vmatmul.f32.vlgmr.msra.gmra.mxu1 %v5470_v56  ;;  %2130 = vmatpush.msrb.mxu0 %v5314_v20 }
 0x11a   : > { %2232 = vmatpush.msrb.mxu3 %v5329_v27  ;;  %2279 = vmatpush.msra.mxu1 %v5296_v12 }
 0x11c   : > { %2281 = vmatpush.msra.mxu1 %v5298_v13 }
 0x11d   : > { %1957 = vmatmul.f32.vlgmr.msrb.gmra.mxu2 %v5461_v51  ;;  %2023 = vmatmul.f32.vlgmr.msra.gmra.mxu0 %v2022_v10 }
 0x11e   : > { %2105 = vmatmul.f32.vlgmr.msra.gmra.mxu3 %v2020_v3  ;;  %2195 = vmatpush.msrb.mxu2 %v5296_v12 }
 0x11f   : > { %2254 = vmatpush.msra.mxu0 %v5302_v15  ;;  %2331 = vmatpush.msra.mxu3 %v5296_v12 }
 0x120   : > { %2197 = vmatpush.msrb.mxu2 %v5298_v13 }
 0x121   : > { %2155 = vmatmul.f32.vlgmr.msrb.gmra.mxu1 %v5470_v56  ;;  %2257 = vmatpush.msra.mxu0 %v5306_v16 }
 0x122   : > { %2333 = vmatpush.msra.mxu3 %v5298_v13  ;;  %2401 = vmatpush.msrb.mxu1 %v5327_v26  ;;  %v5531_v26 = vand.u32 4294901760, %v5520_v28 }
 0x124   : > { %2407 = vmatpush.msrb.mxu1 %v5329_v27  ;;  %v2574_v27 = vsub.f32 %v5510_v24, %v5523_v30  ;;  %v2580_v34 = vsub.f32 %v5520_v28, %v5531_v26 }
 0x125   : > { %2080 = vmatmul.f32.vlgmr.msra.gmra.mxu2 %v2019_v62  ;;  %2132 = vmatmul.f32.vlgmr.msrb.gmra.mxu0 %v5470_v56  ;;  %v2882_v62 = vpop.permute.xlu1 %2881 }
 0x126   : > { %2234 = vmatmul.f32.vlgmr.msrb.gmra.mxu3 %v5496_v11  ;;  %2306 = vmatpush.msra.mxu2 %v5311_v19  ;;  %v5543_v36 = vand.u32 4294901760, %v2574_v27  ;;  %v5548_v40 = vand.u32 4294901760, %v2580_v34  ;;  %v2883_v1 = vsel %vm240_vm0, %v2882_v62, 0 }
 0x127   : > { %2370 = vmatpush.msrb.mxu0 %v5296_v12  ;;  %2454 = vmatpush.msrb.mxu3 %v5296_v12  ;;  %v2903_v7 = vand.u32 4294901760, %v2883_v1 }
 0x128   : > { %2310 = vmatpush.msra.mxu2 %v5314_v20 }
 0x129   : > { %2285 = vmatmul.f32.vlgmr.msra.gmra.mxu1 %v2200_v29  ;;  %2372 = vmatpush.msrb.mxu0 %v5298_v13 }
 0x12a   : > { %2456 = vmatpush.msrb.mxu3 %v5298_v13  ;;  %2506 = vmatpush.msra.mxu1 %v5296_v12 }
 0x12c   : > { %2508 = vmatpush.msra.mxu1 %v5298_v13  ;;  %v2377_v13 = vand.u32 4294901760, %v2376_v37  ;;  %v500_v42 = vpop.f32.mrf.mxu0 }
 0x12d   : > { %2203 = vmatmul.f32.vlgmr.msrb.gmra.mxu2 %v2202_v35  ;;  %2260 = vmatmul.f32.vlgmr.msra.gmra.mxu0 %v2199_v23 }
 0x12e   : > { %2335 = vmatmul.f32.vlgmr.msra.gmra.mxu3 %v5496_v11  ;;  %v525_v39 = vpop.f32.mrf.mxu1  ;;  %2429 = vmatpush.msrb.mxu2 %v5302_v15  ;;  %v5558_v15 = vand.u32 4294901760, %v2528_v41 }
 0x12f   : > { %2481 = vmatpush.msra.mxu0 %v5311_v19  ;;  %2576 = vmatpush.msra.mxu3 %v5543_v36  ;;  %v2702_v19 = vpop.permute.xlu0 %2701 }
 0x130   : > { %v474_v12 = vpop.f32.mrf.mxu3  ;;  %2432 = vmatpush.msrb.mxu2 %v5306_v16  ;;  %v2703_v43 = vsel %vm240_vm0, %v2702_v19, 0  ;;  %vm1642_vm0 = vcmask 404608  }
 0x131   : > { %2409 = vmatmul.f32.vlgmr.msrb.gmra.mxu1 %v5514_v25  ;;  %2485 = vmatpush.msra.mxu0 %v5314_v20  ;;  %v2549_v20 = vsub.f32 %v2528_v41, %v5558_v15  ;;  %v5570_v47 = vand.u32 4294901760, %v2703_v43 }
 0x132   : > { %2582 = vmatpush.msra.mxu3 %v5548_v40  ;;  %2629 = vmatpush.msrb.mxu1 %v5498_v17 }
 0x133   : > { %v2550_v49 = vand.u32 4294901760, %v2549_v20  ;;  %v5577_v51 = vsub.f32 %v2703_v43, %v5570_v47 }
 0x134   : > { %2631 = vmatpush.msrb.mxu1 %v5504_v22 }
 0x135   : > { %2312 = vmatmul.f32.vlgmr.msra.gmra.mxu2 %v5496_v11  ;;  %2378 = vmatmul.f32.vlgmr.msrb.gmra.mxu0 %v2377_v13  ;;  %v2551_v53 = vsub.f32 %v2549_v20, %v2550_v49  ;;  %v2725_v58 = vand.u32 4294901760, %v5577_v51  ;;  %v2904_v11 = vsub.f32 %v2883_v1, %v2903_v7 }
 0x136   : > { %2460 = vmatmul.f32.vlgmr.msrb.gmra.mxu3 %v2375_v33  ;;  %v649_v16 = vpop.f32.mrf.mxu1  ;;  %2545 = vmatpush.msra.mxu2 %v5498_v17 }
 0x137   : > { %2604 = vmatpush.msrb.mxu0 %v5510_v24  ;;  %2681 = vmatpush.msrb.mxu3 %v5498_v17  ;;  %v2552_v60 = vand.u32 4294901760, %v2551_v53  ;;  %v2726_v63 = vsub.f32 %v5577_v51, %v2725_v58  ;;  %v2905_v29 = vand.u32 4294901760, %v2904_v11 }
 0x138   : > { %v443_v44 = vpop.f32.mrf.mxu2  ;;  %v575_v45 = vpop.f32.mrf.mxu3  ;;  %2547 = vmatpush.msra.mxu2 %v5504_v22 }
 0x139   : > { %v475_v46 = vadd.f32 %v474_v12, %v443_v44  ;;  %2510 = vmatmul.f32.vlgmr.msra.gmra.mxu1 %v5514_v25  ;;  %2607 = vmatpush.msrb.mxu0 %v5520_v28  ;;  %v2727_v4 = vand.u32 4294901760, %v2726_v63  ;;  %v2906_v32 = vsub.f32 %v2904_v11, %v2905_v29 }
 0x13a   : > { %v618_v48 = vpop.f32.mrf.mxu0  ;;  %2683 = vmatpush.msrb.mxu3 %v5504_v22  ;;  %2751 = vmatpush.msra.mxu1 %v5543_v36 }
 0x13b   : > { %v501_v50 = vadd.f32 %v500_v42, %v475_v46  ;;  %v650_v2 = vadd.f32 %v649_v16, %v618_v48  ;;  %v2907_v34 = vand.u32 4294901760, %v2906_v32 }
 0x13c   : > { %2757 = vmatpush.msra.mxu1 %v5548_v40 }
 0x13d   : > { %2435 = vmatmul.f32.vlgmr.msrb.gmra.mxu2 %v2374_v31  ;;  %2487 = vmatmul.f32.vlgmr.msra.gmra.mxu0 %v5514_v25  ;;  %v526_v54 = vadd.f32 %v525_v39, %v501_v50 }
 0x13e   : > { %2584 = vmatmul.f32.vlgmr.msra.gmra.mxu3 %v5558_v15  ;;  %v750_v52 = vpop.f32.mrf.mxu1  ;;  %2656 = vmatpush.msrb.mxu2 %v5523_v30 }
 0x13f   : > { %2720 = vmatpush.msra.mxu0 %v5498_v17  ;;  %2804 = vmatpush.msra.mxu3 %v5498_v17 }
 0x140   : > { %v552_v55 = vpop.f32.mrf.mxu2  ;;  %2660 = vmatpush.msrb.mxu2 %v5531_v26 }
 0x141   : > { %v553_v56 = vadd.f32 %v552_v55, %v526_v54  ;;  %v700_v57 = vpop.f32.mrf.mxu3  ;;  %2635 = vmatmul.f32.vlgmr.msrb.gmra.mxu1 %v2550_v49  ;;  %2722 = vmatpush.msra.mxu0 %v5504_v22 }
 0x142   : > { %v727_v59 = vpop.f32.mrf.mxu0  ;;  %2806 = vmatpush.msra.mxu3 %v5504_v22  ;;  %2856 = vmatpush.msrb.mxu1 %v5498_v17 }
 0x143   : > { %v576_v61 = vadd.f32 %v575_v45, %v553_v56 }
 0x144   : > { %2858 = vmatpush.msrb.mxu1 %v5504_v22 }
 0x145   : > { %2553 = vmatmul.f32.vlgmr.msra.gmra.mxu2 %v2552_v60  ;;  %2610 = vmatmul.f32.vlgmr.msrb.gmra.mxu0 %v2549_v20 }
 0x146   : > { %2685 = vmatmul.f32.vlgmr.msrb.gmra.mxu3 %v5558_v15  ;;  %579 = vrot.lane.b32.xlu1 %v576_v61, %s5115_s30  ;;  %v880_v0 = vpop.f32.mrf.mxu1 }
 0x147   : > { %2779 = vmatpush.msra.mxu2 %v5510_v24  ;;  %2831 = vmatpush.msrb.mxu0 %v5523_v30 }
 0x148   : > { %v675_v3 = vpop.f32.mrf.mxu2  ;;  %2931 = vmatpush.msrb.mxu3 %v5543_v36 }
 0x149   : > { %v676_v5 = vadd.f32 %v675_v3, %v650_v2  ;;  %v829_v6 = vpop.f32.mrf.mxu3  ;;  %2759 = vmatmul.f32.vlgmr.msra.gmra.mxu1 %v5570_v47  ;;  %2782 = vmatpush.msra.mxu2 %v5520_v28 }
 0x14a   : > { %v855_v8 = vpop.f32.mrf.mxu0  ;;  %2835 = vmatpush.msrb.mxu0 %v5531_v26  ;;  %2937 = vmatpush.msrb.mxu3 %v5548_v40 }
 0x14b   : > { %v701_v9 = vadd.f32 %v700_v57, %v676_v5  ;;  %2984 = vmatpush.msra.mxu1 %v5498_v17 }
 0x14d   : > { %v728_v10 = vadd.f32 %v727_v59, %v701_v9  ;;  %2662 = vmatmul.f32.vlgmr.msrb.gmra.mxu2 %v5558_v15  ;;  %2728 = vmatmul.f32.vlgmr.msra.gmra.mxu0 %v2727_v4  ;;  %v5121_v4 = vmov 0.0  }
 0x14e   : > { %v1004_v14 = vpop.f32.mrf.mxu1  ;;  %2810 = vmatmul.f32.vlgmr.msra.gmra.mxu3 %v2725_v58  ;;  %2900 = vmatpush.msrb.mxu2 %v5498_v17  ;;  %234 = vst.msk [vmem:[#allocation2] sm:$0xf] %vm233_vm1, %v5121_v4  ;;  %vm1813_vm1 = vcmask 683408  }
 0x14f   : > { %v751_v18 = vadd.f32 %v750_v52, %v728_v10  ;;  %2959 = vmatpush.msra.mxu0 %v5510_v24  ;;  %3036 = vmatpush.msra.mxu3 %v5498_v17  ;;  %236 = vst.msk [vmem:[#allocation2 + $0x10] sm:$0xf] %vm235_vm2, %v5121_v4  ;;  %vm1988_vm2 = vcmask 962208  }
 0x150   : > { %v798_v21 = vpop.f32.mrf.mxu2  ;;  %2902 = vmatpush.msrb.mxu2 %v5504_v22  ;;  %2986 = vmatpush.msra.mxu1 %v5504_v22 }
 0x151   : > { %v830_v23 = vadd.f32 %v829_v6, %v798_v21  ;;  %v930_v25 = vpop.f32.mrf.mxu3  ;;  %754 = vrot.lane.b32.xlu2 %v751_v18, %s5116_s5  ;;  %2860 = vmatmul.f32.vlgmr.msrb.gmra.mxu1 %v5570_v47  ;;  %s5129_s5 = smov 93  }
 0x152   : > { %v973_v31 = vpop.f32.mrf.mxu0  ;;  %2962 = vmatpush.msra.mxu0 %v5520_v28  ;;  %3038 = vmatpush.msra.mxu3 %v5504_v22  ;;  %v405_v2 = vpop.permute.xlu0 %404 }
 0x153   : > { %v856_v24 = vadd.f32 %v855_v8, %v830_v23  ;;  %v1005_v38 = vadd.f32 %v1004_v14, %v973_v31  ;;  %408 = vst.msk [vmem:[#allocation2] sm:$0xf] %vm407_vm3, %v405_v2  ;;  %vm2166_vm3 = vcmask 1044400  }
 0x155   : > { %2785 = vmatmul.f32.vlgmr.msra.gmra.mxu2 %v5577_v51  ;;  %2837 = vmatmul.f32.vlgmr.msrb.gmra.mxu0 %v5570_v47  ;;  %v881_v27 = vadd.f32 %v880_v0, %v856_v24 }
 0x156   : > { %v1105_v17 = vpop.f32.mrf.mxu1  ;;  %2939 = vmatmul.f32.vlgmr.msrb.gmra.mxu3 %v2903_v7  ;;  %3011 = vmatpush.msra.mxu2 %v5523_v30 }
 0x158   : > { %v907_v33 = vpop.f32.mrf.mxu2  ;;  %3015 = vmatpush.msra.mxu2 %v5531_v26 }
 0x159   : > { %v908_v35 = vadd.f32 %v907_v33, %v881_v27  ;;  %v1055_v36 = vpop.f32.mrf.mxu3  ;;  %2990 = vmatmul.f32.vlgmr.msra.gmra.mxu1 %v2905_v29 }
 0x15a   : > { %v1082_v28 = vpop.f32.mrf.mxu0 }
 0x15b   : > { %v931_v22 = vadd.f32 %v930_v25, %v908_v35 }
 0x15d   : > { %934 = vrot.lane.b32.xlu2 %v931_v22, %s5117_s11  ;;  %2908 = vmatmul.f32.vlgmr.msrb.gmra.mxu2 %v2907_v34 }
 0x15e   : > { %v1230_v37 = vpop.f32.mrf.mxu1  ;;  %2965 = vmatmul.f32.vlgmr.msra.gmra.mxu0 %v2904_v11  ;;  %3040 = vmatmul.f32.vlgmr.msra.gmra.mxu3 %v2903_v7 }
 0x160   : > { %v1030_v39 = vpop.f32.mrf.mxu2 }
 0x161   : > { %v1031_v30 = vadd.f32 %v1030_v39, %v1005_v38  ;;  %v1179_v40 = vpop.f32.mrf.mxu3 }
 0x162   : > { %v1205_v12 = vpop.f32.mrf.mxu0 }
 0x163   : > { %v1056_v41 = vadd.f32 %v1055_v36, %v1031_v30 }
 0x165   : > { %v1083_v26 = vadd.f32 %v1082_v28, %v1056_v41  ;;  %3017 = vmatmul.f32.vlgmr.msra.gmra.mxu2 %v2903_v7 }
 0x166   : > { %v1354_v13 = vpop.f32.mrf.mxu1 }
 0x167   : > { %v1106_v42 = vadd.f32 %v1105_v17, %v1083_v26 }
 0x168   : > { %v1148_v15 = vpop.f32.mrf.mxu2 }
 0x169   : > { %v1180_v19 = vadd.f32 %v1179_v40, %v1148_v15  ;;  %v1280_v16 = vpop.f32.mrf.mxu3  ;;  %1109 = vrot.lane.b32.xlu1 %v1106_v42, %s5118_s12  ;;  %s5130_s12 = smov 60  }
 0x16a   : > { %v1323_v43 = vpop.f32.mrf.mxu0 }
 0x16b   : > { %v1206_v20 = vadd.f32 %v1205_v12, %v1180_v19  ;;  %v1355_v52 = vadd.f32 %v1354_v13, %v1323_v43 }
 0x16d   : > { %v1231_v45 = vadd.f32 %v1230_v37, %v1206_v20 }
 0x16e   : > { %v1455_v44 = vpop.f32.mrf.mxu1 }
 0x170   : > { %v1257_v46 = vpop.f32.mrf.mxu2 }
 0x171   : > { %v1258_v47 = vadd.f32 %v1257_v46, %v1231_v45  ;;  %v1405_v48 = vpop.f32.mrf.mxu3 }
 0x172   : > { %v1432_v49 = vpop.f32.mrf.mxu0 }
 0x173   : > { %v1281_v50 = vadd.f32 %v1280_v16, %v1258_v47 }
 0x175   : > { %1284 = vrot.lane.b32.xlu2 %v1281_v50, %s5119_s13 }
 0x176   : > { %v1585_v51 = vpop.f32.mrf.mxu1 }
 0x178   : > { %v1380_v53 = vpop.f32.mrf.mxu2 }
 0x179   : > { %v1381_v54 = vadd.f32 %v1380_v53, %v1355_v52  ;;  %v1534_v55 = vpop.f32.mrf.mxu3 }
 0x17a   : > { %v1560_v56 = vpop.f32.mrf.mxu0 }
 0x17b   : > { %v1406_v57 = vadd.f32 %v1405_v48, %v1381_v54 }
 0x17d   : > { %v1433_v58 = vadd.f32 %v1432_v49, %v1406_v57 }
 0x17e   : > { %v1705_v59 = vpop.f32.mrf.mxu1 }
 0x17f   : > { %v1456_v60 = vadd.f32 %v1455_v44, %v1433_v58 }
 0x180   : > { %v1503_v61 = vpop.f32.mrf.mxu2 }
 0x181   : > { %v1535_v62 = vadd.f32 %v1534_v55, %v1503_v61  ;;  %v1635_v63 = vpop.f32.mrf.mxu3  ;;  %1459 = vrot.lane.b32.xlu0 %v1456_v60, %s5120_s14  ;;  %s5131_s14 = smov 59  }
 0x182   : > { %v1674_v0 = vpop.f32.mrf.mxu0 }
 0x183   : > { %v1561_v1 = vadd.f32 %v1560_v56, %v1535_v62  ;;  %v1706_v14 = vadd.f32 %v1705_v59, %v1674_v0 }
 0x185   : > { %v1586_v5 = vadd.f32 %v1585_v51, %v1561_v1 }
 0x186   : > { %v1806_v3 = vpop.f32.mrf.mxu1 }
 0x188   : > { %v1612_v6 = vpop.f32.mrf.mxu2 }
 0x189   : > { %v1613_v7 = vadd.f32 %v1612_v6, %v1586_v5  ;;  %v1756_v8 = vpop.f32.mrf.mxu3 }
 0x18a   : > { %v1783_v9 = vpop.f32.mrf.mxu0 }
 0x18b   : > { %v1636_v10 = vadd.f32 %v1635_v63, %v1613_v7 }
 0x18d   : > { %1639 = vrot.lane.b32.xlu0 %v1636_v10, %s5113_s27 }
 0x18e   : > { %v1931_v11 = vpop.f32.mrf.mxu1 }
 0x190   : > { %v1731_v18 = vpop.f32.mrf.mxu2 }
 0x191   : > { %v1732_v21 = vadd.f32 %v1731_v18, %v1706_v14  ;;  %v1880_v23 = vpop.f32.mrf.mxu3 }
 0x192   : > { %v1906_v25 = vpop.f32.mrf.mxu0 }
 0x193   : > { %v1757_v29 = vadd.f32 %v1756_v8, %v1732_v21 }
 0x195   : > { %v1784_v31 = vadd.f32 %v1783_v9, %v1757_v29 }
 0x196   : > { %v2055_v24 = vpop.f32.mrf.mxu1 }
 0x197   : > { %v1807_v32 = vadd.f32 %v1806_v3, %v1784_v31 }
 0x198   : > { %v1849_v17 = vpop.f32.mrf.mxu2 }
 0x199   : > { %v1881_v27 = vadd.f32 %v1880_v23, %v1849_v17  ;;  %v1981_v33 = vpop.f32.mrf.mxu3  ;;  %1810 = vrot.lane.b32.xlu2 %v1807_v32, %s5122_s19  ;;  %s5132_s19 = smov 127  }
 0x19a   : > { %v2024_v34 = vpop.f32.mrf.mxu0 }
 0x19b   : > { %v1907_v35 = vadd.f32 %v1906_v25, %v1881_v27  ;;  %v2056_v40 = vadd.f32 %v2055_v24, %v2024_v34 }
 0x19d   : > { %v1932_v36 = vadd.f32 %v1931_v11, %v1907_v35 }
 0x19e   : > { %v2156_v28 = vpop.f32.mrf.mxu1 }
 0x1a0   : > { %v1958_v22 = vpop.f32.mrf.mxu2 }
 0x1a1   : > { %v1959_v37 = vadd.f32 %v1958_v22, %v1932_v36  ;;  %v2106_v38 = vpop.f32.mrf.mxu3 }
 0x1a2   : > { %v2133_v39 = vpop.f32.mrf.mxu0 }
 0x1a3   : > { %v1982_v30 = vadd.f32 %v1981_v33, %v1959_v37 }
 0x1a5   : > { %1985 = vrot.lane.b32.xlu0 %v1982_v30, %s5123_s21 }
 0x1a6   : > { %v2286_v13 = vpop.f32.mrf.mxu1 }
 0x1a8   : > { %v2081_v12 = vpop.f32.mrf.mxu2 }
 0x1a9   : > { %v2082_v41 = vadd.f32 %v2081_v12, %v2056_v40  ;;  %v2235_v26 = vpop.f32.mrf.mxu3 }
 0x1aa   : > { %v2261_v42 = vpop.f32.mrf.mxu0 }
 0x1ab   : > { %v2107_v15 = vadd.f32 %v2106_v38, %v2082_v41  ;;  %v755_v45 = vpop.permute.xlu2 %754 }
 0x1ac   : > { %v756_v49 = vrot.slane %v755_v45, 4 }
 0x1ad   : > { %v2134_v19 = vadd.f32 %v2133_v39, %v2107_v15 }
 0x1ae   : > { %v2410_v48 = vpop.f32.mrf.mxu1  ;;  %v758_v53 = vsel %vm757_vm6, %v756_v49, %v755_v45  ;;  %vm2168_vm6 = vmor %vm2167_vm4, %vm2166_vm3  ;;  %vm3352_vm3 = vcmask 482304   ;;  %vm3393_vm4 = vcmask 474112  }
 0x1af   : > { %v2157_v16 = vadd.f32 %v2156_v28, %v2134_v19 }
 0x1b0   : > { %v2204_v43 = vpop.f32.mrf.mxu2 }
 0x1b1   : > { %v2236_v20 = vadd.f32 %v2235_v26, %v2204_v43  ;;  %v2336_v44 = vpop.f32.mrf.mxu3  ;;  %2160 = vrot.lane.b32.xlu1 %v2157_v16, %s5124_s7  ;;  %s5133_s7 = smov 94  }
 0x1b2   : > { %v2379_v46 = vpop.f32.mrf.mxu0 }
 0x1b3   : > { %v2262_v47 = vadd.f32 %v2261_v42, %v2236_v20  ;;  %v2411_v60 = vadd.f32 %v2410_v48, %v2379_v46 }
 0x1b5   : > { %v2287_v50 = vadd.f32 %v2286_v13, %v2262_v47 }
 0x1b6   : > { %v2511_v59 = vpop.f32.mrf.mxu1 }
 0x1b7   : > { %v935_v55 = vpop.permute.xlu2 %934 }
 0x1b8   : > { %v580_v51 = vpop.permute.xlu1 %579  ;;  %v2313_v52 = vpop.f32.mrf.mxu2 }
 0x1b9   : > { %583 = vst.msk [vmem:[#allocation2] sm:$0xf] %vm582_vm7, %v580_v51  ;;  %v2314_v54 = vadd.f32 %v2313_v52, %v2287_v50  ;;  %v2461_v56 = vpop.f32.mrf.mxu3  ;;  %vm2343_vm7 = vcmask 470208  }
 0x1ba   : > { %763 = vst.msk [vmem:[#allocation2] sm:$0xff] %vm762_vm8, %v758_v53  ;;  %v2488_v58 = vpop.f32.mrf.mxu0  ;;  %vm2518_vm8 = vcmask 749008  }
 0x1bb   : > { %v2337_v57 = vadd.f32 %v2336_v44, %v2314_v54  ;;  %938 = vst.msk [vmem:[#allocation2 + $0x4] sm:$0xf] %vm937_vm9, %v935_v55  ;;  %vm2871_vm9 = vcmask 1044464  }
 0x1bd   : > { %2340 = vrot.lane.b32.xlu1 %v2337_v57, %s5125_s20 }
 0x1be   : > { %v2636_v4 = vpop.f32.mrf.mxu1 }
 0x1c0   : > { %v2436_v61 = vpop.f32.mrf.mxu2 }
 0x1c1   : > { %v2437_v62 = vadd.f32 %v2436_v61, %v2411_v60  ;;  %v2585_v0 = vpop.f32.mrf.mxu3 }
 0x1c2   : > { %v2611_v2 = vpop.f32.mrf.mxu0 }
 0x1c3   : > { %v2462_v63 = vadd.f32 %v2461_v56, %v2437_v62 }
 0x1c5   : > { %v2489_v1 = vadd.f32 %v2488_v58, %v2462_v63 }
 0x1c6   : > { %v2760_v11 = vpop.f32.mrf.mxu1 }
 0x1c7   : > { %v2512_v3 = vadd.f32 %v2511_v59, %v2489_v1 }
 0x1c8   : > { %v2554_v5 = vpop.f32.mrf.mxu2 }
 0x1c9   : > { %v2586_v6 = vadd.f32 %v2585_v0, %v2554_v5  ;;  %2515 = vrot.lane.b32.xlu0 %v2512_v3, %s5126_s24  ;;  %v2686_v8 = vpop.f32.mrf.mxu3 }
 0x1ca   : > { %v2729_v9 = vpop.f32.mrf.mxu0 }
 0x1cb   : > { %v2612_v7 = vadd.f32 %v2611_v2, %v2586_v6  ;;  %v2761_v23 = vadd.f32 %v2760_v11, %v2729_v9 }
 0x1cd   : > { %v2637_v10 = vadd.f32 %v2636_v4, %v2612_v7 }
 0x1ce   : > { %v2861_v32 = vpop.f32.mrf.mxu1 }
 0x1cf   : > { %v1285_v33 = vpop.permute.xlu2 %1284 }
 0x1d0   : > { %v2663_v14 = vpop.f32.mrf.mxu2 }
 0x1d1   : > { %v2664_v18 = vadd.f32 %v2663_v14, %v2637_v10  ;;  %v2811_v25 = vpop.f32.mrf.mxu3 }
 0x1d2   : > { %v2838_v29 = vpop.f32.mrf.mxu0 }
 0x1d3   : > { %v2687_v21 = vadd.f32 %v2686_v8, %v2664_v18 }
 0x1d5   : > { %2690 = vrot.lane.b32.xlu1 %v2687_v21, %s5127_s25 }
 0x1d6   : > { %v2991_v38 = vpop.f32.mrf.mxu1 }
 0x1d8   : > { %v2786_v31 = vpop.f32.mrf.mxu2 }
 0x1d9   : > { %v2787_v24 = vadd.f32 %v2786_v31, %v2761_v23  ;;  %v2940_v35 = vpop.f32.mrf.mxu3 }
 0x1db   : > { %v2812_v17 = vadd.f32 %v2811_v25, %v2787_v24  ;;  %v1110_v27 = vpop.permute.xlu1 %1109  ;;  %v2966_v22 = vpop.f32.mrf.mxu0 }
 0x1dc   : > { %1113 = vst.msk [vmem:[#allocation2 + $0x4] sm:$0xf] %vm1112_vm10, %v1110_v27  ;;  %vm2872_vm10 = vcmask 261124  }
 0x1dd   : > { %v2839_v34 = vadd.f32 %v2838_v29, %v2812_v17  ;;  %1288 = vst.msk [vmem:[#allocation2 + $0x4] sm:$0xf] %vm1287_vm11, %v1285_v33  ;;  %vm2868_vm11 = vcmask 1031168   ;;  %vm2873_vm13 = vmor %vm2872_vm10, %vm2871_vm9  ;;  %vm4466_vm9 = vcmask 519424  }
 0x1df   : > { %v2862_v36 = vadd.f32 %v2861_v32, %v2839_v34 }
 0x1e0   : > { %v2909_v28 = vpop.f32.mrf.mxu2 }
 0x1e1   : > { %2865 = vrot.lane.b32.xlu2 %v2862_v36, %s5128_s28  ;;  %v2941_v37 = vadd.f32 %v2940_v35, %v2909_v28  ;;  %v3041_v12 = vpop.f32.mrf.mxu3 }
 0x1e3   : > { %v2967_v39 = vadd.f32 %v2966_v22, %v2941_v37 }
 0x1e5   : > { %v2992_v30 = vadd.f32 %v2991_v38, %v2967_v39 }
 0x1e8   : > { %v3018_v40 = vpop.f32.mrf.mxu2 }
 0x1e9   : > { %v3019_v41 = vadd.f32 %v3018_v40, %v2992_v30 }
 0x1eb   : > { %v3042_v26 = vadd.f32 %v3041_v12, %v3019_v41 }
 0x1ed   : > { %3045 = vrot.lane.b32.xlu2 %v3042_v26, %s5112_s26 }
 0x1f3   : > { %v1460_v13 = vpop.permute.xlu0 %1459  ;;  %v1811_v43 = vpop.permute.xlu2 %1810 }
 0x1f4   : > { %v1461_v42 = vrot.slane %v1460_v13, 4 }
 0x1f6   : > { %v1463_v15 = vsel %vm1462_vm14, %v1461_v42, %v1460_v13  ;;  %vm3048_vm14 = vcmask 535808  }
 0x1f7   : > { %1468 = vst.msk [vmem:[#allocation2 + $0x4] sm:$0xff] %vm1467_vm15, %v1463_v15  ;;  %vm3075_vm15 = vcmask 257024  }
 0x1fe   : > { %v3050_v19 = vld [vmem:[#allocation2] sm:$0xff] }
 0x1ff   : > { %3056 = vst [vmem:[#allocation1] ss:$2 sm:$0xff] %v3050_v19  ;;  %v1640_v16 = vpop.permute.xlu0 %1639 }
 0x200   : > { %1643 = vst.msk [vmem:[#allocation2 + $0x8] sm:$0xf] %vm1642_vm0, %v1640_v16  ;;  %vm3227_vm0 = vcmask 760832  }
 0x201   : > { %1814 = vst.msk [vmem:[#allocation2 + $0x8] sm:$0xf] %vm1813_vm1, %v1811_v43  ;;  %vm3269_vm1 = vcmask 752640  }
 0x206   : > { %v3061_v20 = vld.sshfl [vmem:[#allocation1] sm:$0xff pattern:$0x75316420]  ;;  %v3062_v44 = vld.sshfl [vmem:[#allocation1 + $0x8] sm:$0xff pattern:$0x75316420] }
 0x207   : > { %3084 = vst [vmem:[#allocation1 + $0x1] ss:$2 sm:$0xff] %v3050_v19 }
 0x208   : > { %3071 = vst [vmem:[#allocation3] sm:$0xf] %v3061_v20 }
 0x209   : > { %3072 = vst [vmem:[#allocation3 + $0x8] sm:$0xf] %v3062_v44 }
 0x20e   : > { %v5623_v45 = vld.sshfl [vmem:[#allocation1] sm:$0xff pattern:$0x75316420]  ;;  %v5625_v46 = vld.sshfl [vmem:[#allocation1 + $0x8] sm:$0xff pattern:$0x75316420] }
 0x20f   : > { %3125 = vst [vmem:[#allocation1] ss:$2 sm:$0xff] %v3050_v19 }
 0x216   : > { %v3131_v47 = vld.sshfl [vmem:[#allocation1 + $0x8] sm:$0xff pattern:$0x75316420]  ;;  %v3130_v48 = vld.sshfl [vmem:[#allocation1] sm:$0xff pattern:$0x75316420] }
 0x217   : > { %v1986_v49 = vpop.permute.xlu0 %1985  ;;  %3137 = vrot.lane.b32.xlu2 %v3131_v47, %s5128_s28  ;;  %3135 = vrot.lane.b32.xlu1 %v3130_v48, %s5128_s28  ;;  %3166 = vst [vmem:[#allocation1 + $0x1] ss:$2 sm:$0xff] %v3050_v19 }
 0x218   : > { %1989 = vst.msk [vmem:[#allocation2 + $0x8] sm:$0xf] %vm1988_vm2, %v1986_v49  ;;  %vm3310_vm2 = vcmask 490496  }
 0x21e   : > { %v5629_v50 = vld.sshfl [vmem:[#allocation1] sm:$0xff pattern:$0x75316420]  ;;  %v3172_v51 = vld.sshfl [vmem:[#allocation1 + $0x8] sm:$0xff pattern:$0x75316420] }
 0x21f   : > { %3207 = vst [vmem:[#allocation1] ss:$2 sm:$0xff] %v3050_v19 }
 0x223   : > { %v2161_v52 = vpop.permute.xlu1 %2160 }
 0x224   : > { %v2162_v53 = vrot.slane %v2161_v52, 4 }
 0x226   : > { %v2164_v54 = vsel %vm2163_vm5, %v2162_v53, %v2161_v52  ;;  %v3213_v55 = vld.sshfl [vmem:[#allocation1 + $0x8] sm:$0xff pattern:$0x75316420]  ;;  %v3212_v56 = vld.sshfl [vmem:[#allocation1] sm:$0xff pattern:$0x75316420] }
 0x227   : > { %2169 = vst.msk [vmem:[#allocation2 + $0x8] sm:$0xff] %vm2168_vm6, %v2164_v54  ;;  %3219 = vrot.lane.b32.xlu1 %v3213_v55, %s5129_s5  ;;  %3217 = vrot.lane.b32.xlu0 %v3212_v56, %s5129_s5  ;;  %vm3440_vm5 = vcmask 293888   ;;  %vm3186_vm6 = vcmask 769024  }
 0x228   : > { %3249 = vst [vmem:[#allocation1 + $0x1] ss:$2 sm:$0xff] %v3050_v19 }
 0x22f   : > { %v2341_v57 = vpop.permute.xlu1 %2340  ;;  %v3255_v58 = vld.sshfl [vmem:[#allocation1 + $0x8] sm:$0xff pattern:$0x75316420]  ;;  %v3254_v59 = vld.sshfl [vmem:[#allocation1] sm:$0xff pattern:$0x75316420] }
 0x230   : > { %2344 = vst.msk [vmem:[#allocation2 + $0xc] sm:$0xf] %vm2343_vm7, %v2341_v57  ;;  %3261 = vrot.lane.b32.xlu0 %v3255_v58, %s5127_s25  ;;  %3259 = vrot.lane.b32.xlu2 %v3254_v59, %s5127_s25  ;;  %vm3444_vm7 = vcmask 1043456  }
 0x231   : > { %3290 = vst [vmem:[#allocation1] ss:$2 sm:$0xff] %v3050_v19 }
 0x238   : > { %v3296_v60 = vld.sshfl [vmem:[#allocation1 + $0x8] sm:$0xff pattern:$0x75316420]  ;;  %v3295_v61 = vld.sshfl [vmem:[#allocation1] sm:$0xff pattern:$0x75316420] }
 0x239   : > { %3302 = vrot.lane.b32.xlu0 %v3296_v60, %s5130_s12  ;;  %3300 = vrot.lane.b32.xlu2 %v3295_v61, %s5130_s12  ;;  %3332 = vst [vmem:[#allocation1 + $0x1] ss:$2 sm:$0xff] %v3050_v19 }
 0x23b   : > { %v2516_v62 = vpop.permute.xlu0 %2515  ;;  %v2866_v63 = vpop.permute.xlu2 %2865 }
 0x23c   : > { %2519 = vst.msk [vmem:[#allocation2 + $0xc] sm:$0xf] %vm2518_vm8, %v2516_v62  ;;  %v2867_v2 = vrot.slane %v2866_v63, 4  ;;  %vm3104_vm8 = vcmask 1039360  }
 0x23e   : > { %v2869_v5 = vsel %vm2868_vm11, %v2867_v2, %v2866_v63 }
 0x240   : > { %v3338_v0 = vld.sshfl [vmem:[#allocation1 + $0x8] sm:$0xff pattern:$0x75316420]  ;;  %v3337_v1 = vld.sshfl [vmem:[#allocation1] sm:$0xff pattern:$0x75316420] }
 0x241   : > { %3344 = vrot.lane.b32.xlu2 %v3338_v0, %s5131_s14  ;;  %3342 = vrot.lane.b32.xlu1 %v3337_v1, %s5131_s14  ;;  %3373 = vst [vmem:[#allocation1] ss:$2 sm:$0xff] %v3050_v19  ;;  %v3408_v1 = vld [vmem:[%s6194_s2] sm:$0xff] }
 0x247   : > { %v2691_v3 = vpop.permute.xlu1 %2690  ;;  %v3046_v4 = vpop.permute.xlu2 %3045 }
 0x248   : > { %2694 = vst.msk [vmem:[#allocation2 + $0xc] sm:$0xf] %vm2693_vm12, %v2691_v3  ;;  %v3379_v6 = vld.sshfl [vmem:[#allocation1 + $0x8] sm:$0xff pattern:$0x75316420]  ;;  %vm4454_vm12 = vcmask 261120  }
 0x249   : > { %2874 = vst.msk [vmem:[#allocation2 + $0xc] sm:$0xff] %vm2873_vm13, %v2869_v5  ;;  %3094 = vrot.lane.b32.xlu2 %v5623_v45, %s5132_s19  ;;  %3385 = vrot.lane.b32.xlu1 %v3379_v6, %s5126_s24  ;;  %v3378_v7 = vld.sshfl [vmem:[#allocation1] sm:$0xff pattern:$0x75316420]  ;;  %v3442_v5 = vsel %vm3440_vm5, %v3408_v1, 0  ;;  %vm4509_vm13 = vcmask 736256  }
 0x24a   : > { %3383 = vrot.lane.b32.xlu0 %v3378_v7, %s5126_s24  ;;  %3049 = vst.msk [vmem:[#allocation2 + $0x10] sm:$0xf] %vm3048_vm14, %v3046_v4  ;;  %vm4524_vm14 = vcmask 998400  }
 0x250   : > { %v5645_v8 = vld [vmem:[#allocation2 + $0x8] sm:$0xff] }
 0x251   : > { %3058 = vst [vmem:[#allocation1 + $0x10] ss:$2 sm:$0xff] %v5645_v8  ;;  %v3052_v9 = vld [vmem:[#allocation2 + $0x10] sm:$0xf]  ;;  %3178 = vrot.lane.b32.xlu1 %v3172_v51, %s5133_s7 }
 0x252   : > { %3060 = vst [vmem:[#allocation1 + $0x20] ss:$2 sm:$0xff] %v3052_v9  ;;  %3176 = vrot.lane.b32.xlu0 %v5629_v50, %s5133_s7  ;;  %v3079_v10 = vld [vmem:[#allocation2 + $0x10] sm:$0xf] }
 0x253   : > { %v3121_v25 = vld [vmem:[#allocation2 + $0x10] sm:$0xf] }
 0x254   : > { %v3161_v32 = vld [vmem:[#allocation2 + $0x10] sm:$0xf] }
 0x255   : > { %v3203_v34 = vld [vmem:[#allocation2 + $0x10] sm:$0xf] }
 0x256   : > { %v3244_v22 = vld [vmem:[#allocation2 + $0x10] sm:$0xf] }
 0x257   : > { %v3286_v30 = vld [vmem:[#allocation2 + $0x10] sm:$0xf] }
 0x258   : > { %v3063_v11 = vld.sshfl [vmem:[#allocation1 + $0x10] sm:$0xff pattern:$0x75316420]  ;;  %v3064_v14 = vld.sshfl [vmem:[#allocation1 + $0x18] sm:$0xff pattern:$0x75316420] }
 0x259   : > { %3086 = vst [vmem:[#allocation1 + $0x11] ss:$2 sm:$0xff] %v5645_v8  ;;  %v3065_v18 = vld.sshfl [vmem:[#allocation1 + $0x20] sm:$0xff pattern:$0x75316420] }
 0x25a   : > { %3073 = vst [vmem:[#allocation3 + $0x10] sm:$0xf] %v3063_v11  ;;  %3096 = vrot.lane.b32.xlu0 %v5625_v46, %s5132_s19  ;;  %v3327_v42 = vld [vmem:[#allocation2 + $0x10] sm:$0xf]  ;;  %v5739_v11 = vand.u32 4294901760, %v3442_v5 }
 0x25b   : > { %3074 = vst [vmem:[#allocation3 + $0x18] sm:$0xf] %v3064_v14  ;;  %v3369_v20 = vld [vmem:[#allocation2 + $0x10] sm:$0xf] }
 0x25c   : > { %3088 = vst [vmem:[#allocation1 + $0x21] ss:$2 sm:$0xff] %v3079_v10 }
 0x25d   : > { %3076 = vst.msk [vmem:[#allocation3 + $0x20] sm:$0xf] %vm3075_vm15, %v3065_v18 }
 0x260   : > { %v3091_v21 = vld.sshfl [vmem:[#allocation1 + $0x10] sm:$0xff pattern:$0x75316420]  ;;  %v5654_v23 = vld.sshfl [vmem:[#allocation1 + $0x18] sm:$0xff pattern:$0x75316420] }
 0x261   : > { %3127 = vst [vmem:[#allocation1 + $0x10] ss:$2 sm:$0xff] %v5645_v8 }
 0x263   : > { %v5657_v29 = vld.sshfl [vmem:[#allocation1 + $0x20] sm:$0xff pattern:$0x75316420] }
 0x264   : > { %3129 = vst [vmem:[#allocation1 + $0x20] ss:$2 sm:$0xff] %v3121_v25  ;;  %v5755_v25 = vsub.f32 %v3442_v5, %v5739_v11 }
 0x268   : > { %v3132_v31 = vld.sshfl [vmem:[#allocation1 + $0x10] sm:$0xff pattern:$0x75316420]  ;;  %v3133_v24 = vld.sshfl [vmem:[#allocation1 + $0x18] sm:$0xff pattern:$0x75316420] }
 0x269   : > { %3168 = vst [vmem:[#allocation1 + $0x11] ss:$2 sm:$0xff] %v5645_v8 }
 0x26b   : > { %v5660_v17 = vld.sshfl [vmem:[#allocation1 + $0x20] sm:$0xff pattern:$0x75316420] }
 0x26c   : > { %3170 = vst [vmem:[#allocation1 + $0x21] ss:$2 sm:$0xff] %v3161_v32 }
 0x270   : > { %v3173_v27 = vld.sshfl [vmem:[#allocation1 + $0x10] sm:$0xff pattern:$0x75316420]  ;;  %v5662_v33 = vld.sshfl [vmem:[#allocation1 + $0x18] sm:$0xff pattern:$0x75316420] }
 0x271   : > { %3209 = vst [vmem:[#allocation1 + $0x10] ss:$2 sm:$0xff] %v5645_v8  ;;  %v5674_v26 = vpop.permute.xlu2 %3137 }
 0x273   : > { %v5665_v35 = vld.sshfl [vmem:[#allocation1 + $0x20] sm:$0xff pattern:$0x75316420] }
 0x274   : > { %3211 = vst [vmem:[#allocation1 + $0x20] ss:$2 sm:$0xff] %v3203_v34 }
 0x278   : > { %v3214_v36 = vld.sshfl [vmem:[#allocation1 + $0x10] sm:$0xff pattern:$0x75316420]  ;;  %v3215_v28 = vld.sshfl [vmem:[#allocation1 + $0x18] sm:$0xff pattern:$0x75316420] }
 0x279   : > { %3221 = vrot.lane.b32.xlu1 %v3214_v36, %s5129_s5  ;;  %3251 = vst [vmem:[#allocation1 + $0x11] ss:$2 sm:$0xff] %v5645_v8 }
 0x27b   : > { %v3216_v37 = vld.sshfl [vmem:[#allocation1 + $0x20] sm:$0xff pattern:$0x75316420] }
 0x27c   : > { %3253 = vst [vmem:[#allocation1 + $0x21] ss:$2 sm:$0xff] %v3244_v22 }
 0x280   : > { %v3256_v38 = vld.sshfl [vmem:[#allocation1 + $0x10] sm:$0xff pattern:$0x75316420]  ;;  %v3257_v39 = vld.sshfl [vmem:[#allocation1 + $0x18] sm:$0xff pattern:$0x75316420] }
 0x281   : > { %3263 = vrot.lane.b32.xlu2 %v3256_v38, %s5127_s25  ;;  %3292 = vst [vmem:[#allocation1 + $0x10] ss:$2 sm:$0xff] %v5645_v8  ;;  %v3434_v38 = vld [vmem:[%s6195_s3] sm:$0xff] }
 0x283   : > { %v5672_v40 = vld.sshfl [vmem:[#allocation1 + $0x20] sm:$0xff pattern:$0x75316420] }
 0x284   : > { %3294 = vst [vmem:[#allocation1 + $0x20] ss:$2 sm:$0xff] %v3286_v30 }
 0x288   : > { %v3297_v12 = vld.sshfl [vmem:[#allocation1 + $0x10] sm:$0xff pattern:$0x75316420]  ;;  %v3298_v41 = vld.sshfl [vmem:[#allocation1 + $0x18] sm:$0xff pattern:$0x75316420] }
 0x289   : > { %v3136_v13 = vpop.permute.xlu1 %3135  ;;  %3304 = vrot.lane.b32.xlu2 %v3297_v12, %s5130_s12  ;;  %3334 = vst [vmem:[#allocation1 + $0x11] ss:$2 sm:$0xff] %v5645_v8 }
 0x28a   : > { %v3145_v15 = vsel %vm2868_vm11, %v3136_v13, %v5674_v26  ;;  %v3260_v49 = vpop.permute.xlu2 %3259 }
 0x28b   : > { %3154 = vst [vmem:[#allocation3 + $0x28] sm:$0xf] %v3145_v15  ;;  %v3299_v19 = vld.sshfl [vmem:[#allocation1 + $0x20] sm:$0xff pattern:$0x75316420] }
 0x28c   : > { %3336 = vst [vmem:[#allocation1 + $0x21] ss:$2 sm:$0xff] %v3327_v42 }
 0x290   : > { %v3339_v16 = vld.sshfl [vmem:[#allocation1 + $0x10] sm:$0xff pattern:$0x75316420]  ;;  %v3340_v43 = vld.sshfl [vmem:[#allocation1 + $0x18] sm:$0xff pattern:$0x75316420] }
 0x291   : > { %3098 = vrot.lane.b32.xlu2 %v3091_v21, %s5132_s19  ;;  %3346 = vrot.lane.b32.xlu0 %v3339_v16, %s5131_s14  ;;  %3375 = vst [vmem:[#allocation1 + $0x10] ss:$2 sm:$0xff] %v5645_v8 }
 0x293   : > { %v3341_v44 = vld.sshfl [vmem:[#allocation1 + $0x20] sm:$0xff pattern:$0x75316420]  ;;  %v3301_v53 = vpop.permute.xlu2 %3300 }
 0x294   : > { %3377 = vst [vmem:[#allocation1 + $0x20] ss:$2 sm:$0xff] %v3369_v20 }
 0x298   : > { %v3380_v45 = vld.sshfl [vmem:[#allocation1 + $0x10] sm:$0xff pattern:$0x75316420]  ;;  %v3381_v52 = vld.sshfl [vmem:[#allocation1 + $0x18] sm:$0xff pattern:$0x75316420] }
 0x299   : > { %v5683_v46 = vpop.permute.xlu1 %3219  ;;  %v3218_v47 = vpop.permute.xlu0 %3217  ;;  %3348 = vrot.lane.b32.xlu2 %v3340_v43, %s5131_s14  ;;  %3139 = vrot.lane.b32.xlu0 %v3132_v31, %s5128_s28 }
 0x29a   : > { %v3228_v48 = vsel %vm3227_vm0, %v3218_v47, %v5683_v46  ;;  %3387 = vrot.lane.b32.xlu1 %v3380_v45, %s5126_s24 }
 0x29b   : > { %3237 = vst [vmem:[#allocation3 + $0x50] sm:$0xf] %v3228_v48  ;;  %v3382_v56 = vld.sshfl [vmem:[#allocation1 + $0x20] sm:$0xff pattern:$0x75316420]  ;;  %v5708_v57 = vpop.permute.xlu2 %3344 }
 0x2a1   : > { %3141 = vrot.lane.b32.xlu2 %v3133_v24, %s5128_s28  ;;  %3223 = vrot.lane.b32.xlu0 %v3215_v28, %s5129_s5  ;;  %v5769_v28 = vand.u32 4294901760, %v5755_v25 }
 0x2a2   : > { %v5692_v50 = vpop.permute.xlu0 %3261  ;;  %3180 = vrot.lane.b32.xlu1 %v3173_v27, %s5133_s7 }
 0x2a3   : > { %v3270_v51 = vsel %vm3269_vm1, %v3260_v49, %v5692_v50  ;;  %v3095_v32 = vpop.permute.xlu2 %3094  ;;  %v3484_v12 = vsub.f32 %v5755_v25, %v5769_v28 }
 0x2a4   : > { %3279 = vst [vmem:[#allocation3 + $0x50] sm:$0xf0] %v3270_v51 }
 0x2a5   : > { %v5778_v16 = vand.u32 4294901760, %v3484_v12 }
 0x2a9   : > { %3389 = vrot.lane.b32.xlu0 %v3381_v52, %s5126_s24  ;;  %3225 = vrot.lane.b32.xlu2 %v3216_v37, %s5129_s5  ;;  %s5139_s5 = smov 22  }
 0x2aa   : > { %3306 = vrot.lane.b32.xlu1 %v3298_v41, %s5130_s12 }
 0x2ab   : > { %v5700_v54 = vpop.permute.xlu0 %3302  ;;  %v3419_v0 = vld [vmem:[#allocation3 + $0x50] sm:$0xff] }
 0x2ac   : > { %v3311_v55 = vsel %vm3310_vm2, %v3301_v53, %v5700_v54  ;;  %v5731_v4 = vand.u32 4294901760, %v3419_v0 }
 0x2ad   : > { %3320 = vst [vmem:[#allocation3 + $0x78] sm:$0xf] %v3311_v55 }
 0x2ae   : > { %v5744_v18 = vsub.f32 %v3419_v0, %v5731_v4 }
 0x2b0   : > { %v3515_v24 = vand.u32 4294901760, %v5744_v18 }
 0x2b1   : > { %3182 = vrot.lane.b32.xlu0 %v5662_v33, %s5133_s7  ;;  %3391 = vrot.lane.b32.xlu2 %v3382_v56, %s5126_s24  ;;  %v5134_v33 = vmov 0   ;;  %s4854_s24 = sshll.u32 %s5272_s9, 5 }
 0x2b2   : > { %3265 = vrot.lane.b32.xlu1 %v3257_v39, %s5127_s25  ;;  %4971 = vset.pattern.permute.xlu0 %v5134_v33  ;;  %v3516_v37 = vsub.f32 %v5744_v18, %v3515_v24 }
 0x2b3   : > { %v3343_v58 = vpop.permute.xlu1 %3342  ;;  %4970 = vset.pattern.permute.xlu1 %v5134_v33 }
 0x2b4   : > { %v3353_v59 = vsel %vm3352_vm3, %v3343_v58, %v5708_v57  ;;  %v3517_v41 = vand.u32 4294901760, %v3516_v37 }
 0x2b5   : > { %3362 = vst [vmem:[#allocation3 + $0x78] sm:$0xf0] %v3353_v59 }
 0x2b9   : > { %3308 = vrot.lane.b32.xlu0 %v3299_v19, %s5130_s12  ;;  %3184 = vrot.lane.b32.xlu2 %v5665_v35, %s5133_s7  ;;  %s5136_s7 = smov 62  }
 0x2ba   : > { %3100 = vrot.lane.b32.xlu1 %v5654_v23, %s5132_s19 }
 0x2bb   : > { %v5717_v60 = vpop.permute.xlu1 %3385 }
 0x2bc   : > { %v3384_v61 = vpop.permute.xlu0 %3383  ;;  %v3424_v63 = vld [vmem:[#allocation3 + $0x78] sm:$0xff] }
 0x2bd   : > { %v3394_v62 = vsel %vm3393_vm4, %v3384_v61, %v5717_v60  ;;  %v5726_v2 = vand.u32 4294901760, %v3424_v63 }
 0x2be   : > { %3403 = vst [vmem:[#allocation3 + $0xa0] sm:$0xf] %v3394_v62 }
 0x2bf   : > { %v5736_v9 = vsub.f32 %v3424_v63, %v5726_v2 }
 0x2c1   : > { %3267 = vrot.lane.b32.xlu0 %v5672_v40, %s5127_s25  ;;  %v3509_v23 = vand.u32 4294901760, %v5736_v9 }
 0x2c2   : > { %3350 = vrot.lane.b32.xlu1 %v3341_v44, %s5131_s14  ;;  %s5141_s14 = smov 122  }
 0x2c3   : > { %v5729_v3 = vpop.permute.xlu1 %3178  ;;  %v3510_v35 = vsub.f32 %v5736_v9, %v3509_v23 }
 0x2c4   : > { %v3177_v6 = vpop.permute.xlu0 %3176 }
 0x2c5   : > { %v3187_v7 = vsel %vm3186_vm6, %v3177_v6, %v5729_v3  ;;  %v3429_v8 = vld [vmem:[#allocation3 + $0xa0] sm:$0xf]  ;;  %v3511_v30 = vand.u32 4294901760, %v3510_v35 }
 0x2c6   : > { %3196 = vst [vmem:[#allocation3 + $0x28] sm:$0xf0] %v3187_v7  ;;  %v3446_v10 = vsel %vm3444_vm7, %v3429_v8, 0 }
 0x2c7   : > { %v5741_v14 = vand.u32 4294901760, %v3446_v10 }
 0x2c9   : > { %3472 = vmatpush.msrb.mxu0 %v5741_v14  ;;  %3580 = vmatpush.msrb.mxu3 %v5741_v14  ;;  %v3502_v21 = vsub.f32 %v3446_v10, %v5741_v14 }
 0x2ca   : > { %3102 = vrot.lane.b32.xlu0 %v5657_v29, %s5132_s19  ;;  %3143 = vrot.lane.b32.xlu1 %v5660_v17, %s5128_s28  ;;  %s5135_s19 = smov 30   ;;  %s5140_s28 = smov 90  }
 0x2cb   : > { %3474 = vmatpush.msrb.mxu0 %v5726_v2  ;;  %3549 = vmatpush.msrb.mxu2 %v3502_v21  ;;  %v3503_v31 = vand.u32 4294901760, %v3502_v21 }
 0x2cc   : > { %3582 = vmatpush.msrb.mxu3 %v5726_v2  ;;  %v5760_v27 = vpop.permute.xlu0 %3096 }
 0x2cd   : > { %v3105_v29 = vsel %vm3104_vm8, %v3095_v32, %v5760_v27  ;;  %3476 = vmatpush.msrb.mxu0 %v5731_v4  ;;  %3552 = vmatpush.msrb.mxu2 %v5736_v9  ;;  %v3414_v17 = vld [vmem:[#allocation3 + $0x28] sm:$0xff]  ;;  %v3504_v34 = vsub.f32 %v3502_v21, %v3503_v31 }
 0x2ce   : > { %3114 = vst [vmem:[#allocation3] sm:$0xf0] %v3105_v29  ;;  %3584 = vmatpush.msrb.mxu3 %v5731_v4  ;;  %v3477_v36 = vand.u32 4294901760, %v3414_v17 }
 0x2cf   : > { %3555 = vmatpush.msrb.mxu2 %v5744_v18  ;;  %v3505_v22 = vand.u32 4294901760, %v3504_v34 }
 0x2d0   : > { %3478 = vmatpush.msrb.mxu0 %v3477_v36  ;;  %3586 = vmatpush.msrb.mxu3 %v3477_v36  ;;  %v3520_v39 = vsub.f32 %v3414_v17, %v3477_v36 }
 0x2d1   : > { %3506 = vmatpush.msrb.mxu1 %v3505_v22 }
 0x2d2   : > { %3558 = vmatpush.msrb.mxu2 %v3520_v39  ;;  %v3521_v40 = vand.u32 4294901760, %v3520_v39  ;;  %3437 = vperm.xlu1 %4970, %v3434_v38  }
 0x2d3   : > { %3512 = vmatpush.msrb.mxu1 %v3511_v30 }
 0x2d4   : > { %v3522_v13 = vsub.f32 %v3520_v39, %v3521_v40 }
 0x2d5   : > { %3518 = vmatpush.msrb.mxu1 %v3517_v41  ;;  %v3409_v42 = vld [vmem:[#allocation3] sm:$0xff] }
 0x2d6   : > { %v3479_v15 = vand.u32 4294901760, %v3409_v42  ;;  %v3523_v19 = vand.u32 4294901760, %v3522_v13 }
 0x2d8   : > { %3480 = vmatpush.msrb.mxu0 %v3479_v15  ;;  %3524 = vmatpush.msrb.mxu1 %v3523_v19  ;;  %v3526_v43 = vsub.f32 %v3409_v42, %v3479_v15 }
 0x2d9   : > { %3588 = vmatpush.msrb.mxu3 %v3479_v15  ;;  %3486 = vmatmul.f32.vlgmr.msrb.gmra.mxu0 %v5778_v16 }
 0x2da   : > { %3610 = vmatpush.msra.mxu0 %v3503_v31  ;;  %3561 = vmatpush.msrb.mxu2 %v3526_v43  ;;  %v3527_v20 = vand.u32 4294901760, %v3526_v43 }
 0x2db   : > { %3564 = vmatmul.f32.vlgmr.msrb.gmra.mxu2 %v5755_v25  ;;  %v5782_v44 = vpop.permute.xlu2 %3263  ;;  %3592 = vmatmul.f32.vlgmr.msrb.gmra.mxu3 %v5769_v28 }
 0x2dc   : > { %3614 = vmatpush.msra.mxu0 %v3509_v23  ;;  %v3271_v45 = vsel %vm3269_vm1, %v5692_v50, %v5782_v44  ;;  %v3528_v47 = vsub.f32 %v3526_v43, %v3527_v20 }
 0x2dd   : > { %3280 = vst [vmem:[#allocation3 + $0x58] sm:$0xf0] %v3271_v45 }
 0x2de   : > { %3618 = vmatpush.msra.mxu0 %v3515_v24  ;;  %v3529_v48 = vand.u32 4294901760, %v3528_v47 }
 0x2e0   : > { %3622 = vmatpush.msra.mxu0 %v3521_v40  ;;  %3530 = vmatpush.msrb.mxu1 %v3529_v48 }
 0x2e1   : > { %3532 = vmatmul.f32.vlgmr.msrb.gmra.mxu1 %v5739_v11 }
 0x2e2   : > { %3626 = vmatpush.msra.mxu0 %v3527_v20  ;;  %3644 = vmatpush.msra.mxu1 %v5741_v14 }
 0x2e3   : > { %3628 = vmatmul.f32.vlgmr.msra.gmra.mxu0 %v5739_v11  ;;  %v5792_v49 = vpop.permute.xlu2 %3304 }
 0x2e4   : > { %3646 = vmatpush.msra.mxu1 %v5726_v2  ;;  %v3312_v50 = vsel %vm3310_vm2, %v5700_v54, %v5792_v49 }
 0x2e5   : > { %3321 = vst [vmem:[#allocation3 + $0x80] sm:$0xf] %v3312_v50 }
 0x2e6   : > { %3648 = vmatpush.msra.mxu1 %v5731_v4 }
 0x2e8   : > { %3650 = vmatpush.msra.mxu1 %v3477_v36 }
 0x2ea   : > { %3652 = vmatpush.msra.mxu1 %v3479_v15 }
 0x2eb   : > { %3654 = vmatmul.f32.vlgmr.msra.gmra.mxu1 %v5739_v11  ;;  %v3222_v51 = vpop.permute.xlu1 %3221  ;;  %v5799_v52 = vpop.permute.xlu2 %3098 }
 0x2ec   : > { %v3229_v53 = vsel %vm3227_vm0, %v5683_v46, %v3222_v51  ;;  %v3106_v55 = vsel %vm3104_vm8, %v5760_v27, %v5799_v52 }
 0x2ed   : > { %3238 = vst [vmem:[#allocation3 + $0x58] sm:$0xf] %v3229_v53 }
 0x2ee   : > { %3115 = vst [vmem:[#allocation3 + $0x8] sm:$0xf0] %v3106_v55 }
 0x2f3   : > { %v5806_v54 = vpop.permute.xlu2 %3348 }
 0x2f4   : > { %v3420_v5 = vld [vmem:[#allocation3 + $0x58] sm:$0xff] }
 0x2f5   : > { %v3410_v18 = vld [vmem:[#allocation3 + $0x8] sm:$0xff] }
 0x2f6   : > { %v5837_v32 = vand.u32 4294901760, %v3410_v18 }
 0x2f8   : > { %v5852_v22 = vsub.f32 %v3410_v18, %v5837_v32 }
 0x2fa   : > { %v3725_v13 = vand.u32 4294901760, %v5852_v22 }
 0x2fb   : > { %v5808_v56 = vpop.permute.xlu2 %3141 }
 0x2fc   : > { %v3726_v50 = vsub.f32 %v5852_v22, %v3725_v13 }
 0x303   : > { %v3347_v58 = vpop.permute.xlu0 %3346  ;;  %v3226_v59 = vpop.permute.xlu2 %3225 }
 0x304   : > { %v3354_v61 = vsel %vm3352_vm3, %v5708_v57, %v3347_v58  ;;  %v3355_v62 = vsel %vm3352_vm3, %v3347_v58, %v5806_v54  ;;  %3241 = vst.msk [vmem:[#allocation3 + $0x70] sm:$0xf] %vm3075_vm15, %v3226_v59 }
 0x305   : > { %3363 = vst [vmem:[#allocation3 + $0x80] sm:$0xf0] %v3354_v61 }
 0x306   : > { %3364 = vst [vmem:[#allocation3 + $0x88] sm:$0xf0] %v3355_v62 }
 0x30b   : > { %v3140_v46 = vpop.permute.xlu0 %3139  ;;  %v3392_v63 = vpop.permute.xlu2 %3391 }
 0x30c   : > { %v3146_v0 = vsel %vm2868_vm11, %v5674_v26, %v3140_v46  ;;  %v3147_v1 = vsel %vm2868_vm11, %v3140_v46, %v5808_v56  ;;  %v3388_v2 = vpop.permute.xlu1 %3387  ;;  %3407 = vst.msk [vmem:[#allocation3 + $0xc0] sm:$0xf] %vm3075_vm15, %v3392_v63  ;;  %v3425_v4 = vld [vmem:[#allocation3 + $0x80] sm:$0xff] }
 0x30d   : > { %3155 = vst [vmem:[#allocation3 + $0x30] sm:$0xf] %v3146_v0  ;;  %v3395_v57 = vsel %vm3393_vm4, %v5717_v60, %v3388_v2  ;;  %v5822_v8 = vand.u32 4294901760, %v3425_v4  ;;  %v5829_v60 = vand.u32 4294901760, %v3420_v5  ;;  %v3727_v0 = vand.u32 4294901760, %v3726_v50 }
 0x30e   : > { %3156 = vst [vmem:[#allocation3 + $0x38] sm:$0xf] %v3147_v1 }
 0x30f   : > { %3404 = vst [vmem:[#allocation3 + $0xa8] sm:$0xf] %v3395_v57  ;;  %v5833_v31 = vsub.f32 %v3425_v4, %v5822_v8  ;;  %v5840_v27 = vsub.f32 %v3420_v5, %v5829_v60 }
 0x311   : > { %v3707_v29 = vand.u32 4294901760, %v5833_v31  ;;  %v3713_v38 = vand.u32 4294901760, %v5840_v27 }
 0x313   : > { %v3224_v6 = vpop.permute.xlu0 %3223  ;;  %v3185_v7 = vpop.permute.xlu2 %3184  ;;  %v3708_v12 = vsub.f32 %v5833_v31, %v3707_v29  ;;  %v3714_v15 = vsub.f32 %v5840_v27, %v3713_v38 }
 0x314   : > { %v3230_v26 = vsel %vm3227_vm0, %v3222_v51, %v3224_v6  ;;  %v3231_v9 = vsel %vm3227_vm0, %v3224_v6, %v3226_v59  ;;  %v3181_v10 = vpop.permute.xlu1 %3180  ;;  %3200 = vst.msk [vmem:[#allocation3 + $0x48] sm:$0xf0] %vm2872_vm10, %v3185_v7  ;;  %vm4582_vm0 = vcmask 670720  }
 0x315   : > { %3239 = vst [vmem:[#allocation3 + $0x60] sm:$0xf] %v3230_v26  ;;  %v3188_v14 = vsel %vm3186_vm6, %v5729_v3, %v3181_v10  ;;  %v3709_v19 = vand.u32 4294901760, %v3708_v12  ;;  %v3715_v53 = vand.u32 4294901760, %v3714_v15 }
 0x316   : > { %3240 = vst [vmem:[#allocation3 + $0x68] sm:$0xf] %v3231_v9  ;;  %v3430_v21 = vld [vmem:[#allocation3 + $0xa8] sm:$0xf] }
 0x317   : > { %3197 = vst [vmem:[#allocation3 + $0x30] sm:$0xf0] %v3188_v14  ;;  %v3449_v23 = vsel %vm3444_vm7, %v3430_v21, 0 }
 0x318   : > { %v5835_v24 = vand.u32 4294901760, %v3449_v23 }
 0x31a   : > { %3670 = vmatpush.msra.mxu2 %v5835_v24  ;;  %3778 = vmatpush.msrb.mxu1 %v5835_v24  ;;  %v3700_v3 = vsub.f32 %v3449_v23, %v5835_v24 }
 0x31b   : > { %v3390_v33 = vpop.permute.xlu0 %3389 }
 0x31c   : > { %3672 = vmatpush.msra.mxu2 %v5822_v8  ;;  %3747 = vmatpush.msrb.mxu0 %v3700_v3  ;;  %v3396_v17 = vsel %vm3393_vm4, %v3388_v2, %v3390_v33  ;;  %v3397_v34 = vsel %vm3393_vm4, %v3390_v33, %v3392_v63  ;;  %v5849_v35 = vpop.permute.xlu1 %3306  ;;  %v3701_v36 = vand.u32 4294901760, %v3700_v3  ;;  %vm4743_vm4 = vcmask 801792  }
 0x31d   : > { %3780 = vmatpush.msrb.mxu1 %v5822_v8  ;;  %3405 = vst [vmem:[#allocation3 + $0xb0] sm:$0xf] %v3396_v17  ;;  %v3313_v37 = vsel %vm3310_vm2, %v5792_v49, %v5849_v35 }
 0x31e   : > { %3406 = vst [vmem:[#allocation3 + $0xb8] sm:$0xf] %v3397_v34  ;;  %3674 = vmatpush.msra.mxu2 %v5829_v60  ;;  %3750 = vmatpush.msrb.mxu0 %v5833_v31  ;;  %v3415_v39 = vld [vmem:[#allocation3 + $0x30] sm:$0xff]  ;;  %v3702_v30 = vsub.f32 %v3700_v3, %v3701_v36 }
 0x31f   : > { %3322 = vst [vmem:[#allocation3 + $0x88] sm:$0xf] %v3313_v37  ;;  %3782 = vmatpush.msrb.mxu1 %v5829_v60  ;;  %v5862_v40 = vand.u32 4294901760, %v3415_v39 }
 0x320   : > { %3753 = vmatpush.msrb.mxu0 %v5840_v27  ;;  %v3703_v41 = vand.u32 4294901760, %v3702_v30 }
 0x321   : > { %3676 = vmatpush.msra.mxu2 %v5862_v40  ;;  %3784 = vmatpush.msrb.mxu1 %v5862_v40  ;;  %v3718_v42 = vsub.f32 %v3415_v39, %v5862_v40 }
 0x322   : > { %3704 = vmatpush.msra.mxu3 %v3703_v41 }
 0x323   : > { %3678 = vmatpush.msra.mxu2 %v5837_v32  ;;  %3756 = vmatpush.msrb.mxu0 %v3718_v42  ;;  %v3183_v43 = vpop.permute.xlu0 %3182  ;;  %v3719_v20 = vand.u32 4294901760, %v3718_v42 }
 0x324   : > { %3786 = vmatpush.msrb.mxu1 %v5837_v32  ;;  %3684 = vmatmul.f32.vlgmr.msra.gmra.mxu2 %v5778_v16  ;;  %v3189_v45 = vsel %vm3186_vm6, %v3181_v10, %v3183_v43  ;;  %v3190_v47 = vsel %vm3186_vm6, %v3183_v43, %v3185_v7  ;;  %v5876_v48 = vpop.permute.xlu1 %3265  ;;  %v3431_v49 = vld [vmem:[#allocation3 + $0xb0] sm:$0xf] }
 0x325   : > { %3710 = vmatpush.msra.mxu3 %v3709_v19  ;;  %3808 = vmatpush.msrb.mxu2 %v3701_v36  ;;  %3198 = vst [vmem:[#allocation3 + $0x38] sm:$0xf0] %v3189_v45  ;;  %v3272_v51 = vsel %vm3269_vm1, %v5782_v44, %v5876_v48  ;;  %v3720_v55 = vsub.f32 %v3718_v42, %v3719_v20  ;;  %v3452_v58 = vsel %vm3444_vm7, %v3431_v49, 0  ;;  %v3432_v63 = vld [vmem:[#allocation3 + $0xb8] sm:$0xf] }
 0x326   : > { %3199 = vst [vmem:[#allocation3 + $0x40] sm:$0xf0] %v3190_v47  ;;  %3759 = vmatpush.msrb.mxu0 %v5852_v22  ;;  %v5884_v59 = vand.u32 4294901760, %v3452_v58  ;;  %v3426_v61 = vld [vmem:[#allocation3 + $0x88] sm:$0xff]  ;;  %3790 = vmatmul.f32.vlgmr.msrb.gmra.mxu1 %v5769_v28  ;;  %v3455_v5 = vsel %vm3444_vm7, %v3432_v63, 0 }
 0x327   : > { %3281 = vst [vmem:[#allocation3 + $0x60] sm:$0xf0] %v3272_v51  ;;  %3716 = vmatpush.msra.mxu3 %v3715_v53  ;;  %3812 = vmatpush.msrb.mxu2 %v3707_v29  ;;  %v3721_v62 = vand.u32 4294901760, %v3720_v55  ;;  %v5887_v46 = vand.u32 4294901760, %v3426_v61  ;;  %v5920_v31 = vand.u32 4294901760, %v3455_v5 }
 0x328   : > { %3868 = vmatpush.msra.mxu0 %v5884_v59  ;;  %v5891_v44 = vsub.f32 %v3452_v58, %v5884_v59  ;;  %v3433_v51 = vld [vmem:[#allocation3 + $0xc0] sm:$0xf] }
 0x329   : > { %3816 = vmatpush.msrb.mxu2 %v3713_v38  ;;  %3722 = vmatpush.msra.mxu3 %v3721_v62  ;;  %v5894_v1 = vsub.f32 %v3426_v61, %v5887_v46  ;;  %v5935_v33 = vsub.f32 %v3455_v5, %v5920_v31  ;;  %v3458_v58 = vsel %vm3444_vm7, %v3433_v51, 0 }
 0x32a   : > { %3870 = vmatpush.msra.mxu0 %v5887_v46  ;;  %v3899_v2 = vand.u32 4294901760, %v5891_v44  ;;  %v5996_v63 = vand.u32 4294901760, %v3458_v58 }
 0x32b   : > { %3820 = vmatpush.msrb.mxu2 %v3719_v20  ;;  %3728 = vmatpush.msra.mxu3 %v3727_v0  ;;  %v3309_v57 = vpop.permute.xlu0 %3308  ;;  %v3905_v4 = vand.u32 4294901760, %v5894_v1  ;;  %v4097_v39 = vand.u32 4294901760, %v5935_v33 }
 0x32c   : > { %3730 = vmatmul.f32.vlgmr.msra.gmra.mxu3 %v5739_v11  ;;  %v5901_v6 = vpop.permute.xlu1 %3100  ;;  %v3314_v7 = vsel %vm3310_vm2, %v5849_v35, %v3309_v57  ;;  %3324 = vst.msk [vmem:[#allocation3 + $0x98] sm:$0xf] %vm3075_vm15, %v3309_v57  ;;  %3762 = vmatmul.f32.vlgmr.msrb.gmra.mxu0 %v5755_v25  ;;  %v3900_v26 = vsub.f32 %v5891_v44, %v3899_v2  ;;  %v3416_v9 = vld [vmem:[#allocation3 + $0x38] sm:$0xff]  ;;  %vm4597_vm2 = vcmask 932864  }
 0x32d   : > { %3824 = vmatpush.msrb.mxu2 %v3725_v13  ;;  %3842 = vmatpush.msrb.mxu3 %v5835_v24  ;;  %v3107_v10 = vsel %vm3104_vm8, %v5799_v52, %v5901_v6  ;;  %3323 = vst [vmem:[#allocation3 + $0x90] sm:$0xf] %v3314_v7  ;;  %v5914_v14 = vand.u32 4294901760, %v3416_v9  ;;  %v3906_v18 = vsub.f32 %v5894_v1, %v3905_v4 }
 0x32e   : > { %3116 = vst [vmem:[#allocation3 + $0x10] sm:$0xf0] %v3107_v10  ;;  %v3421_v21 = vld [vmem:[#allocation3 + $0x60] sm:$0xff]  ;;  %v3901_v23 = vand.u32 4294901760, %v3900_v26  ;;  %3826 = vmatmul.f32.vlgmr.msrb.gmra.mxu2 %v5739_v11  ;;  %v6011_v26 = vsub.f32 %v3458_v58, %v5996_v63 }
 0x32f   : > { %3945 = vmatpush.msra.mxu2 %v5891_v44  ;;  %3844 = vmatpush.msrb.mxu3 %v5822_v8  ;;  %v5923_v24 = vand.u32 4294901760, %v3421_v21  ;;  %v5927_v52 = vsub.f32 %v3416_v9, %v5914_v14  ;;  %v3907_v27 = vand.u32 4294901760, %v3906_v18 }
 0x330   : > { %3902 = vmatpush.msra.mxu1 %v3901_v23 }
 0x331   : > { %3948 = vmatpush.msra.mxu2 %v5894_v1  ;;  %3846 = vmatpush.msrb.mxu3 %v5829_v60  ;;  %v3910_v3 = vsub.f32 %v3421_v21, %v5923_v24  ;;  %v3917_v8 = vand.u32 4294901760, %v5927_v52 }
 0x332   : > { %3872 = vmatpush.msra.mxu0 %v5923_v24  ;;  %3908 = vmatpush.msra.mxu1 %v3907_v27  ;;  %v4295_v27 = vand.u32 4294901760, %v6011_v26 }
 0x333   : > { %3848 = vmatpush.msrb.mxu3 %v5862_v40  ;;  %v3268_v29 = vpop.permute.xlu0 %3267  ;;  %v3911_v17 = vand.u32 4294901760, %v3910_v3  ;;  %3951 = vmatpush.msra.mxu2 %v3910_v3  ;;  %v3918_v38 = vsub.f32 %v5927_v52, %v3917_v8  ;;  %v4098_v40 = vsub.f32 %v5935_v33, %v4097_v39 }
 0x334   : > { %3874 = vmatpush.msra.mxu0 %v5914_v14  ;;  %v3273_v60 = vsel %vm3269_vm1, %v5876_v48, %v3268_v29  ;;  %3283 = vst.msk [vmem:[#allocation3 + $0x70] sm:$0xf0] %vm2872_vm10, %v3268_v29  ;;  %v3351_v34 = vpop.permute.xlu1 %3350  ;;  %vm4655_vm1 = vcmask 605184  }
 0x335   : > { %3850 = vmatpush.msrb.mxu3 %v5837_v32  ;;  %3282 = vst [vmem:[#allocation3 + $0x68] sm:$0xf0] %v3273_v60  ;;  %v3356_v35 = vsel %vm3352_vm3, %v5806_v54, %v3351_v34  ;;  %v3411_v36 = vld [vmem:[#allocation3 + $0x10] sm:$0xff]  ;;  %v3912_v22 = vsub.f32 %v3910_v3, %v3911_v17  ;;  %3954 = vmatpush.msra.mxu2 %v5927_v52  ;;  %v3919_v30 = vand.u32 4294901760, %v3918_v38  ;;  %v4099_v47 = vand.u32 4294901760, %v4098_v40 }
 0x336   : > { %3852 = vmatmul.f32.vlgmr.msrb.gmra.mxu3 %v5739_v11  ;;  %3365 = vst [vmem:[#allocation3 + $0x90] sm:$0xf0] %v3356_v35  ;;  %v5947_v37 = vand.u32 4294901760, %v3411_v36  ;;  %vm4728_vm3 = vcmask 539648  }
 0x337   : > { %3976 = vmatpush.msra.mxu3 %v5884_v59  ;;  %3366 = vst.msk [vmem:[#allocation3 + $0x98] sm:$0xf0] %vm2872_vm10, %v3351_v34  ;;  %v3913_v32 = vand.u32 4294901760, %v3912_v22 }
 0x338   : > { %3876 = vmatpush.msra.mxu0 %v5947_v37  ;;  %v3922_v54 = vsub.f32 %v3411_v36, %v5947_v37 }
 0x339   : > { %3978 = vmatpush.msra.mxu3 %v5887_v46  ;;  %3914 = vmatpush.msra.mxu1 %v3913_v32 }
 0x33a   : > { %3882 = vmatmul.f32.vlgmr.msra.gmra.mxu0 %v5778_v16  ;;  %3957 = vmatpush.msra.mxu2 %v3922_v54  ;;  %v3923_v12 = vand.u32 4294901760, %v3922_v54 }
 0x33b   : > { %3980 = vmatpush.msra.mxu3 %v5923_v24  ;;  %4006 = vmatpush.msrb.mxu0 %v3899_v2 }
 0x33c   : > { %3920 = vmatpush.msra.mxu1 %v3919_v30  ;;  %4066 = vmatpush.msrb.mxu2 %v5920_v31  ;;  %v3103_v41 = vpop.permute.xlu0 %3102  ;;  %v3144_v13 = vpop.permute.xlu1 %3143  ;;  %v3924_v42 = vsub.f32 %v3922_v54, %v3923_v12  ;;  %v3422_v15 = vld [vmem:[#allocation3 + $0x68] sm:$0xff] }
 0x33d   : > { %3982 = vmatpush.msra.mxu3 %v5914_v14  ;;  %4010 = vmatpush.msrb.mxu0 %v3905_v4  ;;  %v3108_v19 = vsel %vm3104_vm8, %v5901_v6, %v3103_v41  ;;  %3118 = vst.msk [vmem:[#allocation3 + $0x20] sm:$0xf0] %vm2872_vm10, %v3103_v41  ;;  %v3148_v43 = vsel %vm2868_vm11, %v5808_v56, %v3144_v13  ;;  %v3427_v20 = vld [vmem:[#allocation3 + $0x90] sm:$0xff]  ;;  %v5972_v45 = vand.u32 4294901760, %v3422_v15  ;;  %vm4473_vm10 = vcmask 781824  }
 0x33e   : > { %3117 = vst [vmem:[#allocation3 + $0x18] sm:$0xf0] %v3108_v19  ;;  %3960 = vmatmul.f32.vlgmr.msra.gmra.mxu2 %v5755_v25  ;;  %v3925_v48 = vand.u32 4294901760, %v3924_v42  ;;  %v5975_v49 = vand.u32 4294901760, %v3427_v20  ;;  %v3428_v0 = vld [vmem:[#allocation3 + $0x98] sm:$0xff]  ;;  %v3423_v6 = vld [vmem:[#allocation3 + $0x70] sm:$0xff] }
 0x33f   : > { %3984 = vmatpush.msra.mxu3 %v5947_v37  ;;  %3157 = vst [vmem:[#allocation3 + $0x40] sm:$0xf] %v3148_v43  ;;  %4014 = vmatpush.msrb.mxu0 %v3911_v17  ;;  %v5979_v50 = vsub.f32 %v3422_v15, %v5972_v45  ;;  %v6005_v5 = vand.u32 4294901760, %v3428_v0  ;;  %v6015_v21 = vand.u32 4294901760, %v3423_v6  ;;  %vm4483_vm11 = vcmask 1044224  }
 0x340   : > { %3158 = vst.msk [vmem:[#allocation3 + $0x48] sm:$0xf] %vm3075_vm15, %v3144_v13  ;;  %3926 = vmatpush.msra.mxu1 %v3925_v48  ;;  %v4102_v56 = vsub.f32 %v3427_v20, %v5975_v49  ;;  %3988 = vmatmul.f32.vlgmr.msra.gmra.mxu3 %v5769_v28 }
 0x341   : > { %4100 = vmatpush.msrb.mxu3 %v4099_v47  ;;  %4018 = vmatpush.msrb.mxu0 %v3917_v8  ;;  %v4109_v53 = vand.u32 4294901760, %v5979_v50  ;;  %v4300_v23 = vsub.f32 %v3428_v0, %v6005_v5  ;;  %v4306_v17 = vsub.f32 %v3423_v6, %v6015_v21 }
 0x342   : > { %4068 = vmatpush.msrb.mxu2 %v5975_v49  ;;  %3928 = vmatmul.f32.vlgmr.msra.gmra.mxu1 %v5739_v11  ;;  %v4103_v55 = vand.u32 4294901760, %v4102_v56 }
 0x343   : > { %4022 = vmatpush.msrb.mxu0 %v3923_v12  ;;  %4040 = vmatpush.msrb.mxu1 %v5884_v59  ;;  %v4110_v62 = vsub.f32 %v5979_v50, %v4109_v53  ;;  %v4301_v60 = vand.u32 4294901760, %v4300_v23  ;;  %v4307_v36 = vand.u32 4294901760, %v4306_v17 }
 0x344   : > { %4070 = vmatpush.msrb.mxu2 %v5972_v45  ;;  %v4104_v61 = vsub.f32 %v4102_v56, %v4103_v55  ;;  %4024 = vmatmul.f32.vlgmr.msrb.gmra.mxu0 %v5739_v11  ;;  %v6049_v41 = vpop.permute.xlu1 %3437 }
 0x345   : > { %4143 = vmatpush.msra.mxu0 %v5935_v33  ;;  %4042 = vmatpush.msrb.mxu1 %v5887_v46  ;;  %v3412_v44 = vld [vmem:[#allocation3 + $0x18] sm:$0xff]  ;;  %v4111_v4 = vand.u32 4294901760, %v4110_v62  ;;  %v4296_v33 = vsub.f32 %v6011_v26, %v4295_v27  ;;  %v4308_v32 = vsub.f32 %v4306_v17, %v4307_v36 }
 0x346   : > { %v3417_v1 = vld [vmem:[#allocation3 + $0x40] sm:$0xff]  ;;  %v4105_v59 = vand.u32 4294901760, %v4104_v61  ;;  %v5998_v2 = vand.u32 4294901760, %v3412_v44 }
 0x347   : > { %4146 = vmatpush.msra.mxu0 %v4102_v56  ;;  %4044 = vmatpush.msrb.mxu1 %v5923_v24  ;;  %v6001_v57 = vand.u32 4294901760, %v3417_v1  ;;  %v3418_v10 = vld [vmem:[#allocation3 + $0x48] sm:$0xff]  ;;  %v4297_v38 = vand.u32 4294901760, %v4296_v33 }
 0x348   : > { %4106 = vmatpush.msrb.mxu3 %v4105_v59  ;;  %v4120_v46 = vsub.f32 %v3412_v44, %v5998_v2  ;;  %v6021_v52 = vand.u32 4294901760, %v3418_v10 }
 0x349   : > { %4149 = vmatpush.msra.mxu0 %v5979_v50  ;;  %4046 = vmatpush.msrb.mxu1 %v5914_v14  ;;  %v4114_v7 = vsub.f32 %v3417_v1, %v6001_v57  ;;  %v3413_v14 = vld [vmem:[#allocation3 + $0x20] sm:$0xff] }
 0x34a   : > { %4072 = vmatpush.msrb.mxu2 %v6001_v57  ;;  %4112 = vmatpush.msrb.mxu3 %v4111_v4  ;;  %v4121_v9 = vand.u32 4294901760, %v4120_v46  ;;  %v6028_v29 = vand.u32 4294901760, %v3413_v14  ;;  %v4312_v34 = vsub.f32 %v3418_v10, %v6021_v52 }
 0x34b   : > { %4048 = vmatpush.msrb.mxu1 %v5947_v37  ;;  %v4115_v18 = vand.u32 4294901760, %v4114_v7  ;;  %4152 = vmatpush.msra.mxu0 %v4114_v7  ;;  %v4302_v37 = vsub.f32 %v4300_v23, %v4301_v60 }
 0x34c   : > { %4074 = vmatpush.msrb.mxu2 %v5998_v2  ;;  %4050 = vmatmul.f32.vlgmr.msrb.gmra.mxu1 %v5739_v11  ;;  %v4122_v3 = vsub.f32 %v4120_v46, %v4121_v9  ;;  %v4318_v22 = vsub.f32 %v3413_v14, %v6028_v29 }
 0x34d   : > { %4174 = vmatpush.msra.mxu1 %v5920_v31  ;;  %4080 = vmatmul.f32.vlgmr.msrb.gmra.mxu2 %v5778_v16  ;;  %v4116_v24 = vsub.f32 %v4114_v7, %v4115_v18  ;;  %v4303_v30 = vand.u32 4294901760, %v4302_v37 }
 0x34e   : > { %4204 = vmatpush.msra.mxu2 %v4097_v39  ;;  %4155 = vmatpush.msra.mxu0 %v4120_v46  ;;  %v4123_v35 = vand.u32 4294901760, %v4122_v3  ;;  %v4313_v39 = vand.u32 4294901760, %v4312_v34  ;;  %v4319_v54 = vand.u32 4294901760, %v4318_v22 }
 0x34f   : > { %4176 = vmatpush.msra.mxu1 %v5975_v49  ;;  %v4117_v8 = vand.u32 4294901760, %v4116_v24  ;;  %4158 = vmatmul.f32.vlgmr.msra.gmra.mxu0 %v5755_v25 }
 0x350   : > { %4264 = vmatpush.msrb.mxu0 %v5996_v63  ;;  %4208 = vmatpush.msra.mxu2 %v4103_v55  ;;  %v4314_v40 = vsub.f32 %v4312_v34, %v4313_v39  ;;  %v4320_v13 = vsub.f32 %v4318_v22, %v4319_v54 }
 0x351   : > { %4178 = vmatpush.msra.mxu1 %v5972_v45  ;;  %4118 = vmatpush.msrb.mxu3 %v4117_v8 }
 0x352   : > { %4266 = vmatpush.msrb.mxu0 %v6005_v5  ;;  %4212 = vmatpush.msra.mxu2 %v4109_v53  ;;  %v4315_v15 = vand.u32 4294901760, %v4314_v40  ;;  %v4321_v19 = vand.u32 4294901760, %v4320_v13 }
 0x353   : > { %4180 = vmatpush.msra.mxu1 %v6001_v57  ;;  %4124 = vmatpush.msrb.mxu3 %v4123_v35 }
 0x354   : > { %4268 = vmatpush.msrb.mxu0 %v6015_v21  ;;  %4216 = vmatpush.msra.mxu2 %v4115_v18 }
 0x355   : > { %4182 = vmatpush.msra.mxu1 %v5998_v2  ;;  %4126 = vmatmul.f32.vlgmr.msrb.gmra.mxu3 %v5739_v11 }
 0x356   : > { %4220 = vmatpush.msra.mxu2 %v4121_v9  ;;  %4238 = vmatpush.msra.mxu3 %v5920_v31  ;;  %v3487_v12 = vpop.f32.mrf.mxu0  ;;  %v4309_v31 = vand.u32 4294901760, %v4308_v32 }
 0x357   : > { %4270 = vmatpush.msrb.mxu0 %v6021_v52  ;;  %4298 = vmatpush.msrb.mxu1 %v4297_v38  ;;  %v3488_v42 = vadd.f32 %v3487_v12, %v6049_v41 }
 0x358   : > { %4186 = vmatmul.f32.vlgmr.msra.gmra.mxu1 %v5769_v28  ;;  %4341 = vmatpush.msrb.mxu2 %v6011_v26 }
 0x359   : > { %4222 = vmatmul.f32.vlgmr.msra.gmra.mxu2 %v5739_v11  ;;  %4240 = vmatpush.msra.mxu3 %v5975_v49 }
 0x35a   : > { %4272 = vmatpush.msrb.mxu0 %v6028_v29  ;;  %4304 = vmatpush.msrb.mxu1 %v4303_v30 }
 0x35b   : > { %4278 = vmatmul.f32.vlgmr.msrb.gmra.mxu0 %v5778_v16  ;;  %4344 = vmatpush.msrb.mxu2 %v4300_v23 }
 0x35c   : > { %4402 = vmatpush.msra.mxu0 %v4295_v27  ;;  %4242 = vmatpush.msra.mxu3 %v5972_v45 }
 0x35d   : > { %4310 = vmatpush.msrb.mxu1 %v4309_v31  ;;  %4347 = vmatpush.msrb.mxu2 %v4306_v17 }
 0x35e   : > { %4406 = vmatpush.msra.mxu0 %v4301_v60  ;;  %4244 = vmatpush.msra.mxu3 %v6001_v57  ;;  %v3533_v43 = vpop.f32.mrf.mxu1  ;;  %v3565_v20 = vpop.f32.mrf.mxu2 }
 0x35f   : > { %4316 = vmatpush.msrb.mxu1 %v4315_v15  ;;  %4350 = vmatpush.msrb.mxu2 %v4312_v34  ;;  %v3534_v16 = vadd.f32 %v3533_v43, %v3488_v42  ;;  %v3593_v45 = vpop.f32.mrf.mxu3 }
 0x360   : > { %4410 = vmatpush.msra.mxu0 %v4307_v36  ;;  %4246 = vmatpush.msra.mxu3 %v5998_v2  ;;  %v3629_v48 = vpop.f32.mrf.mxu0 }
 0x361   : > { %4322 = vmatpush.msrb.mxu1 %v4321_v19  ;;  %4248 = vmatmul.f32.vlgmr.msra.gmra.mxu3 %v5739_v11  ;;  %v3566_v47 = vadd.f32 %v3565_v20, %v3534_v16 }
 0x362   : > { %4324 = vmatmul.f32.vlgmr.msrb.gmra.mxu1 %v5739_v11  ;;  %4353 = vmatpush.msrb.mxu2 %v4318_v22 }
 0x363   : > { %4372 = vmatpush.msrb.mxu3 %v5996_v63  ;;  %4414 = vmatpush.msra.mxu0 %v4313_v39  ;;  %v3594_v49 = vadd.f32 %v3593_v45, %v3566_v47 }
 0x364   : > { %4436 = vmatpush.msra.mxu1 %v5996_v63  ;;  %4356 = vmatmul.f32.vlgmr.msrb.gmra.mxu2 %v5755_v25 }
 0x365   : > { %4374 = vmatpush.msrb.mxu3 %v6005_v5  ;;  %4418 = vmatpush.msra.mxu0 %v4319_v54  ;;  %v3630_v50 = vadd.f32 %v3629_v48, %v3594_v49 }
 0x366   : > { %4438 = vmatpush.msra.mxu1 %v6005_v5  ;;  %4420 = vmatmul.f32.vlgmr.msra.gmra.mxu0 %v5739_v11 }
 0x367   : > { %4376 = vmatpush.msrb.mxu3 %v6015_v21 }
 0x368   : > { %v3655_v51 = vpop.f32.mrf.mxu1  ;;  %4440 = vmatpush.msra.mxu1 %v6015_v21 }
 0x369   : > { %v3656_v56 = vadd.f32 %v3655_v51, %v3630_v50  ;;  %4378 = vmatpush.msrb.mxu3 %v6021_v52 }
 0x36a   : > { %4442 = vmatpush.msra.mxu1 %v6021_v52 }
 0x36b   : > { %4450 = vst [vmem:[#allocation4] sm:$0xff] %v3656_v56  ;;  %4380 = vmatpush.msrb.mxu3 %v6028_v29 }
 0x36c   : > { %4444 = vmatpush.msra.mxu1 %v6028_v29  ;;  %4384 = vmatmul.f32.vlgmr.msrb.gmra.mxu3 %v5769_v28 }
 0x36d   : > { %4446 = vmatmul.f32.vlgmr.msra.gmra.mxu1 %v5739_v11 }
 0x372   : > { %v4458_v25 = vld [vmem:[#allocation4] sm:$0xf0]  ;;  %v4485_v53 = vld [vmem:[#allocation4] sm:$0xf] }
 0x373   : > { %4460 = vst.sshfl [vmem:[#allocation1] sm:$0xff pattern:$0x75316420] %v4458_v25  ;;  %v4468_v55 = vld [vmem:[#allocation4] sm:$0xf]  ;;  %4487 = vrot.lane.b32.xlu2 %v4485_v53, %s5130_s12  ;;  %s6077_s12 = scalar_lea.vmem [#allocation10], %s4854_s24 }
 0x374   : > { %4470 = vrot.lane.b32.xlu0 %v4468_v55, %s5135_s19  ;;  %v4475_v58 = vld [vmem:[#allocation4] sm:$0xf0]  ;;  %v4456_v63 = vld [vmem:[#allocation4] sm:$0xf]  ;;  %s5142_s19 = smov 44   ;;  %s5146_s24 = smov 36  }
 0x375   : > { %v4491_v62 = vld [vmem:[#allocation4] sm:$0xf0]  ;;  %4457 = vst.msk [vmem:[%s6077_s12] sm:$0xf] %vm3075_vm15, %v4456_v63  ;;  %v4500_v39 = vld [vmem:[#allocation4] sm:$0xf] }
 0x376   : > { %v4513_v11 = vld [vmem:[#allocation4] sm:$0xf0] }
 0x37a   : > { %v4462_v61 = vld [vmem:[#allocation1 + $0x1] ss:$2 sm:$0xff] }
 0x37b   : > { %4477 = vst.sshfl [vmem:[#allocation1] sm:$0xff pattern:$0x75316420] %v4475_v58  ;;  %4463 = vrot.lane.b32.xlu2 %v4462_v61, %s5112_s26  ;;  %s5137_s26 = smov 52  }
 0x382   : > { %v4479_v44 = vld [vmem:[#allocation1 + $0x1] ss:$2 sm:$0xff] }
 0x383   : > { %4493 = vst.sshfl [vmem:[#allocation1] sm:$0xff pattern:$0x75316420] %v4491_v62  ;;  %4480 = vrot.lane.b32.xlu1 %v4479_v44, %s5136_s7  ;;  %s5145_s7 = smov 54  }
 0x38a   : > { %v4495_v28 = vld [vmem:[#allocation1 + $0x1] ss:$2 sm:$0xff] }
 0x38b   : > { %4517 = vst.sshfl [vmem:[#allocation1] sm:$0xff pattern:$0x75316420] %v4513_v11  ;;  %4496 = vrot.lane.b32.xlu0 %v4495_v28, %s5127_s25  ;;  %s5138_s25 = smov 120  }
 0x3a3   : > { %v3791_v4 = vpop.f32.mrf.mxu1 }
 0x3a7   : > { %v3685_v0 = vpop.f32.mrf.mxu2 }
 0x3a8   : > { %v3686_v1 = vadd.f32 %v3685_v0, %v6049_v41 }
 0x3a9   : > { %v3763_v57 = vpop.f32.mrf.mxu0 }
 0x3af   : > { %v3731_v59 = vpop.f32.mrf.mxu3 }
 0x3b0   : > { %v3732_v2 = vadd.f32 %v3731_v59, %v3686_v1 }
 0x3b1   : > { %v3827_v5 = vpop.f32.mrf.mxu2 }
 0x3b2   : > { %v3764_v46 = vadd.f32 %v3763_v57, %v3732_v2 }
 0x3b4   : > { %v3792_v6 = vadd.f32 %v3791_v4, %v3764_v46 }
 0x3b6   : > { %v3828_v7 = vadd.f32 %v3827_v5, %v3792_v6 }
 0x3b7   : > { %v3883_v10 = vpop.f32.mrf.mxu0 }
 0x3b8   : > { %v3884_v18 = vadd.f32 %v3883_v10, %v6049_v41 }
 0x3b9   : > { %v3853_v26 = vpop.f32.mrf.mxu3 }
 0x3ba   : > { %v3854_v9 = vadd.f32 %v3853_v26, %v3828_v7 }
 0x3bc   : > { %4451 = vst [vmem:[#allocation4 + $0x8] sm:$0xff] %v3854_v9 }
 0x3bf   : > { %v3929_v21 = vpop.f32.mrf.mxu1 }
 0x3c0   : > { %v3930_v14 = vadd.f32 %v3929_v21, %v3884_v18 }
 0x3c1   : > { %v3961_v23 = vpop.f32.mrf.mxu2  ;;  %v4025_v3 = vpop.f32.mrf.mxu0 }
 0x3c2   : > { %v3962_v24 = vadd.f32 %v3961_v23, %v3930_v14 }
 0x3c3   : > { %v4514_v52 = vld [vmem:[#allocation4 + $0x8] sm:$0xf0]  ;;  %v3989_v27 = vpop.f32.mrf.mxu3  ;;  %v4558_v29 = vld [vmem:[#allocation4 + $0x8] sm:$0xf] }
 0x3c4   : > { %4518 = vst.sshfl [vmem:[#allocation1 + $0x8] sm:$0xff pattern:$0x75316420] %v4514_v52  ;;  %v3990_v8 = vadd.f32 %v3989_v27, %v3962_v24  ;;  %v4528_v17 = vld [vmem:[#allocation4 + $0x8] sm:$0xf]  ;;  %4560 = vrot.lane.b32.xlu1 %v4558_v29, %s5137_s26  ;;  %s5147_s26 = smov 104  }
 0x3c5   : > { %4530 = vrot.lane.b32.xlu0 %v4528_v17, %s5138_s25  ;;  %v4543_v60 = vld [vmem:[#allocation4 + $0x8] sm:$0xf]  ;;  %v4534_v38 = vld [vmem:[#allocation4 + $0x8] sm:$0xf0]  ;;  %s5148_s25 = smov 74  }
 0x3c6   : > { %v4501_v33 = vld [vmem:[#allocation4 + $0x8] sm:$0xf]  ;;  %4545 = vrot.lane.b32.xlu2 %v4543_v60, %s5139_s5  ;;  %v4026_v34 = vadd.f32 %v4025_v3, %v3990_v8  ;;  %v4549_v40 = vld [vmem:[#allocation4 + $0x8] sm:$0xf0]  ;;  %s5149_s5 = smov 114  }
 0x3c7   : > { %v4504_v36 = vrot.slane %v4501_v33, 4  ;;  %v4564_v47 = vld [vmem:[#allocation4 + $0x8] sm:$0xf0]  ;;  %v4573_v56 = vld [vmem:[#allocation4 + $0x8] sm:$0xf] }
 0x3c8   : > { %v4586_v61 = vld [vmem:[#allocation4 + $0x8] sm:$0xf0] }
 0x3c9   : > { %v4051_v35 = vpop.f32.mrf.mxu1  ;;  %v4505_v32 = vsel %vm3444_vm7, %v4500_v39, %v4504_v36 }
 0x3ca   : > { %v4052_v22 = vadd.f32 %v4051_v35, %v4026_v34 }
 0x3cb   : > { %v4520_v37 = vld [vmem:[#allocation1 + $0x1] ss:$2 sm:$0xff] }
 0x3cc   : > { %4536 = vst.sshfl [vmem:[#allocation1] sm:$0xff pattern:$0x75316420] %v4534_v38  ;;  %4506 = vrot.lane.b32.xlu1 %v4505_v32, %s5140_s28  ;;  %v4159_v16 = vpop.f32.mrf.mxu0  ;;  %s5150_s28 = smov 66  }
 0x3cd   : > { %4452 = vst [vmem:[#allocation4 + $0x10] sm:$0xff] %v4052_v22  ;;  %v4488_v54 = vpop.permute.xlu2 %4487 }
 0x3ce   : > { %4521 = vrot.lane.b32.xlu2 %v4520_v37, %s5141_s14  ;;  %4490 = vst.msk [vmem:[%s6077_s12 + $0x4] sm:$0xf] %vm3075_vm15, %v4488_v54  ;;  %s5153_s14 = smov 38  }
 0x3d0   : > { %v4081_v12 = vpop.f32.mrf.mxu2 }
 0x3d1   : > { %v4082_v15 = vadd.f32 %v4081_v12, %v6049_v41 }
 0x3d3   : > { %v4538_v30 = vld [vmem:[#allocation1 + $0x1] ss:$2 sm:$0xff] }
 0x3d4   : > { %4551 = vst.sshfl [vmem:[#allocation1] sm:$0xff pattern:$0x75316420] %v4549_v40  ;;  %v4631_v31 = vld [vmem:[#allocation4 + $0x10] sm:$0xf]  ;;  %4539 = vrot.lane.b32.xlu1 %v4538_v30, %s5125_s20  ;;  %s5143_s20 = smov 82  }
 0x3d5   : > { %v4601_v13 = vld [vmem:[#allocation4 + $0x10] sm:$0xf]  ;;  %v4464_v42 = vpop.permute.xlu2 %4463  ;;  %4633 = vrot.lane.b32.xlu0 %v4631_v31, %s5142_s19  ;;  %v4187_v50 = vpop.f32.mrf.mxu1  ;;  %v4587_v44 = vld [vmem:[#allocation4 + $0x10] sm:$0xf0] }
 0x3d6   : > { %4603 = vrot.lane.b32.xlu2 %v4601_v13, %s5107_s23  ;;  %4467 = vst.msk [vmem:[%s6077_s12] sm:$0xf] %vm4466_vm9, %v4464_v42  ;;  %v4574_v19 = vld [vmem:[#allocation4 + $0x10] sm:$0xf]  ;;  %s5144_s23 = smov 14  }
 0x3d7   : > { %v4577_v45 = vrot.slane %v4574_v19, 4  ;;  %v4616_v53 = vld [vmem:[#allocation4 + $0x10] sm:$0xf]  ;;  %v4607_v57 = vld [vmem:[#allocation4 + $0x10] sm:$0xf0] }
 0x3d8   : > { %v4127_v43 = vpop.f32.mrf.mxu3  ;;  %v4279_v0 = vpop.f32.mrf.mxu0  ;;  %v4646_v23 = vld [vmem:[#allocation4 + $0x10] sm:$0xf]  ;;  %v4622_v8 = vld [vmem:[#allocation4 + $0x10] sm:$0xf0] }
 0x3d9   : > { %v4128_v20 = vadd.f32 %v4127_v43, %v4082_v15  ;;  %v4578_v25 = vsel %vm3444_vm7, %v4573_v56, %v4577_v45  ;;  %v4280_v59 = vadd.f32 %v4279_v0, %v6049_v41  ;;  %v4637_v60 = vld [vmem:[#allocation4 + $0x10] sm:$0xf0] }
 0x3da   : > { %v4659_v22 = vld [vmem:[#allocation4 + $0x10] sm:$0xf0] }
 0x3db   : > { %v4160_v48 = vadd.f32 %v4159_v16, %v4128_v20  ;;  %v4553_v49 = vld [vmem:[#allocation1 + $0x1] ss:$2 sm:$0xff] }
 0x3dc   : > { %4566 = vst.sshfl [vmem:[#allocation1] sm:$0xff pattern:$0x75316420] %v4564_v47  ;;  %v4223_v55 = vpop.f32.mrf.mxu2 }
 0x3dd   : > { %v4188_v51 = vadd.f32 %v4187_v50, %v4160_v48  ;;  %4579 = vrot.lane.b32.xlu0 %v4578_v25, %s5143_s20 }
 0x3de   : > { %4618 = vrot.lane.b32.xlu2 %v4616_v53, %s5144_s23 }
 0x3df   : > { %v4224_v58 = vadd.f32 %v4223_v55, %v4188_v51  ;;  %v4325_v1 = vpop.f32.mrf.mxu1 }
 0x3e0   : > { %v4326_v4 = vadd.f32 %v4325_v1, %v4280_v59 }
 0x3e3   : > { %v4568_v62 = vld [vmem:[#allocation1 + $0x1] ss:$2 sm:$0xff]  ;;  %v4421_v26 = vpop.f32.mrf.mxu0 }
 0x3e4   : > { %v4249_v11 = vpop.f32.mrf.mxu3  ;;  %4590 = vst.sshfl [vmem:[#allocation1] sm:$0xff pattern:$0x75316420] %v4586_v61 }
 0x3e5   : > { %v4250_v28 = vadd.f32 %v4249_v11, %v4224_v58  ;;  %4591 = vst.sshfl [vmem:[#allocation1 + $0x8] sm:$0xff pattern:$0x75316420] %v4587_v44  ;;  %4554 = vrot.lane.b32.xlu0 %v4553_v49, %s5145_s7  ;;  %s4761_s7 = sshll.u32 %s6077_s12, 4  ;;  %s4762_s7 = int_to_ptr.vmem [resolvable:$true] %s4761_s7 }
 0x3e6   : > { %v4471_v63 = vpop.permute.xlu0 %4470 }
 0x3e7   : > { %4453 = vst [vmem:[#allocation4 + $0x18] sm:$0xff] %v4250_v28  ;;  %v4357_v2 = vpop.f32.mrf.mxu2 }
 0x3e8   : > { %4474 = vst.msk [vmem:[%s6077_s12] sm:$0xf] %vm4473_vm10, %v4471_v63  ;;  %v4358_v5 = vadd.f32 %v4357_v2, %v4326_v4 }
 0x3ea   : > { %v4447_v21 = vpop.f32.mrf.mxu1 }
 0x3ec   : > { %v4593_v46 = vld [vmem:[#allocation1 + $0x1] ss:$2 sm:$0xff] }
 0x3ed   : > { %4609 = vst.sshfl [vmem:[#allocation1] sm:$0xff pattern:$0x75316420] %v4607_v57 }
 0x3ee   : > { %v4704_v7 = vld [vmem:[#allocation4 + $0x18] sm:$0xf]  ;;  %v4660_v38 = vld [vmem:[#allocation4 + $0x18] sm:$0xf0] }
 0x3ef   : > { %v4385_v6 = vpop.f32.mrf.mxu3  ;;  %4706 = vrot.lane.b32.xlu0 %v4704_v7, %s5146_s24  ;;  %v4674_v10 = vld [vmem:[#allocation4 + $0x18] sm:$0xf]  ;;  %v4680_v39 = vld [vmem:[#allocation4 + $0x18] sm:$0xf0] }
 0x3f0   : > { %v4386_v9 = vadd.f32 %v4385_v6, %v4358_v5  ;;  %v4647_v18 = vld [vmem:[#allocation4 + $0x18] sm:$0xf]  ;;  %4676 = vrot.lane.b32.xlu2 %v4674_v10, %s5147_s26  ;;  %v4695_v54 = vld [vmem:[#allocation4 + $0x18] sm:$0xf0]  ;;  %s4748_s26 = scalar_lea.sflag [#allocation7], %s5272_s9 }
 0x3f1   : > { %v4650_v14 = vrot.slane %v4647_v18, 4  ;;  %v4719_v35 = vld [vmem:[#allocation4 + $0x18] sm:$0xf]  ;;  %v4710_v40 = vld [vmem:[#allocation4 + $0x18] sm:$0xf0] }
 0x3f2   : > { %v4422_v41 = vadd.f32 %v4421_v26, %v4386_v9  ;;  %v4689_v12 = vld [vmem:[#allocation4 + $0x18] sm:$0xf]  ;;  %v4732_v42 = vld [vmem:[#allocation4 + $0x18] sm:$0xf0] }
 0x3f3   : > { %v4651_v24 = vsel %vm3444_vm7, %v4646_v23, %v4650_v14 }
 0x3f4   : > { %v4448_v52 = vadd.f32 %v4447_v21, %v4422_v41  ;;  %4652 = vrot.lane.b32.xlu1 %v4651_v24, %s5148_s25  ;;  %v4611_v3 = vld [vmem:[#allocation1 + $0x1] ss:$2 sm:$0xff] }
 0x3f5   : > { %v4481_v27 = vpop.permute.xlu1 %4480  ;;  %4624 = vst.sshfl [vmem:[#allocation1] sm:$0xff pattern:$0x75316420] %v4622_v8 }
 0x3f6   : > { %4484 = vst.msk [vmem:[%s6077_s12] sm:$0xf] %vm4483_vm11, %v4481_v27 }
 0x3f7   : > { %4455 = vst.msk [vmem:[#allocation4 + $0x20] sm:$0xff] %vm4454_vm12, %v4448_v52  ;;  %4612 = vrot.lane.b32.xlu0 %v4611_v3, %s5113_s27  ;;  %s5151_s27 = smov 106  }
 0x3f8   : > { %4569 = vrot.lane.b32.xlu2 %v4568_v62, %s5123_s21  ;;  %s5152_s21 = smov 6  }
 0x3fc   : > { %4594 = vrot.lane.b32.xlu1 %v4593_v46, %s5149_s5  ;;  %v4626_v33 = vld [vmem:[#allocation1 + $0x1] ss:$2 sm:$0xff] }
 0x3fd   : > { %v4497_v29 = vpop.permute.xlu0 %4496  ;;  %4639 = vst.sshfl [vmem:[#allocation1] sm:$0xff pattern:$0x75316420] %v4637_v60 }
 0x3fe   : > { %4499 = vst.msk [vmem:[%s6077_s12 + $0x4] sm:$0xf] %vm4466_vm9, %v4497_v29  ;;  %v4720_v17 = vld [vmem:[#allocation4 + $0x20] sm:$0xf]  ;;  %v4733_v19 = vld [vmem:[#allocation4 + $0x20] sm:$0xf0] }
 0x3ff   : > { %v4723_v34 = vrot.slane %v4720_v17, 4 }
 0x401   : > { %v4724_v36 = vsel %vm3444_vm7, %v4719_v35, %v4723_v34 }
 0x402   : > { %4725 = vrot.lane.b32.xlu2 %v4724_v36, %s5150_s28 }
 0x404   : > { %v4641_v37 = vld [vmem:[#allocation1 + $0x1] ss:$2 sm:$0xff] }
 0x405   : > { %4663 = vst.sshfl [vmem:[#allocation1] sm:$0xff pattern:$0x75316420] %v4659_v22 }
 0x406   : > { %4664 = vst.sshfl [vmem:[#allocation1 + $0x8] sm:$0xff pattern:$0x75316420] %v4660_v38 }
 0x40a   : > { %4642 = vrot.lane.b32.xlu2 %v4641_v37, %s5119_s13  ;;  %s5155_s13 = smov 46  }
 0x40d   : > { %v4666_v32 = vld [vmem:[#allocation1 + $0x1] ss:$2 sm:$0xff] }
 0x40e   : > { %4667 = vrot.lane.b32.xlu1 %v4666_v32, %s5151_s27  ;;  %4682 = vst.sshfl [vmem:[#allocation1] sm:$0xff pattern:$0x75316420] %v4680_v39  ;;  %s5052_s27 = scalar_lea.hbm %s6196_s4, 64 }
 0x415   : > { %v4684_v30 = vld [vmem:[#allocation1 + $0x1] ss:$2 sm:$0xff] }
 0x416   : > { %4685 = vrot.lane.b32.xlu0 %v4684_v30, %s5117_s11  ;;  %4697 = vst.sshfl [vmem:[#allocation1] sm:$0xff pattern:$0x75316420] %v4695_v54  ;;  %s5154_s11 = smov 98  }
 0x41d   : > { %v4699_v31 = vld [vmem:[#allocation1 + $0x1] ss:$2 sm:$0xff] }
 0x41e   : > { %4691 = vrot.lane.b32.xlu0 %v4689_v12, %s5152_s21  ;;  %4700 = vrot.lane.b32.xlu2 %v4699_v31, %s5153_s14  ;;  %4712 = vst.sshfl [vmem:[#allocation1] sm:$0xff pattern:$0x75316420] %v4710_v40 }
 0x420   : > { %v4546_v13 = vpop.permute.xlu2 %4545 }
 0x425   : > { %v4714_v15 = vld [vmem:[#allocation1 + $0x1] ss:$2 sm:$0xff] }
 0x426   : > { %4715 = vrot.lane.b32.xlu1 %v4714_v15, %s5115_s30  ;;  %4736 = vst.sshfl [vmem:[#allocation1] sm:$0xff pattern:$0x75316420] %v4732_v42  ;;  %s4861_s30 = sshll.u32 %s5205_s22, 5 }
 0x427   : > { %4737 = vst.sshfl [vmem:[#allocation1 + $0x8] sm:$0xff pattern:$0x75316420] %v4733_v19  ;;  %s4759_s23 = scalar_lea.hbm %s6196_s4, %s4861_s30 }
 0x428   : > { %v4522_v43 = vpop.permute.xlu2 %4521  ;;  %s4763_s24 = sshll.u32 %s4759_s23, 4  ;;  %s4764_s24 = int_to_ptr.hbm [resolvable:$true] %s4763_s24 }
 0x429   : > { %v4523_v48 = vrot.slane %v4522_v43, 4  ;;  %s5046_s22 = sshra.s32 %s4764_s24, 4  ;;  %s5047_s22 = int_to_ptr.hbm [resolvable:$true] %s5046_s22 }
 0x42a   : > { %s5048_s25 = scalar_lea.hbm %s5047_s22, 32  ;;  %p5053_p12 = scmp.lt.s32.totalorder %s5047_s22, %s6196_s4 }
 0x42b   : > { %v4525_v25 = vsel %vm4524_vm14, %v4522_v43, %v4523_v48  ;;  %p5049_p1 = scmp.ne.s32.totalorder %s5047_s22, %s5048_s25  ;;  %p5054_p8 = scmp.lt.s32.totalorder %s5052_s27, %s5048_s25 }
 0x42d   : > { %p5050_p3 = pnand %p5049_p1, %p5241_p13  ;;  %p5055_p7 = por %p5054_p8, %p5053_p12 }
 0x42e   : > { %v4739_v20 = vld [vmem:[#allocation1 + $0x1] ss:$2 sm:$0xff] }
 0x42f   : > { %4740 = vrot.lane.b32.xlu1 %v4739_v20, %s5154_s11  ;;  %p5051_p5 = pneg %p5050_p3 }
 0x430   : > { %v4604_v16 = vpop.permute.xlu2 %4603 }
 0x431   : > { %4606 = vst.msk [vmem:[%s6077_s12 + $0x10] sm:$0xf] %vm3075_vm15, %v4604_v16  ;;  %p5056_p9 = pnand %p5055_p7, %p5051_p5 }
 0x436   : > { %v4561_v45 = vpop.permute.xlu1 %4560 }
 0x437   : > { %v4531_v47 = vpop.permute.xlu0 %4530  ;;  %4627 = vrot.lane.b32.xlu1 %v4626_v33, %s5155_s13  ;;  %4563 = vst.msk [vmem:[%s6077_s12 + $0xc] sm:$0xf] %vm3075_vm15, %v4561_v45 }
 0x438   : > { %4533 = vst.msk [vmem:[%s6077_s12 + $0x8] sm:$0xf] %vm3075_vm15, %v4531_v47  ;;  %v4619_v51 = vpop.permute.xlu2 %4618 }
 0x43e   : > { %v4507_v49 = vpop.permute.xlu1 %4506 }
 0x43f   : > { %v4508_v50 = vrot.slane %v4507_v49, 4 }
 0x441   : > { %v4510_v56 = vsel %vm4509_vm13, %v4507_v49, %v4508_v50 }
 0x442   : > { %4512 = vst.msk [vmem:[%s6077_s12 + $0x4] sm:$0xf] %vm4473_vm10, %v4510_v56 }
 0x443   : > { %4527 = vst.msk [vmem:[%s6077_s12 + $0x4] sm:$0xf] %vm4483_vm11, %v4525_v25 }
 0x446   : > { %v4540_v53 = vpop.permute.xlu1 %4539 }
 0x447   : > { %v4634_v55 = vpop.permute.xlu0 %4633  ;;  %4542 = vst.msk [vmem:[%s6077_s12 + $0x8] sm:$0xf] %vm4466_vm9, %v4540_v53 }
 0x448   : > { %4636 = vst.msk [vmem:[%s6077_s12 + $0x14] sm:$0xf] %vm3075_vm15, %v4634_v55 }
 0x449   : > { %4548 = vst.msk [vmem:[%s6077_s12 + $0x8] sm:$0xf] %vm4473_vm10, %v4546_v13 }
 0x44a   : > { %v4677_v58 = vpop.permute.xlu2 %4676 }
 0x44b   : > { %4679 = vst.msk [vmem:[%s6077_s12 + $0x18] sm:$0xf] %vm3075_vm15, %v4677_v58 }
 0x44f   : > { %v4580_v61 = vpop.permute.xlu0 %4579 }
 0x450   : > { %v4581_v62 = vrot.slane %v4580_v61, 4 }
 0x452   : > { %v4570_v44 = vpop.permute.xlu2 %4569  ;;  %v4583_v11 = vsel %vm4582_vm0, %v4580_v61, %v4581_v62 }
 0x453   : > { %4572 = vst.msk [vmem:[%s6077_s12 + $0xc] sm:$0xf] %vm4466_vm9, %v4570_v44 }
 0x454   : > { %4585 = vst.msk [vmem:[%s6077_s12 + $0xc] sm:$0xf] %vm4473_vm10, %v4583_v11 }
 0x457   : > { %v4555_v28 = vpop.permute.xlu0 %4554 }
 0x458   : > { %4557 = vst.msk [vmem:[%s6077_s12 + $0x8] sm:$0xf] %vm4483_vm11, %v4555_v28 }
 0x45c   : > { %v4726_v63 = vpop.permute.xlu2 %4725 }
 0x45d   : > { %v4727_v14 = vrot.slane %v4726_v63, 4 }
 0x45f   : > { %v4729_v23 = vsel %vm4728_vm3, %v4726_v63, %v4727_v14 }
 0x461   : > { %v4707_v0 = vpop.permute.xlu0 %4706 }
 0x462   : > { %4709 = vst.msk [vmem:[%s6077_s12 + $0x1c] sm:$0xf] %vm3075_vm15, %v4707_v0  ;;  %vm4670_vm15 = vcmask 867328  }
 0x464   : > { %v4643_v1 = vpop.permute.xlu2 %4642 }
 0x465   : > { %4645 = vst.msk [vmem:[%s6077_s12 + $0x14] sm:$0xf] %vm4466_vm9, %v4643_v1 }
 0x466   : > { %v4653_v59 = vpop.permute.xlu1 %4652 }
 0x467   : > { %v4654_v2 = vrot.slane %v4653_v59, 4 }
 0x469   : > { %v4656_v57 = vsel %vm4655_vm1, %v4653_v59, %v4654_v2  ;;  %v4613_v4 = vpop.permute.xlu0 %4612 }
 0x46a   : > { %4658 = vst.msk [vmem:[%s6077_s12 + $0x14] sm:$0xf] %vm4473_vm10, %v4656_v57 }
 0x46b   : > { %4615 = vst.msk [vmem:[%s6077_s12 + $0x10] sm:$0xf] %vm4466_vm9, %v4613_v4 }
 0x46c   : > { %4621 = vst.msk [vmem:[%s6077_s12 + $0x10] sm:$0xf] %vm4473_vm10, %v4619_v51 }
 0x46e   : > { %v4595_v46 = vpop.permute.xlu1 %4594 }
 0x46f   : > { %v4596_v5 = vrot.slane %v4595_v46, 4 }
 0x471   : > { %v4598_v6 = vsel %vm4597_vm2, %v4595_v46, %v4596_v5 }
 0x472   : > { %4600 = vst.msk [vmem:[%s6077_s12 + $0xc] sm:$0xf] %vm4483_vm11, %v4598_v6 }
 0x478   : > { %v4701_v21 = vpop.permute.xlu2 %4700 }
 0x480   : > { %v4668_v7 = vpop.permute.xlu1 %4667 }
 0x481   : > { %v4669_v26 = vrot.slane %v4668_v7, 4 }
 0x483   : > { %v4671_v9 = vsel %vm4670_vm15, %v4668_v7, %v4669_v26 }
 0x484   : > { %4673 = vst.msk [vmem:[%s6077_s12 + $0x14] sm:$0xf] %vm4483_vm11, %v4671_v9 }
 0x488   : > { %v4686_v10 = vpop.permute.xlu0 %4685 }
 0x489   : > { %4688 = vst.msk [vmem:[%s6077_s12 + $0x18] sm:$0xf] %vm4466_vm9, %v4686_v10 }
 0x490   : > { %v4692_v18 = vpop.permute.xlu0 %4691 }
 0x491   : > { %4694 = vst.msk [vmem:[%s6077_s12 + $0x18] sm:$0xf] %vm4473_vm10, %v4692_v18 }
 0x492   : > { %4703 = vst.msk [vmem:[%s6077_s12 + $0x18] sm:$0xf] %vm4483_vm11, %v4701_v21 }
 0x498   : > { %v4716_v41 = vpop.permute.xlu1 %4715 }
 0x499   : > { %4718 = vst.msk [vmem:[%s6077_s12 + $0x1c] sm:$0xf] %vm4466_vm9, %v4716_v41 }
 0x49a   : > { %4731 = vst.msk [vmem:[%s6077_s12 + $0x1c] sm:$0xf] %vm4473_vm10, %v4729_v23 }
 0x4a1   : > { %v4741_v24 = vpop.permute.xlu1 %4740 }
 0x4a2   : > { %v4742_v52 = vrot.slane %v4741_v24, 4 }
 0x4a4   : > { %v4744_v27 = vsel %vm4743_vm4, %v4741_v24, %v4742_v52 }
 0x4a5   : > { %4746 = vst.msk [vmem:[%s6077_s12 + $0x1c] sm:$0xf] %vm4483_vm11, %v4744_v27 }
 0x4a9   : > { %v4628_v3 = vpop.permute.xlu1 %4627 }
 0x4aa   : > { %4630 = vst.msk [vmem:[%s6077_s12 + $0x10] sm:$0xf] %vm4483_vm11, %v4628_v3 }
 0x4ab   : > { %5059 = shalt.err (!%p5056_p9)
}
 0x4ac   : > { %4868 = dma.vmem_to_hbm [thread:$0]  (%p5241_p13), %s4762_s7, 512, %s4764_s24, %s4748_s26  }
 0x4ad PF: > { %s4775_s9 = sand.u32 1, %s5090_s15   ;;  %p6202_p10 = scmp.ge.s32.totalorder %s5102_s18, 2 }
 0x4ae   : > { %s4776_s12 = scalar_lea.sflag [#allocation7], %s4775_s9 }
 0x4af   : > { %p4879_p11 = pnand %p6202_p10, %p5246_p4 }
 0x4b1   : > { %p4880_p0 = pneg %p4879_p11 }
 0x4b3   : > { %5085 = dma.done.wait (%p4880_p0), %s4776_s12, 512  }
 0x4b4   : > { %5087 = vsyncadd (%p4880_p0), %s4776_s12, 4294966784  ;;  %p18_p2 = scmp.ge.s32.totalorder %s5221_s29, 4   ;;  %s6203_s15 = smov %s5094_s16 }
 0x4b5   : > { %s6204_s16 = smov %s5098_s17  ;;  %s6205_s17 = smov %s5233_s6 }
 0x4b6   : > { %s6206_s18 = smov %s5221_s29  ;;  %20 = sbr.rel (!%p18_p2) target bundleno = 6 (0x6), region = 123 }
 0x4bb   :  { %4782 = vsyncpa [#allocation6], 1 }
 0x4bc   :  { %4784 = vsyncpa [#allocation6 + $0x1], 1 }
 0x4bd   :  { %4785 = vsyncpa [#allocation9], 1 }
 0x4be   :  { %4786 = vsyncpa [#allocation7], 1 }
 0x4bf   :  { %4788 = vsyncpa [#allocation7 + $0x1], 1 }

</bundles_post_ra>
